<compile_context>
chip_gen: v5e
topology: v5e:2x2
jax: 0.10.0
libtpu: 0.0.40
codegen_flags: <defaults>
</compile_context>

<pallas_src>
import functools

import jax
import jax.numpy as jnp
from jax.experimental import pallas as pl
from jax.experimental.pallas import tpu as pltpu


# ----------------------------------------------------------------------------
# Fused forward kernel
# ----------------------------------------------------------------------------
def _lstm_cell(gates, c, H):
    """PyTorch LSTM cell update from pre-activation gates (B, 4H)."""
    i_g = jax.nn.sigmoid(gates[:, 0:H])
    f_g = jax.nn.sigmoid(gates[:, H:2 * H])
    g_g = jnp.tanh(gates[:, 2 * H:3 * H])
    o_g = jax.nn.sigmoid(gates[:, 3 * H:4 * H])
    c_new = f_g * c + i_g * g_g
    h_new = o_g * jnp.tanh(c_new)
    return h_new, c_new


def fused_forward_kernel(src1_ref, src2_ref,
                         e_wih_ref, e_whh_ref, e_b_ref,      # enhancement LSTM(1, Hl)
                         e_fw_ref, e_fb_ref,                 # enhancement fc (Hl -> 6)
                         p_w_ref, p_b_ref,                   # encoder pre_fc (I -> I)
                         l_wih_ref, l_whh_ref, l_b_ref,      # encoder LSTM (I -> H)
                         f_w_ref, f_b_ref,                   # encoder fc (H -> O)
                         dp_w_ref, dp_b_ref,                 # decoder pre_fc (O+1 -> O+1)
                         d_wih_ref, d_whh_ref, d_b_ref,      # decoder LSTM (O+1 -> H)
                         dfo_w_ref, dfo_b_ref,               # decoder fc_out (H -> O)
                         out_ref,                            # (Tdec+1, B, O)
                         enh_hseq_scr,                       # VMEM (T, B, Hl)
                         *, prec_window):
    T, B, F = src1_ref.shape
    Td = src2_ref.shape[0]
    Hl = e_whh_ref.shape[0]
    H = l_whh_ref.shape[0]
    O = dfo_w_ref.shape[1]
    S1 = e_fw_ref.shape[1]          # = 6 (enhancement fc output features)
    f32 = jnp.float32
    dot = functools.partial(jnp.dot, preferred_element_type=f32)

    # ---- hoist all weights / biases out of the loops ------------------------
    src1 = src1_ref[...]            # (T, B, F)
    e_whh = e_whh_ref[...]
    l_whh = l_whh_ref[...]
    d_wih = d_wih_ref[...]
    d_whh = d_whh_ref[...]
    d_b = d_b_ref[...]
    dp_w_cur = dp_w_ref[0:O, :]     # rows multiplying current_input
    dfo_w = dfo_w_ref[...]
    dfo_b = dfo_b_ref[...]
    f_w = f_w_ref[...]
    f_b = f_b_ref[...]

    # ---- 1. enhancement LSTM over feature 0 ---------------------------------
    # input projection hoisted off the serial chain (K=1 -> broadcast multiply)
    x0_2d = src1[:, :, 0:1].reshape(T * B, 1)
    enh_xproj = (x0_2d * e_wih_ref[...] + e_b_ref[...]).reshape(T, B, 4 * Hl)

    h = jnp.zeros((B, Hl), f32)
    c = jnp.zeros((B, Hl), f32)
    for t in range(T):                                  # fully unrolled
        gates = enh_xproj[t] + dot(h, e_whh)
        h, c = _lstm_cell(gates, c, Hl)
        enh_hseq_scr[t] = h

    # ---- 2. enhancement fc + encoder pre_fc (concat-free) + ReLU ------------
    hseq_2d = enh_hseq_scr[...].reshape(T * B, Hl)
    out_src1_2d = dot(hseq_2d, e_fw_ref[...]) + e_fb_ref[...]        # (T*B, 6)
    rest_2d = src1[:, :, 1:].reshape(T * B, F - 1)
    # [out_src1 | src1[:,:,1:]] @ W_pre  ==  out_src1 @ W[:6] + rest @ W[6:]
    pre_2d = (dot(out_src1_2d, p_w_ref[0:S1, :])
              + dot(rest_2d, p_w_ref[S1:, :])
              + p_b_ref[...])
    pre_2d = jnp.maximum(pre_2d, 0.0)                                # (T*B, I)

    # ---- 3. encoder LSTM (input projection hoisted) -------------------------
    enc_xproj = (dot(pre_2d, l_wih_ref[...]) + l_b_ref[...]).reshape(T, B, 4 * H)
    idx_prec = (T - prec_window) % T        # encoder_outputs[:, -prec_window, :]

    h = jnp.zeros((B, H), f32)
    c = jnp.zeros((B, H), f32)
    h_prec = h
    for t in range(T):                                  # fully unrolled
        gates = enc_xproj[t] + dot(h, l_whh)
        h, c = _lstm_cell(gates, c, H)
        if t == idx_prec:
            h_prec = h

    # encoder fc only on the two rows actually consumed
    prec_out = dot(h_prec, f_w) + f_b       # (B, O)   prepended output
    cur = dot(h, f_w) + f_b                 # (B, O)   encoder_outputs[:, -1, :]
    out_ref[0] = prec_out

    # ---- 4. decoder autoregressive loop (teacher_forcing_ratio == 0) --------
    # TODO(synk): python-random teacher forcing branch is nondeterministic; run
    # with teacher_forcing_ratio = 0.0 (pure autoregressive feedback).
    p_2d = src2_ref[...].reshape(Td * B, 1)
    # [cur | p] @ W_pre = cur @ W[:O] + p * W[O];  p-term + bias hoisted off chain
    pterm = (p_2d * dp_w_ref[O:O + 1, :] + dp_b_ref[...]).reshape(Td, B, O + 1)

    for t in range(Td):                                 # fully unrolled
        x = jnp.maximum(dot(cur, dp_w_cur) + pterm[t], 0.0)          # pre_fc + relu
        gates = dot(x, d_wih) + dot(h, d_whh) + d_b
        h, c = _lstm_cell(gates, c, H)
        cur = dot(h, dfo_w) + dfo_b                                  # fc_out (dropout=id)
        out_ref[1 + t] = cur


# ----------------------------------------------------------------------------
# Wrapper
# ----------------------------------------------------------------------------
def data_enhanced_forward(params, src1, src2, token, *, trg_len, prec_window):
    del token  # only consulted for teacher forcing; ratio fixed to 0.0
    B, T, F = src1.shape
    Td = trg_len
    O = params["dec"]["fc"]["w"].shape[1]
    Hl = params["enh_lstm"]["whh"].shape[0]

    # pad batch to a multiple of 8 sublanes (compute identical, layout friendly)
    Bp = ((B + 7) // 8) * 8
    if Bp != B:
        src1 = jnp.pad(src1, ((0, Bp - B), (0, 0), (0, 0)))
        src2 = jnp.pad(src2, ((0, Bp - B), (0, 0), (0, 0)))

    src1_tm = jnp.transpose(src1, (1, 0, 2))                  # (T, Bp, F)
    src2_tm = jnp.transpose(src2[:, :Td, :], (1, 0, 2))       # (Td, Bp, 1)

    vmem = pl.BlockSpec(memory_space=pltpu.MemorySpace.VMEM)
    kernel = functools.partial(fused_forward_kernel, prec_window=prec_window)

    out_tm = pl.pallas_call(
        kernel,
        out_shape=jax.ShapeDtypeStruct((Td + 1, Bp, O), jnp.float32),
        in_specs=[vmem] * 21,
        out_specs=vmem,
        scratch_shapes=[pltpu.VMEM((T, Bp, Hl), jnp.float32)],
    )(src1_tm, src2_tm,
      params["enh_lstm"]["wih"], params["enh_lstm"]["whh"], params["enh_lstm"]["b"],
      params["enh_fc"]["w"], params["enh_fc"]["b"],
      params["enc_pre"]["w"], params["enc_pre"]["b"],
      params["enc_lstm"]["wih"], params["enc_lstm"]["whh"], params["enc_lstm"]["b"],
      params["enc_fc"]["w"], params["enc_fc"]["b"],
      params["dec"]["pre"]["w"], params["dec"]["pre"]["b"],
      params["dec"]["lstm"]["wih"], params["dec"]["lstm"]["whh"], params["dec"]["lstm"]["b"],
      params["dec"]["fc"]["w"], params["dec"]["fc"]["b"])

    out = jnp.transpose(out_tm, (1, 0, 2))                    # (Bp, Td+1, O)
    return out[:B]


# ----------------------------------------------------------------------------
# Parameter init (deterministic, PyTorch-default-style uniform ranges)
# ----------------------------------------------------------------------------
def _linear_params(key, fan_in, fan_out):
    k1, k2 = jax.random.split(key)
    bound = float(fan_in) ** -0.5
    w = jax.random.uniform(k1, (fan_in, fan_out), jnp.float32, -bound, bound)
    b = jax.random.uniform(k2, (1, fan_out), jnp.float32, -bound, bound)
    return {"w": w, "b": b}


def _lstm_params(key, in_dim, hid):
    k1, k2, k3, k4 = jax.random.split(key, 4)
    bound = float(hid) ** -0.5
    wih = jax.random.uniform(k1, (in_dim, 4 * hid), jnp.float32, -bound, bound)
    whh = jax.random.uniform(k2, (hid, 4 * hid), jnp.float32, -bound, bound)
    b_ih = jax.random.uniform(k3, (1, 4 * hid), jnp.float32, -bound, bound)
    b_hh = jax.random.uniform(k4, (1, 4 * hid), jnp.float32, -bound, bound)
    return {"wih": wih, "whh": whh, "b": b_ih + b_hh}


def init_params(key, *, src1_feat, hidden_length, input_size, output_size, hidden_size):
    del src1_feat
    keys = jax.random.split(key, 8)
    return {
        # DataEnhancedModel extras: LSTM(1, hidden_length), Linear(hidden_length, 6)
        "enh_lstm": _lstm_params(keys[0], 1, hidden_length),
        "enh_fc": _linear_params(keys[1], hidden_length, 6),
        # Encoder
        "enc_pre": _linear_params(keys[2], input_size, input_size),
        "enc_lstm": _lstm_params(keys[3], input_size, hidden_size),
        "enc_fc": _linear_params(keys[4], hidden_size, output_size),
        # Decoder
        "dec": {
            "pre": _linear_params(keys[5], output_size + 1, output_size + 1),
            "lstm": _lstm_params(keys[6], output_size + 1, hidden_size),
            "fc": _linear_params(keys[7], hidden_size, output_size),
        },
    }


# ----------------------------------------------------------------------------
if __name__ == "__main__":
    B, T, F = 2, 8, 5            # src1: batch, history length, features
    HIDDEN_LENGTH = 16           # DataEnhancedModel extra LSTM hidden
    INPUT_SIZE = 6 + (F - 1)     # combined encoder input = 10
    OUTPUT_SIZE = 2
    HIDDEN_SIZE = 32
    TRG_LEN = 4                  # forecast_length
    PREC_WINDOW = 1

    key = jax.random.PRNGKey(0)
    k1, k2, k3 = jax.random.split(key, 3)
    src1 = jax.random.normal(k1, (B, T, F), jnp.float32)
    src2 = jax.random.normal(k2, (B, TRG_LEN, 1), jnp.float32)
    token = jax.random.normal(k3, (B, PREC_WINDOW + TRG_LEN, OUTPUT_SIZE), jnp.float32)

    params = init_params(jax.random.PRNGKey(42),
                         src1_feat=F, hidden_length=HIDDEN_LENGTH,
                         input_size=INPUT_SIZE, output_size=OUTPUT_SIZE,
                         hidden_size=HIDDEN_SIZE)

    fwd = jax.jit(functools.partial(data_enhanced_forward,
                                    trg_len=TRG_LEN, prec_window=PREC_WINDOW))
    out = fwd(params, src1, src2, token)
    out = jax.block_until_ready(out)
    assert out.shape == (B, TRG_LEN + 1, OUTPUT_SIZE), out.shape
    assert bool(jnp.all(jnp.isfinite(out)))
    print("KERNEL_OK")
</pallas_src>

<mosaic_0001>
module attributes {stable_mosaic.version = 11 : i64} {
  func.func @fused_forward_kernel(%arg0: memref<8x8x5xf32, #tpu.memory_space<vmem>>, %arg1: memref<4x8x1xf32, #tpu.memory_space<vmem>>, %arg2: memref<1x64xf32, #tpu.memory_space<vmem>>, %arg3: memref<16x64xf32, #tpu.memory_space<vmem>>, %arg4: memref<1x64xf32, #tpu.memory_space<vmem>>, %arg5: memref<16x6xf32, #tpu.memory_space<vmem>>, %arg6: memref<1x6xf32, #tpu.memory_space<vmem>>, %arg7: memref<10x10xf32, #tpu.memory_space<vmem>>, %arg8: memref<1x10xf32, #tpu.memory_space<vmem>>, %arg9: memref<10x128xf32, #tpu.memory_space<vmem>>, %arg10: memref<32x128xf32, #tpu.memory_space<vmem>>, %arg11: memref<1x128xf32, #tpu.memory_space<vmem>>, %arg12: memref<32x2xf32, #tpu.memory_space<vmem>>, %arg13: memref<1x2xf32, #tpu.memory_space<vmem>>, %arg14: memref<3x3xf32, #tpu.memory_space<vmem>>, %arg15: memref<1x3xf32, #tpu.memory_space<vmem>>, %arg16: memref<3x128xf32, #tpu.memory_space<vmem>>, %arg17: memref<32x128xf32, #tpu.memory_space<vmem>>, %arg18: memref<1x128xf32, #tpu.memory_space<vmem>>, %arg19: memref<32x2xf32, #tpu.memory_space<vmem>>, %arg20: memref<1x2xf32, #tpu.memory_space<vmem>>, %arg21: memref<5x8x2xf32, #tpu.memory_space<vmem>>, %arg22: memref<8x8x16xf32, #tpu.memory_space<vmem>>) attributes {dimension_semantics = [], scalar_prefetch = 0 : i64, scratch_operands = 1 : i64, tpu.core_type = #tpu.core_type<tc>} {
    %c0 = arith.constant 0 : index
    %c0_0 = arith.constant 0 : index
    %c0_1 = arith.constant 0 : index
    %0 = vector.load %arg0[%c0, %c0_0, %c0_1] : memref<8x8x5xf32, #tpu.memory_space<vmem>>, vector<8x8x5xf32>
    %c0_2 = arith.constant 0 : index
    %c0_3 = arith.constant 0 : index
    %1 = vector.load %arg3[%c0_2, %c0_3] : memref<16x64xf32, #tpu.memory_space<vmem>>, vector<16x64xf32>
    %c0_4 = arith.constant 0 : index
    %c0_5 = arith.constant 0 : index
    %2 = vector.load %arg10[%c0_4, %c0_5] : memref<32x128xf32, #tpu.memory_space<vmem>>, vector<32x128xf32>
    %c0_6 = arith.constant 0 : index
    %c0_7 = arith.constant 0 : index
    %3 = vector.load %arg16[%c0_6, %c0_7] : memref<3x128xf32, #tpu.memory_space<vmem>>, vector<3x128xf32>
    %c0_8 = arith.constant 0 : index
    %c0_9 = arith.constant 0 : index
    %4 = vector.load %arg17[%c0_8, %c0_9] : memref<32x128xf32, #tpu.memory_space<vmem>>, vector<32x128xf32>
    %c0_10 = arith.constant 0 : index
    %c0_11 = arith.constant 0 : index
    %5 = vector.load %arg18[%c0_10, %c0_11] : memref<1x128xf32, #tpu.memory_space<vmem>>, vector<1x128xf32>
    %c0_12 = arith.constant 0 : index
    %c0_13 = arith.constant 0 : index
    %6 = vector.load %arg14[%c0_12, %c0_13] : memref<3x3xf32, #tpu.memory_space<vmem>>, vector<2x3xf32>
    %c0_14 = arith.constant 0 : index
    %c0_15 = arith.constant 0 : index
    %7 = vector.load %arg19[%c0_14, %c0_15] : memref<32x2xf32, #tpu.memory_space<vmem>>, vector<32x2xf32>
    %c0_16 = arith.constant 0 : index
    %c0_17 = arith.constant 0 : index
    %8 = vector.load %arg20[%c0_16, %c0_17] : memref<1x2xf32, #tpu.memory_space<vmem>>, vector<1x2xf32>
    %c0_18 = arith.constant 0 : index
    %c0_19 = arith.constant 0 : index
    %9 = vector.load %arg12[%c0_18, %c0_19] : memref<32x2xf32, #tpu.memory_space<vmem>>, vector<32x2xf32>
    %c0_20 = arith.constant 0 : index
    %c0_21 = arith.constant 0 : index
    %10 = vector.load %arg13[%c0_20, %c0_21] : memref<1x2xf32, #tpu.memory_space<vmem>>, vector<1x2xf32>
    %11 = vector.extract_strided_slice %0 {offsets = [0, 0, 0], sizes = [8, 8, 1], strides = [1, 1, 1]} : vector<8x8x5xf32> to vector<8x8x1xf32>
    %12 = vector.shape_cast %11 : vector<8x8x1xf32> to vector<64x1xf32>
    %c0_22 = arith.constant 0 : index
    %c0_23 = arith.constant 0 : index
    %13 = vector.load %arg2[%c0_22, %c0_23] : memref<1x64xf32, #tpu.memory_space<vmem>>, vector<1x64xf32>
    %14 = vector.broadcast %12 : vector<64x1xf32> to vector<64x64xf32>
    %15 = vector.broadcast %13 : vector<1x64xf32> to vector<64x64xf32>
    %16 = arith.mulf %14, %15 : vector<64x64xf32>
    %c0_24 = arith.constant 0 : index
    %c0_25 = arith.constant 0 : index
    %17 = vector.load %arg4[%c0_24, %c0_25] : memref<1x64xf32, #tpu.memory_space<vmem>>, vector<1x64xf32>
    %18 = vector.broadcast %17 : vector<1x64xf32> to vector<64x64xf32>
    %19 = arith.addf %16, %18 : vector<64x64xf32>
    %20 = vector.shape_cast %19 : vector<64x64xf32> to vector<8x8x64xf32>
    %cst = arith.constant 0.000000e+00 : f32
    %21 = vector.broadcast %cst : f32 to vector<8x16xf32>
    %cst_26 = arith.constant 0.000000e+00 : f32
    %22 = vector.broadcast %cst_26 : f32 to vector<8x16xf32>
    %23 = vector.extract_strided_slice %20 {offsets = [0, 0, 0], sizes = [1, 8, 64], strides = [1, 1, 1]} : vector<8x8x64xf32> to vector<1x8x64xf32>
    %24 = vector.shape_cast %23 : vector<1x8x64xf32> to vector<8x64xf32>
    %cst_27 = arith.constant dense<0.000000e+00> : vector<8x64xf32>
    %25 = tpu.matmul %21, %1, %cst_27 {dimension_numbers = #tpu.dot_dimension_numbers<[1], [0], [0], [1], [0, 0, 1, 1], [], []>} : vector<8x16xf32>, vector<16x64xf32>, vector<8x64xf32> -> vector<8x64xf32>
    %26 = arith.addf %24, %25 : vector<8x64xf32>
    %27 = vector.extract_strided_slice %26 {offsets = [0, 0], sizes = [8, 16], strides = [1, 1]} : vector<8x64xf32> to vector<8x16xf32>
    %28 = arith.negf %27 : vector<8x16xf32>
    %29 = math.exp %28 : vector<8x16xf32>
    %cst_28 = arith.constant 1.000000e+00 : f32
    %30 = vector.broadcast %cst_28 : f32 to vector<8x16xf32>
    %31 = arith.addf %30, %29 : vector<8x16xf32>
    %32 = arith.divf %30, %31 : vector<8x16xf32>
    %33 = vector.extract_strided_slice %26 {offsets = [0, 16], sizes = [8, 16], strides = [1, 1]} : vector<8x64xf32> to vector<8x16xf32>
    %34 = arith.negf %33 : vector<8x16xf32>
    %35 = math.exp %34 : vector<8x16xf32>
    %cst_29 = arith.constant 1.000000e+00 : f32
    %36 = vector.broadcast %cst_29 : f32 to vector<8x16xf32>
    %37 = arith.addf %36, %35 : vector<8x16xf32>
    %38 = arith.divf %36, %37 : vector<8x16xf32>
    %39 = vector.extract_strided_slice %26 {offsets = [0, 32], sizes = [8, 16], strides = [1, 1]} : vector<8x64xf32> to vector<8x16xf32>
    %40 = math.tanh %39 : vector<8x16xf32>
    %41 = vector.extract_strided_slice %26 {offsets = [0, 48], sizes = [8, 16], strides = [1, 1]} : vector<8x64xf32> to vector<8x16xf32>
    %42 = arith.negf %41 : vector<8x16xf32>
    %43 = math.exp %42 : vector<8x16xf32>
    %cst_30 = arith.constant 1.000000e+00 : f32
    %44 = vector.broadcast %cst_30 : f32 to vector<8x16xf32>
    %45 = arith.addf %44, %43 : vector<8x16xf32>
    %46 = arith.divf %44, %45 : vector<8x16xf32>
    %47 = arith.mulf %38, %22 : vector<8x16xf32>
    %48 = arith.mulf %32, %40 : vector<8x16xf32>
    %49 = arith.addf %47, %48 : vector<8x16xf32>
    %50 = math.tanh %49 : vector<8x16xf32>
    %51 = arith.mulf %46, %50 : vector<8x16xf32>
    %c0_31 = arith.constant 0 : index
    %c0_32 = arith.constant 0 : index
    %c0_33 = arith.constant 0 : index
    %52 = vector.load %arg22[%c0_31, %c0_32, %c0_33] : memref<8x8x16xf32, #tpu.memory_space<vmem>>, vector<1x8x16xf32>
    %53 = vector.shape_cast %52 : vector<1x8x16xf32> to vector<8x16xf32>
    %54 = vector.shape_cast %51 : vector<8x16xf32> to vector<1x8x16xf32>
    tpu.vector_store %arg22[%c0_31, %c0_32, %c0_33], %54 {strides = array<i32>} : memref<8x8x16xf32, #tpu.memory_space<vmem>>, vector<1x8x16xf32>,
    %55 = vector.extract_strided_slice %20 {offsets = [1, 0, 0], sizes = [1, 8, 64], strides = [1, 1, 1]} : vector<8x8x64xf32> to vector<1x8x64xf32>
    %56 = vector.shape_cast %55 : vector<1x8x64xf32> to vector<8x64xf32>
    %cst_34 = arith.constant dense<0.000000e+00> : vector<8x64xf32>
    %57 = tpu.matmul %51, %1, %cst_34 {dimension_numbers = #tpu.dot_dimension_numbers<[1], [0], [0], [1], [0, 0, 1, 1], [], []>} : vector<8x16xf32>, vector<16x64xf32>, vector<8x64xf32> -> vector<8x64xf32>
    %58 = arith.addf %56, %57 : vector<8x64xf32>
    %59 = vector.extract_strided_slice %58 {offsets = [0, 0], sizes = [8, 16], strides = [1, 1]} : vector<8x64xf32> to vector<8x16xf32>
    %60 = arith.negf %59 : vector<8x16xf32>
    %61 = math.exp %60 : vector<8x16xf32>
    %cst_35 = arith.constant 1.000000e+00 : f32
    %62 = vector.broadcast %cst_35 : f32 to vector<8x16xf32>
    %63 = arith.addf %62, %61 : vector<8x16xf32>
    %64 = arith.divf %62, %63 : vector<8x16xf32>
    %65 = vector.extract_strided_slice %58 {offsets = [0, 16], sizes = [8, 16], strides = [1, 1]} : vector<8x64xf32> to vector<8x16xf32>
    %66 = arith.negf %65 : vector<8x16xf32>
    %67 = math.exp %66 : vector<8x16xf32>
    %cst_36 = arith.constant 1.000000e+00 : f32
    %68 = vector.broadcast %cst_36 : f32 to vector<8x16xf32>
    %69 = arith.addf %68, %67 : vector<8x16xf32>
    %70 = arith.divf %68, %69 : vector<8x16xf32>
    %71 = vector.extract_strided_slice %58 {offsets = [0, 32], sizes = [8, 16], strides = [1, 1]} : vector<8x64xf32> to vector<8x16xf32>
    %72 = math.tanh %71 : vector<8x16xf32>
    %73 = vector.extract_strided_slice %58 {offsets = [0, 48], sizes = [8, 16], strides = [1, 1]} : vector<8x64xf32> to vector<8x16xf32>
    %74 = arith.negf %73 : vector<8x16xf32>
    %75 = math.exp %74 : vector<8x16xf32>
    %cst_37 = arith.constant 1.000000e+00 : f32
    %76 = vector.broadcast %cst_37 : f32 to vector<8x16xf32>
    %77 = arith.addf %76, %75 : vector<8x16xf32>
    %78 = arith.divf %76, %77 : vector<8x16xf32>
    %79 = arith.mulf %70, %49 : vector<8x16xf32>
    %80 = arith.mulf %64, %72 : vector<8x16xf32>
    %81 = arith.addf %79, %80 : vector<8x16xf32>
    %82 = math.tanh %81 : vector<8x16xf32>
    %83 = arith.mulf %78, %82 : vector<8x16xf32>
    %c1 = arith.constant 1 : index
    %c0_38 = arith.constant 0 : index
    %c0_39 = arith.constant 0 : index
    %84 = vector.load %arg22[%c1, %c0_38, %c0_39] : memref<8x8x16xf32, #tpu.memory_space<vmem>>, vector<1x8x16xf32>
    %85 = vector.shape_cast %84 : vector<1x8x16xf32> to vector<8x16xf32>
    %86 = vector.shape_cast %83 : vector<8x16xf32> to vector<1x8x16xf32>
    tpu.vector_store %arg22[%c1, %c0_38, %c0_39], %86 {strides = array<i32>} : memref<8x8x16xf32, #tpu.memory_space<vmem>>, vector<1x8x16xf32>,
    %87 = vector.extract_strided_slice %20 {offsets = [2, 0, 0], sizes = [1, 8, 64], strides = [1, 1, 1]} : vector<8x8x64xf32> to vector<1x8x64xf32>
    %88 = vector.shape_cast %87 : vector<1x8x64xf32> to vector<8x64xf32>
    %cst_40 = arith.constant dense<0.000000e+00> : vector<8x64xf32>
    %89 = tpu.matmul %83, %1, %cst_40 {dimension_numbers = #tpu.dot_dimension_numbers<[1], [0], [0], [1], [0, 0, 1, 1], [], []>} : vector<8x16xf32>, vector<16x64xf32>, vector<8x64xf32> -> vector<8x64xf32>
    %90 = arith.addf %88, %89 : vector<8x64xf32>
    %91 = vector.extract_strided_slice %90 {offsets = [0, 0], sizes = [8, 16], strides = [1, 1]} : vector<8x64xf32> to vector<8x16xf32>
    %92 = arith.negf %91 : vector<8x16xf32>
    %93 = math.exp %92 : vector<8x16xf32>
    %cst_41 = arith.constant 1.000000e+00 : f32
    %94 = vector.broadcast %cst_41 : f32 to vector<8x16xf32>
    %95 = arith.addf %94, %93 : vector<8x16xf32>
    %96 = arith.divf %94, %95 : vector<8x16xf32>
    %97 = vector.extract_strided_slice %90 {offsets = [0, 16], sizes = [8, 16], strides = [1, 1]} : vector<8x64xf32> to vector<8x16xf32>
    %98 = arith.negf %97 : vector<8x16xf32>
    %99 = math.exp %98 : vector<8x16xf32>
    %cst_42 = arith.constant 1.000000e+00 : f32
    %100 = vector.broadcast %cst_42 : f32 to vector<8x16xf32>
    %101 = arith.addf %100, %99 : vector<8x16xf32>
    %102 = arith.divf %100, %101 : vector<8x16xf32>
    %103 = vector.extract_strided_slice %90 {offsets = [0, 32], sizes = [8, 16], strides = [1, 1]} : vector<8x64xf32> to vector<8x16xf32>
    %104 = math.tanh %103 : vector<8x16xf32>
    %105 = vector.extract_strided_slice %90 {offsets = [0, 48], sizes = [8, 16], strides = [1, 1]} : vector<8x64xf32> to vector<8x16xf32>
    %106 = arith.negf %105 : vector<8x16xf32>
    %107 = math.exp %106 : vector<8x16xf32>
    %cst_43 = arith.constant 1.000000e+00 : f32
    %108 = vector.broadcast %cst_43 : f32 to vector<8x16xf32>
    %109 = arith.addf %108, %107 : vector<8x16xf32>
    %110 = arith.divf %108, %109 : vector<8x16xf32>
    %111 = arith.mulf %102, %81 : vector<8x16xf32>
    %112 = arith.mulf %96, %104 : vector<8x16xf32>
    %113 = arith.addf %111, %112 : vector<8x16xf32>
    %114 = math.tanh %113 : vector<8x16xf32>
    %115 = arith.mulf %110, %114 : vector<8x16xf32>
    %c2 = arith.constant 2 : index
    %c0_44 = arith.constant 0 : index
    %c0_45 = arith.constant 0 : index
    %116 = vector.load %arg22[%c2, %c0_44, %c0_45] : memref<8x8x16xf32, #tpu.memory_space<vmem>>, vector<1x8x16xf32>
    %117 = vector.shape_cast %116 : vector<1x8x16xf32> to vector<8x16xf32>
    %118 = vector.shape_cast %115 : vector<8x16xf32> to vector<1x8x16xf32>
    tpu.vector_store %arg22[%c2, %c0_44, %c0_45], %118 {strides = array<i32>} : memref<8x8x16xf32, #tpu.memory_space<vmem>>, vector<1x8x16xf32>,
    %119 = vector.extract_strided_slice %20 {offsets = [3, 0, 0], sizes = [1, 8, 64], strides = [1, 1, 1]} : vector<8x8x64xf32> to vector<1x8x64xf32>
    %120 = vector.shape_cast %119 : vector<1x8x64xf32> to vector<8x64xf32>
    %cst_46 = arith.constant dense<0.000000e+00> : vector<8x64xf32>
    %121 = tpu.matmul %115, %1, %cst_46 {dimension_numbers = #tpu.dot_dimension_numbers<[1], [0], [0], [1], [0, 0, 1, 1], [], []>} : vector<8x16xf32>, vector<16x64xf32>, vector<8x64xf32> -> vector<8x64xf32>
    %122 = arith.addf %120, %121 : vector<8x64xf32>
    %123 = vector.extract_strided_slice %122 {offsets = [0, 0], sizes = [8, 16], strides = [1, 1]} : vector<8x64xf32> to vector<8x16xf32>
    %124 = arith.negf %123 : vector<8x16xf32>
    %125 = math.exp %124 : vector<8x16xf32>
    %cst_47 = arith.constant 1.000000e+00 : f32
    %126 = vector.broadcast %cst_47 : f32 to vector<8x16xf32>
    %127 = arith.addf %126, %125 : vector<8x16xf32>
    %128 = arith.divf %126, %127 : vector<8x16xf32>
    %129 = vector.extract_strided_slice %122 {offsets = [0, 16], sizes = [8, 16], strides = [1, 1]} : vector<8x64xf32> to vector<8x16xf32>
    %130 = arith.negf %129 : vector<8x16xf32>
    %131 = math.exp %130 : vector<8x16xf32>
    %cst_48 = arith.constant 1.000000e+00 : f32
    %132 = vector.broadcast %cst_48 : f32 to vector<8x16xf32>
    %133 = arith.addf %132, %131 : vector<8x16xf32>
    %134 = arith.divf %132, %133 : vector<8x16xf32>
    %135 = vector.extract_strided_slice %122 {offsets = [0, 32], sizes = [8, 16], strides = [1, 1]} : vector<8x64xf32> to vector<8x16xf32>
    %136 = math.tanh %135 : vector<8x16xf32>
    %137 = vector.extract_strided_slice %122 {offsets = [0, 48], sizes = [8, 16], strides = [1, 1]} : vector<8x64xf32> to vector<8x16xf32>
    %138 = arith.negf %137 : vector<8x16xf32>
    %139 = math.exp %138 : vector<8x16xf32>
    %cst_49 = arith.constant 1.000000e+00 : f32
    %140 = vector.broadcast %cst_49 : f32 to vector<8x16xf32>
    %141 = arith.addf %140, %139 : vector<8x16xf32>
    %142 = arith.divf %140, %141 : vector<8x16xf32>
    %143 = arith.mulf %134, %113 : vector<8x16xf32>
    %144 = arith.mulf %128, %136 : vector<8x16xf32>
    %145 = arith.addf %143, %144 : vector<8x16xf32>
    %146 = math.tanh %145 : vector<8x16xf32>
    %147 = arith.mulf %142, %146 : vector<8x16xf32>
    %c3 = arith.constant 3 : index
    %c0_50 = arith.constant 0 : index
    %c0_51 = arith.constant 0 : index
    %148 = vector.load %arg22[%c3, %c0_50, %c0_51] : memref<8x8x16xf32, #tpu.memory_space<vmem>>, vector<1x8x16xf32>
    %149 = vector.shape_cast %148 : vector<1x8x16xf32> to vector<8x16xf32>
    %150 = vector.shape_cast %147 : vector<8x16xf32> to vector<1x8x16xf32>
    tpu.vector_store %arg22[%c3, %c0_50, %c0_51], %150 {strides = array<i32>} : memref<8x8x16xf32, #tpu.memory_space<vmem>>, vector<1x8x16xf32>,
    %151 = vector.extract_strided_slice %20 {offsets = [4, 0, 0], sizes = [1, 8, 64], strides = [1, 1, 1]} : vector<8x8x64xf32> to vector<1x8x64xf32>
    %152 = vector.shape_cast %151 : vector<1x8x64xf32> to vector<8x64xf32>
    %cst_52 = arith.constant dense<0.000000e+00> : vector<8x64xf32>
    %153 = tpu.matmul %147, %1, %cst_52 {dimension_numbers = #tpu.dot_dimension_numbers<[1], [0], [0], [1], [0, 0, 1, 1], [], []>} : vector<8x16xf32>, vector<16x64xf32>, vector<8x64xf32> -> vector<8x64xf32>
    %154 = arith.addf %152, %153 : vector<8x64xf32>
    %155 = vector.extract_strided_slice %154 {offsets = [0, 0], sizes = [8, 16], strides = [1, 1]} : vector<8x64xf32> to vector<8x16xf32>
    %156 = arith.negf %155 : vector<8x16xf32>
    %157 = math.exp %156 : vector<8x16xf32>
    %cst_53 = arith.constant 1.000000e+00 : f32
    %158 = vector.broadcast %cst_53 : f32 to vector<8x16xf32>
    %159 = arith.addf %158, %157 : vector<8x16xf32>
    %160 = arith.divf %158, %159 : vector<8x16xf32>
    %161 = vector.extract_strided_slice %154 {offsets = [0, 16], sizes = [8, 16], strides = [1, 1]} : vector<8x64xf32> to vector<8x16xf32>
    %162 = arith.negf %161 : vector<8x16xf32>
    %163 = math.exp %162 : vector<8x16xf32>
    %cst_54 = arith.constant 1.000000e+00 : f32
    %164 = vector.broadcast %cst_54 : f32 to vector<8x16xf32>
    %165 = arith.addf %164, %163 : vector<8x16xf32>
    %166 = arith.divf %164, %165 : vector<8x16xf32>
    %167 = vector.extract_strided_slice %154 {offsets = [0, 32], sizes = [8, 16], strides = [1, 1]} : vector<8x64xf32> to vector<8x16xf32>
    %168 = math.tanh %167 : vector<8x16xf32>
    %169 = vector.extract_strided_slice %154 {offsets = [0, 48], sizes = [8, 16], strides = [1, 1]} : vector<8x64xf32> to vector<8x16xf32>
    %170 = arith.negf %169 : vector<8x16xf32>
    %171 = math.exp %170 : vector<8x16xf32>
    %cst_55 = arith.constant 1.000000e+00 : f32
    %172 = vector.broadcast %cst_55 : f32 to vector<8x16xf32>
    %173 = arith.addf %172, %171 : vector<8x16xf32>
    %174 = arith.divf %172, %173 : vector<8x16xf32>
    %175 = arith.mulf %166, %145 : vector<8x16xf32>
    %176 = arith.mulf %160, %168 : vector<8x16xf32>
    %177 = arith.addf %175, %176 : vector<8x16xf32>
    %178 = math.tanh %177 : vector<8x16xf32>
    %179 = arith.mulf %174, %178 : vector<8x16xf32>
    %c4 = arith.constant 4 : index
    %c0_56 = arith.constant 0 : index
    %c0_57 = arith.constant 0 : index
    %180 = vector.load %arg22[%c4, %c0_56, %c0_57] : memref<8x8x16xf32, #tpu.memory_space<vmem>>, vector<1x8x16xf32>
    %181 = vector.shape_cast %180 : vector<1x8x16xf32> to vector<8x16xf32>
    %182 = vector.shape_cast %179 : vector<8x16xf32> to vector<1x8x16xf32>
    tpu.vector_store %arg22[%c4, %c0_56, %c0_57], %182 {strides = array<i32>} : memref<8x8x16xf32, #tpu.memory_space<vmem>>, vector<1x8x16xf32>,
    %183 = vector.extract_strided_slice %20 {offsets = [5, 0, 0], sizes = [1, 8, 64], strides = [1, 1, 1]} : vector<8x8x64xf32> to vector<1x8x64xf32>
    %184 = vector.shape_cast %183 : vector<1x8x64xf32> to vector<8x64xf32>
    %cst_58 = arith.constant dense<0.000000e+00> : vector<8x64xf32>
    %185 = tpu.matmul %179, %1, %cst_58 {dimension_numbers = #tpu.dot_dimension_numbers<[1], [0], [0], [1], [0, 0, 1, 1], [], []>} : vector<8x16xf32>, vector<16x64xf32>, vector<8x64xf32> -> vector<8x64xf32>
    %186 = arith.addf %184, %185 : vector<8x64xf32>
    %187 = vector.extract_strided_slice %186 {offsets = [0, 0], sizes = [8, 16], strides = [1, 1]} : vector<8x64xf32> to vector<8x16xf32>
    %188 = arith.negf %187 : vector<8x16xf32>
    %189 = math.exp %188 : vector<8x16xf32>
    %cst_59 = arith.constant 1.000000e+00 : f32
    %190 = vector.broadcast %cst_59 : f32 to vector<8x16xf32>
    %191 = arith.addf %190, %189 : vector<8x16xf32>
    %192 = arith.divf %190, %191 : vector<8x16xf32>
    %193 = vector.extract_strided_slice %186 {offsets = [0, 16], sizes = [8, 16], strides = [1, 1]} : vector<8x64xf32> to vector<8x16xf32>
    %194 = arith.negf %193 : vector<8x16xf32>
    %195 = math.exp %194 : vector<8x16xf32>
    %cst_60 = arith.constant 1.000000e+00 : f32
    %196 = vector.broadcast %cst_60 : f32 to vector<8x16xf32>
    %197 = arith.addf %196, %195 : vector<8x16xf32>
    %198 = arith.divf %196, %197 : vector<8x16xf32>
    %199 = vector.extract_strided_slice %186 {offsets = [0, 32], sizes = [8, 16], strides = [1, 1]} : vector<8x64xf32> to vector<8x16xf32>
    %200 = math.tanh %199 : vector<8x16xf32>
    %201 = vector.extract_strided_slice %186 {offsets = [0, 48], sizes = [8, 16], strides = [1, 1]} : vector<8x64xf32> to vector<8x16xf32>
    %202 = arith.negf %201 : vector<8x16xf32>
    %203 = math.exp %202 : vector<8x16xf32>
    %cst_61 = arith.constant 1.000000e+00 : f32
    %204 = vector.broadcast %cst_61 : f32 to vector<8x16xf32>
    %205 = arith.addf %204, %203 : vector<8x16xf32>
    %206 = arith.divf %204, %205 : vector<8x16xf32>
    %207 = arith.mulf %198, %177 : vector<8x16xf32>
    %208 = arith.mulf %192, %200 : vector<8x16xf32>
    %209 = arith.addf %207, %208 : vector<8x16xf32>
    %210 = math.tanh %209 : vector<8x16xf32>
    %211 = arith.mulf %206, %210 : vector<8x16xf32>
    %c5 = arith.constant 5 : index
    %c0_62 = arith.constant 0 : index
    %c0_63 = arith.constant 0 : index
    %212 = vector.load %arg22[%c5, %c0_62, %c0_63] : memref<8x8x16xf32, #tpu.memory_space<vmem>>, vector<1x8x16xf32>
    %213 = vector.shape_cast %212 : vector<1x8x16xf32> to vector<8x16xf32>
    %214 = vector.shape_cast %211 : vector<8x16xf32> to vector<1x8x16xf32>
    tpu.vector_store %arg22[%c5, %c0_62, %c0_63], %214 {strides = array<i32>} : memref<8x8x16xf32, #tpu.memory_space<vmem>>, vector<1x8x16xf32>,
    %215 = vector.extract_strided_slice %20 {offsets = [6, 0, 0], sizes = [1, 8, 64], strides = [1, 1, 1]} : vector<8x8x64xf32> to vector<1x8x64xf32>
    %216 = vector.shape_cast %215 : vector<1x8x64xf32> to vector<8x64xf32>
    %cst_64 = arith.constant dense<0.000000e+00> : vector<8x64xf32>
    %217 = tpu.matmul %211, %1, %cst_64 {dimension_numbers = #tpu.dot_dimension_numbers<[1], [0], [0], [1], [0, 0, 1, 1], [], []>} : vector<8x16xf32>, vector<16x64xf32>, vector<8x64xf32> -> vector<8x64xf32>
    %218 = arith.addf %216, %217 : vector<8x64xf32>
    %219 = vector.extract_strided_slice %218 {offsets = [0, 0], sizes = [8, 16], strides = [1, 1]} : vector<8x64xf32> to vector<8x16xf32>
    %220 = arith.negf %219 : vector<8x16xf32>
    %221 = math.exp %220 : vector<8x16xf32>
    %cst_65 = arith.constant 1.000000e+00 : f32
    %222 = vector.broadcast %cst_65 : f32 to vector<8x16xf32>
    %223 = arith.addf %222, %221 : vector<8x16xf32>
    %224 = arith.divf %222, %223 : vector<8x16xf32>
    %225 = vector.extract_strided_slice %218 {offsets = [0, 16], sizes = [8, 16], strides = [1, 1]} : vector<8x64xf32> to vector<8x16xf32>
    %226 = arith.negf %225 : vector<8x16xf32>
    %227 = math.exp %226 : vector<8x16xf32>
    %cst_66 = arith.constant 1.000000e+00 : f32
    %228 = vector.broadcast %cst_66 : f32 to vector<8x16xf32>
    %229 = arith.addf %228, %227 : vector<8x16xf32>
    %230 = arith.divf %228, %229 : vector<8x16xf32>
    %231 = vector.extract_strided_slice %218 {offsets = [0, 32], sizes = [8, 16], strides = [1, 1]} : vector<8x64xf32> to vector<8x16xf32>
    %232 = math.tanh %231 : vector<8x16xf32>
    %233 = vector.extract_strided_slice %218 {offsets = [0, 48], sizes = [8, 16], strides = [1, 1]} : vector<8x64xf32> to vector<8x16xf32>
    %234 = arith.negf %233 : vector<8x16xf32>
    %235 = math.exp %234 : vector<8x16xf32>
    %cst_67 = arith.constant 1.000000e+00 : f32
    %236 = vector.broadcast %cst_67 : f32 to vector<8x16xf32>
    %237 = arith.addf %236, %235 : vector<8x16xf32>
    %238 = arith.divf %236, %237 : vector<8x16xf32>
    %239 = arith.mulf %230, %209 : vector<8x16xf32>
    %240 = arith.mulf %224, %232 : vector<8x16xf32>
    %241 = arith.addf %239, %240 : vector<8x16xf32>
    %242 = math.tanh %241 : vector<8x16xf32>
    %243 = arith.mulf %238, %242 : vector<8x16xf32>
    %c6 = arith.constant 6 : index
    %c0_68 = arith.constant 0 : index
    %c0_69 = arith.constant 0 : index
    %244 = vector.load %arg22[%c6, %c0_68, %c0_69] : memref<8x8x16xf32, #tpu.memory_space<vmem>>, vector<1x8x16xf32>
    %245 = vector.shape_cast %244 : vector<1x8x16xf32> to vector<8x16xf32>
    %246 = vector.shape_cast %243 : vector<8x16xf32> to vector<1x8x16xf32>
    tpu.vector_store %arg22[%c6, %c0_68, %c0_69], %246 {strides = array<i32>} : memref<8x8x16xf32, #tpu.memory_space<vmem>>, vector<1x8x16xf32>,
    %247 = vector.extract_strided_slice %20 {offsets = [7, 0, 0], sizes = [1, 8, 64], strides = [1, 1, 1]} : vector<8x8x64xf32> to vector<1x8x64xf32>
    %248 = vector.shape_cast %247 : vector<1x8x64xf32> to vector<8x64xf32>
    %cst_70 = arith.constant dense<0.000000e+00> : vector<8x64xf32>
    %249 = tpu.matmul %243, %1, %cst_70 {dimension_numbers = #tpu.dot_dimension_numbers<[1], [0], [0], [1], [0, 0, 1, 1], [], []>} : vector<8x16xf32>, vector<16x64xf32>, vector<8x64xf32> -> vector<8x64xf32>
    %250 = arith.addf %248, %249 : vector<8x64xf32>
    %251 = vector.extract_strided_slice %250 {offsets = [0, 0], sizes = [8, 16], strides = [1, 1]} : vector<8x64xf32> to vector<8x16xf32>
    %252 = arith.negf %251 : vector<8x16xf32>
    %253 = math.exp %252 : vector<8x16xf32>
    %cst_71 = arith.constant 1.000000e+00 : f32
    %254 = vector.broadcast %cst_71 : f32 to vector<8x16xf32>
    %255 = arith.addf %254, %253 : vector<8x16xf32>
    %256 = arith.divf %254, %255 : vector<8x16xf32>
    %257 = vector.extract_strided_slice %250 {offsets = [0, 16], sizes = [8, 16], strides = [1, 1]} : vector<8x64xf32> to vector<8x16xf32>
    %258 = arith.negf %257 : vector<8x16xf32>
    %259 = math.exp %258 : vector<8x16xf32>
    %cst_72 = arith.constant 1.000000e+00 : f32
    %260 = vector.broadcast %cst_72 : f32 to vector<8x16xf32>
    %261 = arith.addf %260, %259 : vector<8x16xf32>
    %262 = arith.divf %260, %261 : vector<8x16xf32>
    %263 = vector.extract_strided_slice %250 {offsets = [0, 32], sizes = [8, 16], strides = [1, 1]} : vector<8x64xf32> to vector<8x16xf32>
    %264 = math.tanh %263 : vector<8x16xf32>
    %265 = vector.extract_strided_slice %250 {offsets = [0, 48], sizes = [8, 16], strides = [1, 1]} : vector<8x64xf32> to vector<8x16xf32>
    %266 = arith.negf %265 : vector<8x16xf32>
    %267 = math.exp %266 : vector<8x16xf32>
    %cst_73 = arith.constant 1.000000e+00 : f32
    %268 = vector.broadcast %cst_73 : f32 to vector<8x16xf32>
    %269 = arith.addf %268, %267 : vector<8x16xf32>
    %270 = arith.divf %268, %269 : vector<8x16xf32>
    %271 = arith.mulf %262, %241 : vector<8x16xf32>
    %272 = arith.mulf %256, %264 : vector<8x16xf32>
    %273 = arith.addf %271, %272 : vector<8x16xf32>
    %274 = math.tanh %273 : vector<8x16xf32>
    %275 = arith.mulf %270, %274 : vector<8x16xf32>
    %c7 = arith.constant 7 : index
    %c0_74 = arith.constant 0 : index
    %c0_75 = arith.constant 0 : index
    %276 = vector.load %arg22[%c7, %c0_74, %c0_75] : memref<8x8x16xf32, #tpu.memory_space<vmem>>, vector<1x8x16xf32>
    %277 = vector.shape_cast %276 : vector<1x8x16xf32> to vector<8x16xf32>
    %278 = vector.shape_cast %275 : vector<8x16xf32> to vector<1x8x16xf32>
    tpu.vector_store %arg22[%c7, %c0_74, %c0_75], %278 {strides = array<i32>} : memref<8x8x16xf32, #tpu.memory_space<vmem>>, vector<1x8x16xf32>,
    %c0_76 = arith.constant 0 : index
    %c0_77 = arith.constant 0 : index
    %c0_78 = arith.constant 0 : index
    %279 = vector.load %arg22[%c0_76, %c0_77, %c0_78] : memref<8x8x16xf32, #tpu.memory_space<vmem>>, vector<8x8x16xf32>
    %280 = vector.shape_cast %279 : vector<8x8x16xf32> to vector<64x16xf32>
    %c0_79 = arith.constant 0 : index
    %c0_80 = arith.constant 0 : index
    %281 = vector.load %arg5[%c0_79, %c0_80] : memref<16x6xf32, #tpu.memory_space<vmem>>, vector<16x6xf32>
    %cst_81 = arith.constant dense<0.000000e+00> : vector<64x6xf32>
    %282 = tpu.matmul %280, %281, %cst_81 {dimension_numbers = #tpu.dot_dimension_numbers<[1], [0], [0], [1], [0, 0, 1, 1], [], []>} : vector<64x16xf32>, vector<16x6xf32>, vector<64x6xf32> -> vector<64x6xf32>
    %c0_82 = arith.constant 0 : index
    %c0_83 = arith.constant 0 : index
    %283 = vector.load %arg6[%c0_82, %c0_83] : memref<1x6xf32, #tpu.memory_space<vmem>>, vector<1x6xf32>
    %284 = vector.broadcast %283 : vector<1x6xf32> to vector<64x6xf32>
    %285 = arith.addf %282, %284 : vector<64x6xf32>
    %286 = vector.extract_strided_slice %0 {offsets = [0, 0, 1], sizes = [8, 8, 4], strides = [1, 1, 1]} : vector<8x8x5xf32> to vector<8x8x4xf32>
    %287 = vector.shape_cast %286 : vector<8x8x4xf32> to vector<64x4xf32>
    %c0_84 = arith.constant 0 : index
    %c0_85 = arith.constant 0 : index
    %288 = vector.load %arg7[%c0_84, %c0_85] : memref<10x10xf32, #tpu.memory_space<vmem>>, vector<6x10xf32>
    %cst_86 = arith.constant dense<0.000000e+00> : vector<64x10xf32>
    %289 = tpu.matmul %285, %288, %cst_86 {dimension_numbers = #tpu.dot_dimension_numbers<[1], [0], [0], [1], [0, 0, 1, 1], [], []>} : vector<64x6xf32>, vector<6x10xf32>, vector<64x10xf32> -> vector<64x10xf32>
    %c6_87 = arith.constant 6 : index
    %c0_88 = arith.constant 0 : index
    %290 = vector.load %arg7[%c6_87, %c0_88] : memref<10x10xf32, #tpu.memory_space<vmem>>, vector<4x10xf32>
    %cst_89 = arith.constant dense<0.000000e+00> : vector<64x10xf32>
    %291 = tpu.matmul %287, %290, %cst_89 {dimension_numbers = #tpu.dot_dimension_numbers<[1], [0], [0], [1], [0, 0, 1, 1], [], []>} : vector<64x4xf32>, vector<4x10xf32>, vector<64x10xf32> -> vector<64x10xf32>
    %292 = arith.addf %289, %291 : vector<64x10xf32>
    %c0_90 = arith.constant 0 : index
    %c0_91 = arith.constant 0 : index
    %293 = vector.load %arg8[%c0_90, %c0_91] : memref<1x10xf32, #tpu.memory_space<vmem>>, vector<1x10xf32>
    %294 = vector.broadcast %293 : vector<1x10xf32> to vector<64x10xf32>
    %295 = arith.addf %292, %294 : vector<64x10xf32>
    %cst_92 = arith.constant 0.000000e+00 : f32
    %296 = vector.broadcast %cst_92 : f32 to vector<64x10xf32>
    %297 = arith.maximumf %295, %296 : vector<64x10xf32>
    %c0_93 = arith.constant 0 : index
    %c0_94 = arith.constant 0 : index
    %298 = vector.load %arg9[%c0_93, %c0_94] : memref<10x128xf32, #tpu.memory_space<vmem>>, vector<10x128xf32>
    %cst_95 = arith.constant dense<0.000000e+00> : vector<64x128xf32>
    %299 = tpu.matmul %297, %298, %cst_95 {dimension_numbers = #tpu.dot_dimension_numbers<[1], [0], [0], [1], [0, 0, 1, 1], [], []>} : vector<64x10xf32>, vector<10x128xf32>, vector<64x128xf32> -> vector<64x128xf32>
    %c0_96 = arith.constant 0 : index
    %c0_97 = arith.constant 0 : index
    %300 = vector.load %arg11[%c0_96, %c0_97] : memref<1x128xf32, #tpu.memory_space<vmem>>, vector<1x128xf32>
    %301 = vector.broadcast %300 : vector<1x128xf32> to vector<64x128xf32>
    %302 = arith.addf %299, %301 : vector<64x128xf32>
    %303 = vector.shape_cast %302 : vector<64x128xf32> to vector<8x8x128xf32>
    %cst_98 = arith.constant 0.000000e+00 : f32
    %304 = vector.broadcast %cst_98 : f32 to vector<8x32xf32>
    %cst_99 = arith.constant 0.000000e+00 : f32
    %305 = vector.broadcast %cst_99 : f32 to vector<8x32xf32>
    %306 = vector.extract_strided_slice %303 {offsets = [0, 0, 0], sizes = [1, 8, 128], strides = [1, 1, 1]} : vector<8x8x128xf32> to vector<1x8x128xf32>
    %307 = vector.shape_cast %306 : vector<1x8x128xf32> to vector<8x128xf32>
    %cst_100 = arith.constant dense<0.000000e+00> : vector<8x128xf32>
    %308 = tpu.matmul %304, %2, %cst_100 {dimension_numbers = #tpu.dot_dimension_numbers<[1], [0], [0], [1], [0, 0, 1, 1], [], []>} : vector<8x32xf32>, vector<32x128xf32>, vector<8x128xf32> -> vector<8x128xf32>
    %309 = arith.addf %307, %308 : vector<8x128xf32>
    %310 = vector.extract_strided_slice %309 {offsets = [0, 0], sizes = [8, 32], strides = [1, 1]} : vector<8x128xf32> to vector<8x32xf32>
    %311 = arith.negf %310 : vector<8x32xf32>
    %312 = math.exp %311 : vector<8x32xf32>
    %cst_101 = arith.constant 1.000000e+00 : f32
    %313 = vector.broadcast %cst_101 : f32 to vector<8x32xf32>
    %314 = arith.addf %313, %312 : vector<8x32xf32>
    %315 = arith.divf %313, %314 : vector<8x32xf32>
    %316 = vector.extract_strided_slice %309 {offsets = [0, 32], sizes = [8, 32], strides = [1, 1]} : vector<8x128xf32> to vector<8x32xf32>
    %317 = arith.negf %316 : vector<8x32xf32>
    %318 = math.exp %317 : vector<8x32xf32>
    %cst_102 = arith.constant 1.000000e+00 : f32
    %319 = vector.broadcast %cst_102 : f32 to vector<8x32xf32>
    %320 = arith.addf %319, %318 : vector<8x32xf32>
    %321 = arith.divf %319, %320 : vector<8x32xf32>
    %322 = vector.extract_strided_slice %309 {offsets = [0, 64], sizes = [8, 32], strides = [1, 1]} : vector<8x128xf32> to vector<8x32xf32>
    %323 = math.tanh %322 : vector<8x32xf32>
    %324 = vector.extract_strided_slice %309 {offsets = [0, 96], sizes = [8, 32], strides = [1, 1]} : vector<8x128xf32> to vector<8x32xf32>
    %325 = arith.negf %324 : vector<8x32xf32>
    %326 = math.exp %325 : vector<8x32xf32>
    %cst_103 = arith.constant 1.000000e+00 : f32
    %327 = vector.broadcast %cst_103 : f32 to vector<8x32xf32>
    %328 = arith.addf %327, %326 : vector<8x32xf32>
    %329 = arith.divf %327, %328 : vector<8x32xf32>
    %330 = arith.mulf %321, %305 : vector<8x32xf32>
    %331 = arith.mulf %315, %323 : vector<8x32xf32>
    %332 = arith.addf %330, %331 : vector<8x32xf32>
    %333 = math.tanh %332 : vector<8x32xf32>
    %334 = arith.mulf %329, %333 : vector<8x32xf32>
    %335 = vector.extract_strided_slice %303 {offsets = [1, 0, 0], sizes = [1, 8, 128], strides = [1, 1, 1]} : vector<8x8x128xf32> to vector<1x8x128xf32>
    %336 = vector.shape_cast %335 : vector<1x8x128xf32> to vector<8x128xf32>
    %cst_104 = arith.constant dense<0.000000e+00> : vector<8x128xf32>
    %337 = tpu.matmul %334, %2, %cst_104 {dimension_numbers = #tpu.dot_dimension_numbers<[1], [0], [0], [1], [0, 0, 1, 1], [], []>} : vector<8x32xf32>, vector<32x128xf32>, vector<8x128xf32> -> vector<8x128xf32>
    %338 = arith.addf %336, %337 : vector<8x128xf32>
    %339 = vector.extract_strided_slice %338 {offsets = [0, 0], sizes = [8, 32], strides = [1, 1]} : vector<8x128xf32> to vector<8x32xf32>
    %340 = arith.negf %339 : vector<8x32xf32>
    %341 = math.exp %340 : vector<8x32xf32>
    %cst_105 = arith.constant 1.000000e+00 : f32
    %342 = vector.broadcast %cst_105 : f32 to vector<8x32xf32>
    %343 = arith.addf %342, %341 : vector<8x32xf32>
    %344 = arith.divf %342, %343 : vector<8x32xf32>
    %345 = vector.extract_strided_slice %338 {offsets = [0, 32], sizes = [8, 32], strides = [1, 1]} : vector<8x128xf32> to vector<8x32xf32>
    %346 = arith.negf %345 : vector<8x32xf32>
    %347 = math.exp %346 : vector<8x32xf32>
    %cst_106 = arith.constant 1.000000e+00 : f32
    %348 = vector.broadcast %cst_106 : f32 to vector<8x32xf32>
    %349 = arith.addf %348, %347 : vector<8x32xf32>
    %350 = arith.divf %348, %349 : vector<8x32xf32>
    %351 = vector.extract_strided_slice %338 {offsets = [0, 64], sizes = [8, 32], strides = [1, 1]} : vector<8x128xf32> to vector<8x32xf32>
    %352 = math.tanh %351 : vector<8x32xf32>
    %353 = vector.extract_strided_slice %338 {offsets = [0, 96], sizes = [8, 32], strides = [1, 1]} : vector<8x128xf32> to vector<8x32xf32>
    %354 = arith.negf %353 : vector<8x32xf32>
    %355 = math.exp %354 : vector<8x32xf32>
    %cst_107 = arith.constant 1.000000e+00 : f32
    %356 = vector.broadcast %cst_107 : f32 to vector<8x32xf32>
    %357 = arith.addf %356, %355 : vector<8x32xf32>
    %358 = arith.divf %356, %357 : vector<8x32xf32>
    %359 = arith.mulf %350, %332 : vector<8x32xf32>
    %360 = arith.mulf %344, %352 : vector<8x32xf32>
    %361 = arith.addf %359, %360 : vector<8x32xf32>
    %362 = math.tanh %361 : vector<8x32xf32>
    %363 = arith.mulf %358, %362 : vector<8x32xf32>
    %364 = vector.extract_strided_slice %303 {offsets = [2, 0, 0], sizes = [1, 8, 128], strides = [1, 1, 1]} : vector<8x8x128xf32> to vector<1x8x128xf32>
    %365 = vector.shape_cast %364 : vector<1x8x128xf32> to vector<8x128xf32>
    %cst_108 = arith.constant dense<0.000000e+00> : vector<8x128xf32>
    %366 = tpu.matmul %363, %2, %cst_108 {dimension_numbers = #tpu.dot_dimension_numbers<[1], [0], [0], [1], [0, 0, 1, 1], [], []>} : vector<8x32xf32>, vector<32x128xf32>, vector<8x128xf32> -> vector<8x128xf32>
    %367 = arith.addf %365, %366 : vector<8x128xf32>
    %368 = vector.extract_strided_slice %367 {offsets = [0, 0], sizes = [8, 32], strides = [1, 1]} : vector<8x128xf32> to vector<8x32xf32>
    %369 = arith.negf %368 : vector<8x32xf32>
    %370 = math.exp %369 : vector<8x32xf32>
    %cst_109 = arith.constant 1.000000e+00 : f32
    %371 = vector.broadcast %cst_109 : f32 to vector<8x32xf32>
    %372 = arith.addf %371, %370 : vector<8x32xf32>
    %373 = arith.divf %371, %372 : vector<8x32xf32>
    %374 = vector.extract_strided_slice %367 {offsets = [0, 32], sizes = [8, 32], strides = [1, 1]} : vector<8x128xf32> to vector<8x32xf32>
    %375 = arith.negf %374 : vector<8x32xf32>
    %376 = math.exp %375 : vector<8x32xf32>
    %cst_110 = arith.constant 1.000000e+00 : f32
    %377 = vector.broadcast %cst_110 : f32 to vector<8x32xf32>
    %378 = arith.addf %377, %376 : vector<8x32xf32>
    %379 = arith.divf %377, %378 : vector<8x32xf32>
    %380 = vector.extract_strided_slice %367 {offsets = [0, 64], sizes = [8, 32], strides = [1, 1]} : vector<8x128xf32> to vector<8x32xf32>
    %381 = math.tanh %380 : vector<8x32xf32>
    %382 = vector.extract_strided_slice %367 {offsets = [0, 96], sizes = [8, 32], strides = [1, 1]} : vector<8x128xf32> to vector<8x32xf32>
    %383 = arith.negf %382 : vector<8x32xf32>
    %384 = math.exp %383 : vector<8x32xf32>
    %cst_111 = arith.constant 1.000000e+00 : f32
    %385 = vector.broadcast %cst_111 : f32 to vector<8x32xf32>
    %386 = arith.addf %385, %384 : vector<8x32xf32>
    %387 = arith.divf %385, %386 : vector<8x32xf32>
    %388 = arith.mulf %379, %361 : vector<8x32xf32>
    %389 = arith.mulf %373, %381 : vector<8x32xf32>
    %390 = arith.addf %388, %389 : vector<8x32xf32>
    %391 = math.tanh %390 : vector<8x32xf32>
    %392 = arith.mulf %387, %391 : vector<8x32xf32>
    %393 = vector.extract_strided_slice %303 {offsets = [3, 0, 0], sizes = [1, 8, 128], strides = [1, 1, 1]} : vector<8x8x128xf32> to vector<1x8x128xf32>
    %394 = vector.shape_cast %393 : vector<1x8x128xf32> to vector<8x128xf32>
    %cst_112 = arith.constant dense<0.000000e+00> : vector<8x128xf32>
    %395 = tpu.matmul %392, %2, %cst_112 {dimension_numbers = #tpu.dot_dimension_numbers<[1], [0], [0], [1], [0, 0, 1, 1], [], []>} : vector<8x32xf32>, vector<32x128xf32>, vector<8x128xf32> -> vector<8x128xf32>
    %396 = arith.addf %394, %395 : vector<8x128xf32>
    %397 = vector.extract_strided_slice %396 {offsets = [0, 0], sizes = [8, 32], strides = [1, 1]} : vector<8x128xf32> to vector<8x32xf32>
    %398 = arith.negf %397 : vector<8x32xf32>
    %399 = math.exp %398 : vector<8x32xf32>
    %cst_113 = arith.constant 1.000000e+00 : f32
    %400 = vector.broadcast %cst_113 : f32 to vector<8x32xf32>
    %401 = arith.addf %400, %399 : vector<8x32xf32>
    %402 = arith.divf %400, %401 : vector<8x32xf32>
    %403 = vector.extract_strided_slice %396 {offsets = [0, 32], sizes = [8, 32], strides = [1, 1]} : vector<8x128xf32> to vector<8x32xf32>
    %404 = arith.negf %403 : vector<8x32xf32>
    %405 = math.exp %404 : vector<8x32xf32>
    %cst_114 = arith.constant 1.000000e+00 : f32
    %406 = vector.broadcast %cst_114 : f32 to vector<8x32xf32>
    %407 = arith.addf %406, %405 : vector<8x32xf32>
    %408 = arith.divf %406, %407 : vector<8x32xf32>
    %409 = vector.extract_strided_slice %396 {offsets = [0, 64], sizes = [8, 32], strides = [1, 1]} : vector<8x128xf32> to vector<8x32xf32>
    %410 = math.tanh %409 : vector<8x32xf32>
    %411 = vector.extract_strided_slice %396 {offsets = [0, 96], sizes = [8, 32], strides = [1, 1]} : vector<8x128xf32> to vector<8x32xf32>
    %412 = arith.negf %411 : vector<8x32xf32>
    %413 = math.exp %412 : vector<8x32xf32>
    %cst_115 = arith.constant 1.000000e+00 : f32
    %414 = vector.broadcast %cst_115 : f32 to vector<8x32xf32>
    %415 = arith.addf %414, %413 : vector<8x32xf32>
    %416 = arith.divf %414, %415 : vector<8x32xf32>
    %417 = arith.mulf %408, %390 : vector<8x32xf32>
    %418 = arith.mulf %402, %410 : vector<8x32xf32>
    %419 = arith.addf %417, %418 : vector<8x32xf32>
    %420 = math.tanh %419 : vector<8x32xf32>
    %421 = arith.mulf %416, %420 : vector<8x32xf32>
    %422 = vector.extract_strided_slice %303 {offsets = [4, 0, 0], sizes = [1, 8, 128], strides = [1, 1, 1]} : vector<8x8x128xf32> to vector<1x8x128xf32>
    %423 = vector.shape_cast %422 : vector<1x8x128xf32> to vector<8x128xf32>
    %cst_116 = arith.constant dense<0.000000e+00> : vector<8x128xf32>
    %424 = tpu.matmul %421, %2, %cst_116 {dimension_numbers = #tpu.dot_dimension_numbers<[1], [0], [0], [1], [0, 0, 1, 1], [], []>} : vector<8x32xf32>, vector<32x128xf32>, vector<8x128xf32> -> vector<8x128xf32>
    %425 = arith.addf %423, %424 : vector<8x128xf32>
    %426 = vector.extract_strided_slice %425 {offsets = [0, 0], sizes = [8, 32], strides = [1, 1]} : vector<8x128xf32> to vector<8x32xf32>
    %427 = arith.negf %426 : vector<8x32xf32>
    %428 = math.exp %427 : vector<8x32xf32>
    %cst_117 = arith.constant 1.000000e+00 : f32
    %429 = vector.broadcast %cst_117 : f32 to vector<8x32xf32>
    %430 = arith.addf %429, %428 : vector<8x32xf32>
    %431 = arith.divf %429, %430 : vector<8x32xf32>
    %432 = vector.extract_strided_slice %425 {offsets = [0, 32], sizes = [8, 32], strides = [1, 1]} : vector<8x128xf32> to vector<8x32xf32>
    %433 = arith.negf %432 : vector<8x32xf32>
    %434 = math.exp %433 : vector<8x32xf32>
    %cst_118 = arith.constant 1.000000e+00 : f32
    %435 = vector.broadcast %cst_118 : f32 to vector<8x32xf32>
    %436 = arith.addf %435, %434 : vector<8x32xf32>
    %437 = arith.divf %435, %436 : vector<8x32xf32>
    %438 = vector.extract_strided_slice %425 {offsets = [0, 64], sizes = [8, 32], strides = [1, 1]} : vector<8x128xf32> to vector<8x32xf32>
    %439 = math.tanh %438 : vector<8x32xf32>
    %440 = vector.extract_strided_slice %425 {offsets = [0, 96], sizes = [8, 32], strides = [1, 1]} : vector<8x128xf32> to vector<8x32xf32>
    %441 = arith.negf %440 : vector<8x32xf32>
    %442 = math.exp %441 : vector<8x32xf32>
    %cst_119 = arith.constant 1.000000e+00 : f32
    %443 = vector.broadcast %cst_119 : f32 to vector<8x32xf32>
    %444 = arith.addf %443, %442 : vector<8x32xf32>
    %445 = arith.divf %443, %444 : vector<8x32xf32>
    %446 = arith.mulf %437, %419 : vector<8x32xf32>
    %447 = arith.mulf %431, %439 : vector<8x32xf32>
    %448 = arith.addf %446, %447 : vector<8x32xf32>
    %449 = math.tanh %448 : vector<8x32xf32>
    %450 = arith.mulf %445, %449 : vector<8x32xf32>
    %451 = vector.extract_strided_slice %303 {offsets = [5, 0, 0], sizes = [1, 8, 128], strides = [1, 1, 1]} : vector<8x8x128xf32> to vector<1x8x128xf32>
    %452 = vector.shape_cast %451 : vector<1x8x128xf32> to vector<8x128xf32>
    %cst_120 = arith.constant dense<0.000000e+00> : vector<8x128xf32>
    %453 = tpu.matmul %450, %2, %cst_120 {dimension_numbers = #tpu.dot_dimension_numbers<[1], [0], [0], [1], [0, 0, 1, 1], [], []>} : vector<8x32xf32>, vector<32x128xf32>, vector<8x128xf32> -> vector<8x128xf32>
    %454 = arith.addf %452, %453 : vector<8x128xf32>
    %455 = vector.extract_strided_slice %454 {offsets = [0, 0], sizes = [8, 32], strides = [1, 1]} : vector<8x128xf32> to vector<8x32xf32>
    %456 = arith.negf %455 : vector<8x32xf32>
    %457 = math.exp %456 : vector<8x32xf32>
    %cst_121 = arith.constant 1.000000e+00 : f32
    %458 = vector.broadcast %cst_121 : f32 to vector<8x32xf32>
    %459 = arith.addf %458, %457 : vector<8x32xf32>
    %460 = arith.divf %458, %459 : vector<8x32xf32>
    %461 = vector.extract_strided_slice %454 {offsets = [0, 32], sizes = [8, 32], strides = [1, 1]} : vector<8x128xf32> to vector<8x32xf32>
    %462 = arith.negf %461 : vector<8x32xf32>
    %463 = math.exp %462 : vector<8x32xf32>
    %cst_122 = arith.constant 1.000000e+00 : f32
    %464 = vector.broadcast %cst_122 : f32 to vector<8x32xf32>
    %465 = arith.addf %464, %463 : vector<8x32xf32>
    %466 = arith.divf %464, %465 : vector<8x32xf32>
    %467 = vector.extract_strided_slice %454 {offsets = [0, 64], sizes = [8, 32], strides = [1, 1]} : vector<8x128xf32> to vector<8x32xf32>
    %468 = math.tanh %467 : vector<8x32xf32>
    %469 = vector.extract_strided_slice %454 {offsets = [0, 96], sizes = [8, 32], strides = [1, 1]} : vector<8x128xf32> to vector<8x32xf32>
    %470 = arith.negf %469 : vector<8x32xf32>
    %471 = math.exp %470 : vector<8x32xf32>
    %cst_123 = arith.constant 1.000000e+00 : f32
    %472 = vector.broadcast %cst_123 : f32 to vector<8x32xf32>
    %473 = arith.addf %472, %471 : vector<8x32xf32>
    %474 = arith.divf %472, %473 : vector<8x32xf32>
    %475 = arith.mulf %466, %448 : vector<8x32xf32>
    %476 = arith.mulf %460, %468 : vector<8x32xf32>
    %477 = arith.addf %475, %476 : vector<8x32xf32>
    %478 = math.tanh %477 : vector<8x32xf32>
    %479 = arith.mulf %474, %478 : vector<8x32xf32>
    %480 = vector.extract_strided_slice %303 {offsets = [6, 0, 0], sizes = [1, 8, 128], strides = [1, 1, 1]} : vector<8x8x128xf32> to vector<1x8x128xf32>
    %481 = vector.shape_cast %480 : vector<1x8x128xf32> to vector<8x128xf32>
    %cst_124 = arith.constant dense<0.000000e+00> : vector<8x128xf32>
    %482 = tpu.matmul %479, %2, %cst_124 {dimension_numbers = #tpu.dot_dimension_numbers<[1], [0], [0], [1], [0, 0, 1, 1], [], []>} : vector<8x32xf32>, vector<32x128xf32>, vector<8x128xf32> -> vector<8x128xf32>
    %483 = arith.addf %481, %482 : vector<8x128xf32>
    %484 = vector.extract_strided_slice %483 {offsets = [0, 0], sizes = [8, 32], strides = [1, 1]} : vector<8x128xf32> to vector<8x32xf32>
    %485 = arith.negf %484 : vector<8x32xf32>
    %486 = math.exp %485 : vector<8x32xf32>
    %cst_125 = arith.constant 1.000000e+00 : f32
    %487 = vector.broadcast %cst_125 : f32 to vector<8x32xf32>
    %488 = arith.addf %487, %486 : vector<8x32xf32>
    %489 = arith.divf %487, %488 : vector<8x32xf32>
    %490 = vector.extract_strided_slice %483 {offsets = [0, 32], sizes = [8, 32], strides = [1, 1]} : vector<8x128xf32> to vector<8x32xf32>
    %491 = arith.negf %490 : vector<8x32xf32>
    %492 = math.exp %491 : vector<8x32xf32>
    %cst_126 = arith.constant 1.000000e+00 : f32
    %493 = vector.broadcast %cst_126 : f32 to vector<8x32xf32>
    %494 = arith.addf %493, %492 : vector<8x32xf32>
    %495 = arith.divf %493, %494 : vector<8x32xf32>
    %496 = vector.extract_strided_slice %483 {offsets = [0, 64], sizes = [8, 32], strides = [1, 1]} : vector<8x128xf32> to vector<8x32xf32>
    %497 = math.tanh %496 : vector<8x32xf32>
    %498 = vector.extract_strided_slice %483 {offsets = [0, 96], sizes = [8, 32], strides = [1, 1]} : vector<8x128xf32> to vector<8x32xf32>
    %499 = arith.negf %498 : vector<8x32xf32>
    %500 = math.exp %499 : vector<8x32xf32>
    %cst_127 = arith.constant 1.000000e+00 : f32
    %501 = vector.broadcast %cst_127 : f32 to vector<8x32xf32>
    %502 = arith.addf %501, %500 : vector<8x32xf32>
    %503 = arith.divf %501, %502 : vector<8x32xf32>
    %504 = arith.mulf %495, %477 : vector<8x32xf32>
    %505 = arith.mulf %489, %497 : vector<8x32xf32>
    %506 = arith.addf %504, %505 : vector<8x32xf32>
    %507 = math.tanh %506 : vector<8x32xf32>
    %508 = arith.mulf %503, %507 : vector<8x32xf32>
    %509 = vector.extract_strided_slice %303 {offsets = [7, 0, 0], sizes = [1, 8, 128], strides = [1, 1, 1]} : vector<8x8x128xf32> to vector<1x8x128xf32>
    %510 = vector.shape_cast %509 : vector<1x8x128xf32> to vector<8x128xf32>
    %cst_128 = arith.constant dense<0.000000e+00> : vector<8x128xf32>
    %511 = tpu.matmul %508, %2, %cst_128 {dimension_numbers = #tpu.dot_dimension_numbers<[1], [0], [0], [1], [0, 0, 1, 1], [], []>} : vector<8x32xf32>, vector<32x128xf32>, vector<8x128xf32> -> vector<8x128xf32>
    %512 = arith.addf %510, %511 : vector<8x128xf32>
    %513 = vector.extract_strided_slice %512 {offsets = [0, 0], sizes = [8, 32], strides = [1, 1]} : vector<8x128xf32> to vector<8x32xf32>
    %514 = arith.negf %513 : vector<8x32xf32>
    %515 = math.exp %514 : vector<8x32xf32>
    %cst_129 = arith.constant 1.000000e+00 : f32
    %516 = vector.broadcast %cst_129 : f32 to vector<8x32xf32>
    %517 = arith.addf %516, %515 : vector<8x32xf32>
    %518 = arith.divf %516, %517 : vector<8x32xf32>
    %519 = vector.extract_strided_slice %512 {offsets = [0, 32], sizes = [8, 32], strides = [1, 1]} : vector<8x128xf32> to vector<8x32xf32>
    %520 = arith.negf %519 : vector<8x32xf32>
    %521 = math.exp %520 : vector<8x32xf32>
    %cst_130 = arith.constant 1.000000e+00 : f32
    %522 = vector.broadcast %cst_130 : f32 to vector<8x32xf32>
    %523 = arith.addf %522, %521 : vector<8x32xf32>
    %524 = arith.divf %522, %523 : vector<8x32xf32>
    %525 = vector.extract_strided_slice %512 {offsets = [0, 64], sizes = [8, 32], strides = [1, 1]} : vector<8x128xf32> to vector<8x32xf32>
    %526 = math.tanh %525 : vector<8x32xf32>
    %527 = vector.extract_strided_slice %512 {offsets = [0, 96], sizes = [8, 32], strides = [1, 1]} : vector<8x128xf32> to vector<8x32xf32>
    %528 = arith.negf %527 : vector<8x32xf32>
    %529 = math.exp %528 : vector<8x32xf32>
    %cst_131 = arith.constant 1.000000e+00 : f32
    %530 = vector.broadcast %cst_131 : f32 to vector<8x32xf32>
    %531 = arith.addf %530, %529 : vector<8x32xf32>
    %532 = arith.divf %530, %531 : vector<8x32xf32>
    %533 = arith.mulf %524, %506 : vector<8x32xf32>
    %534 = arith.mulf %518, %526 : vector<8x32xf32>
    %535 = arith.addf %533, %534 : vector<8x32xf32>
    %536 = math.tanh %535 : vector<8x32xf32>
    %537 = arith.mulf %532, %536 : vector<8x32xf32>
    %cst_132 = arith.constant dense<0.000000e+00> : vector<8x2xf32>
    %538 = tpu.matmul %537, %9, %cst_132 {dimension_numbers = #tpu.dot_dimension_numbers<[1], [0], [0], [1], [0, 0, 1, 1], [], []>} : vector<8x32xf32>, vector<32x2xf32>, vector<8x2xf32> -> vector<8x2xf32>
    %539 = vector.broadcast %10 : vector<1x2xf32> to vector<8x2xf32>
    %540 = arith.addf %538, %539 : vector<8x2xf32>
    %cst_133 = arith.constant dense<0.000000e+00> : vector<8x2xf32>
    %541 = tpu.matmul %537, %9, %cst_133 {dimension_numbers = #tpu.dot_dimension_numbers<[1], [0], [0], [1], [0, 0, 1, 1], [], []>} : vector<8x32xf32>, vector<32x2xf32>, vector<8x2xf32> -> vector<8x2xf32>
    %542 = vector.broadcast %10 : vector<1x2xf32> to vector<8x2xf32>
    %543 = arith.addf %541, %542 : vector<8x2xf32>
    %c0_134 = arith.constant 0 : index
    %c0_135 = arith.constant 0 : index
    %c0_136 = arith.constant 0 : index
    %544 = vector.load %arg21[%c0_134, %c0_135, %c0_136] : memref<5x8x2xf32, #tpu.memory_space<vmem>>, vector<1x8x2xf32>
    %545 = vector.shape_cast %544 : vector<1x8x2xf32> to vector<8x2xf32>
    %546 = vector.shape_cast %540 : vector<8x2xf32> to vector<1x8x2xf32>
    tpu.vector_store %arg21[%c0_134, %c0_135, %c0_136], %546 {strides = array<i32>} : memref<5x8x2xf32, #tpu.memory_space<vmem>>, vector<1x8x2xf32>,
    %c0_137 = arith.constant 0 : index
    %c0_138 = arith.constant 0 : index
    %c0_139 = arith.constant 0 : index
    %547 = vector.load %arg1[%c0_137, %c0_138, %c0_139] : memref<4x8x1xf32, #tpu.memory_space<vmem>>, vector<4x8x1xf32>
    %548 = vector.shape_cast %547 : vector<4x8x1xf32> to vector<32x1xf32>
    %c2_140 = arith.constant 2 : index
    %c0_141 = arith.constant 0 : index
    %549 = vector.load %arg14[%c2_140, %c0_141] : memref<3x3xf32, #tpu.memory_space<vmem>>, vector<1x3xf32>
    %550 = vector.broadcast %548 : vector<32x1xf32> to vector<32x3xf32>
    %551 = vector.broadcast %549 : vector<1x3xf32> to vector<32x3xf32>
    %552 = arith.mulf %550, %551 : vector<32x3xf32>
    %c0_142 = arith.constant 0 : index
    %c0_143 = arith.constant 0 : index
    %553 = vector.load %arg15[%c0_142, %c0_143] : memref<1x3xf32, #tpu.memory_space<vmem>>, vector<1x3xf32>
    %554 = vector.broadcast %553 : vector<1x3xf32> to vector<32x3xf32>
    %555 = arith.addf %552, %554 : vector<32x3xf32>
    %556 = vector.shape_cast %555 : vector<32x3xf32> to vector<4x8x3xf32>
    %cst_144 = arith.constant dense<0.000000e+00> : vector<8x3xf32>
    %557 = tpu.matmul %543, %6, %cst_144 {dimension_numbers = #tpu.dot_dimension_numbers<[1], [0], [0], [1], [0, 0, 1, 1], [], []>} : vector<8x2xf32>, vector<2x3xf32>, vector<8x3xf32> -> vector<8x3xf32>
    %558 = vector.extract_strided_slice %556 {offsets = [0, 0, 0], sizes = [1, 8, 3], strides = [1, 1, 1]} : vector<4x8x3xf32> to vector<1x8x3xf32>
    %559 = vector.shape_cast %558 : vector<1x8x3xf32> to vector<8x3xf32>
    %560 = arith.addf %557, %559 : vector<8x3xf32>
    %cst_145 = arith.constant 0.000000e+00 : f32
    %561 = vector.broadcast %cst_145 : f32 to vector<8x3xf32>
    %562 = arith.maximumf %560, %561 : vector<8x3xf32>
    %cst_146 = arith.constant dense<0.000000e+00> : vector<8x128xf32>
    %563 = tpu.matmul %562, %3, %cst_146 {dimension_numbers = #tpu.dot_dimension_numbers<[1], [0], [0], [1], [0, 0, 1, 1], [], []>} : vector<8x3xf32>, vector<3x128xf32>, vector<8x128xf32> -> vector<8x128xf32>
    %cst_147 = arith.constant dense<0.000000e+00> : vector<8x128xf32>
    %564 = tpu.matmul %537, %4, %cst_147 {dimension_numbers = #tpu.dot_dimension_numbers<[1], [0], [0], [1], [0, 0, 1, 1], [], []>} : vector<8x32xf32>, vector<32x128xf32>, vector<8x128xf32> -> vector<8x128xf32>
    %565 = arith.addf %563, %564 : vector<8x128xf32>
    %566 = vector.broadcast %5 : vector<1x128xf32> to vector<8x128xf32>
    %567 = arith.addf %565, %566 : vector<8x128xf32>
    %568 = vector.extract_strided_slice %567 {offsets = [0, 0], sizes = [8, 32], strides = [1, 1]} : vector<8x128xf32> to vector<8x32xf32>
    %569 = arith.negf %568 : vector<8x32xf32>
    %570 = math.exp %569 : vector<8x32xf32>
    %cst_148 = arith.constant 1.000000e+00 : f32
    %571 = vector.broadcast %cst_148 : f32 to vector<8x32xf32>
    %572 = arith.addf %571, %570 : vector<8x32xf32>
    %573 = arith.divf %571, %572 : vector<8x32xf32>
    %574 = vector.extract_strided_slice %567 {offsets = [0, 32], sizes = [8, 32], strides = [1, 1]} : vector<8x128xf32> to vector<8x32xf32>
    %575 = arith.negf %574 : vector<8x32xf32>
    %576 = math.exp %575 : vector<8x32xf32>
    %cst_149 = arith.constant 1.000000e+00 : f32
    %577 = vector.broadcast %cst_149 : f32 to vector<8x32xf32>
    %578 = arith.addf %577, %576 : vector<8x32xf32>
    %579 = arith.divf %577, %578 : vector<8x32xf32>
    %580 = vector.extract_strided_slice %567 {offsets = [0, 64], sizes = [8, 32], strides = [1, 1]} : vector<8x128xf32> to vector<8x32xf32>
    %581 = math.tanh %580 : vector<8x32xf32>
    %582 = vector.extract_strided_slice %567 {offsets = [0, 96], sizes = [8, 32], strides = [1, 1]} : vector<8x128xf32> to vector<8x32xf32>
    %583 = arith.negf %582 : vector<8x32xf32>
    %584 = math.exp %583 : vector<8x32xf32>
    %cst_150 = arith.constant 1.000000e+00 : f32
    %585 = vector.broadcast %cst_150 : f32 to vector<8x32xf32>
    %586 = arith.addf %585, %584 : vector<8x32xf32>
    %587 = arith.divf %585, %586 : vector<8x32xf32>
    %588 = arith.mulf %579, %535 : vector<8x32xf32>
    %589 = arith.mulf %573, %581 : vector<8x32xf32>
    %590 = arith.addf %588, %589 : vector<8x32xf32>
    %591 = math.tanh %590 : vector<8x32xf32>
    %592 = arith.mulf %587, %591 : vector<8x32xf32>
    %cst_151 = arith.constant dense<0.000000e+00> : vector<8x2xf32>
    %593 = tpu.matmul %592, %7, %cst_151 {dimension_numbers = #tpu.dot_dimension_numbers<[1], [0], [0], [1], [0, 0, 1, 1], [], []>} : vector<8x32xf32>, vector<32x2xf32>, vector<8x2xf32> -> vector<8x2xf32>
    %594 = vector.broadcast %8 : vector<1x2xf32> to vector<8x2xf32>
    %595 = arith.addf %593, %594 : vector<8x2xf32>
    %c1_152 = arith.constant 1 : index
    %c0_153 = arith.constant 0 : index
    %c0_154 = arith.constant 0 : index
    %596 = vector.load %arg21[%c1_152, %c0_153, %c0_154] : memref<5x8x2xf32, #tpu.memory_space<vmem>>, vector<1x8x2xf32>
    %597 = vector.shape_cast %596 : vector<1x8x2xf32> to vector<8x2xf32>
    %598 = vector.shape_cast %595 : vector<8x2xf32> to vector<1x8x2xf32>
    tpu.vector_store %arg21[%c1_152, %c0_153, %c0_154], %598 {strides = array<i32>} : memref<5x8x2xf32, #tpu.memory_space<vmem>>, vector<1x8x2xf32>,
    %cst_155 = arith.constant dense<0.000000e+00> : vector<8x3xf32>
    %599 = tpu.matmul %595, %6, %cst_155 {dimension_numbers = #tpu.dot_dimension_numbers<[1], [0], [0], [1], [0, 0, 1, 1], [], []>} : vector<8x2xf32>, vector<2x3xf32>, vector<8x3xf32> -> vector<8x3xf32>
    %600 = vector.extract_strided_slice %556 {offsets = [1, 0, 0], sizes = [1, 8, 3], strides = [1, 1, 1]} : vector<4x8x3xf32> to vector<1x8x3xf32>
    %601 = vector.shape_cast %600 : vector<1x8x3xf32> to vector<8x3xf32>
    %602 = arith.addf %599, %601 : vector<8x3xf32>
    %cst_156 = arith.constant 0.000000e+00 : f32
    %603 = vector.broadcast %cst_156 : f32 to vector<8x3xf32>
    %604 = arith.maximumf %602, %603 : vector<8x3xf32>
    %cst_157 = arith.constant dense<0.000000e+00> : vector<8x128xf32>
    %605 = tpu.matmul %604, %3, %cst_157 {dimension_numbers = #tpu.dot_dimension_numbers<[1], [0], [0], [1], [0, 0, 1, 1], [], []>} : vector<8x3xf32>, vector<3x128xf32>, vector<8x128xf32> -> vector<8x128xf32>
    %cst_158 = arith.constant dense<0.000000e+00> : vector<8x128xf32>
    %606 = tpu.matmul %592, %4, %cst_158 {dimension_numbers = #tpu.dot_dimension_numbers<[1], [0], [0], [1], [0, 0, 1, 1], [], []>} : vector<8x32xf32>, vector<32x128xf32>, vector<8x128xf32> -> vector<8x128xf32>
    %607 = arith.addf %605, %606 : vector<8x128xf32>
    %608 = vector.broadcast %5 : vector<1x128xf32> to vector<8x128xf32>
    %609 = arith.addf %607, %608 : vector<8x128xf32>
    %610 = vector.extract_strided_slice %609 {offsets = [0, 0], sizes = [8, 32], strides = [1, 1]} : vector<8x128xf32> to vector<8x32xf32>
    %611 = arith.negf %610 : vector<8x32xf32>
    %612 = math.exp %611 : vector<8x32xf32>
    %cst_159 = arith.constant 1.000000e+00 : f32
    %613 = vector.broadcast %cst_159 : f32 to vector<8x32xf32>
    %614 = arith.addf %613, %612 : vector<8x32xf32>
    %615 = arith.divf %613, %614 : vector<8x32xf32>
    %616 = vector.extract_strided_slice %609 {offsets = [0, 32], sizes = [8, 32], strides = [1, 1]} : vector<8x128xf32> to vector<8x32xf32>
    %617 = arith.negf %616 : vector<8x32xf32>
    %618 = math.exp %617 : vector<8x32xf32>
    %cst_160 = arith.constant 1.000000e+00 : f32
    %619 = vector.broadcast %cst_160 : f32 to vector<8x32xf32>
    %620 = arith.addf %619, %618 : vector<8x32xf32>
    %621 = arith.divf %619, %620 : vector<8x32xf32>
    %622 = vector.extract_strided_slice %609 {offsets = [0, 64], sizes = [8, 32], strides = [1, 1]} : vector<8x128xf32> to vector<8x32xf32>
    %623 = math.tanh %622 : vector<8x32xf32>
    %624 = vector.extract_strided_slice %609 {offsets = [0, 96], sizes = [8, 32], strides = [1, 1]} : vector<8x128xf32> to vector<8x32xf32>
    %625 = arith.negf %624 : vector<8x32xf32>
    %626 = math.exp %625 : vector<8x32xf32>
    %cst_161 = arith.constant 1.000000e+00 : f32
    %627 = vector.broadcast %cst_161 : f32 to vector<8x32xf32>
    %628 = arith.addf %627, %626 : vector<8x32xf32>
    %629 = arith.divf %627, %628 : vector<8x32xf32>
    %630 = arith.mulf %621, %590 : vector<8x32xf32>
    %631 = arith.mulf %615, %623 : vector<8x32xf32>
    %632 = arith.addf %630, %631 : vector<8x32xf32>
    %633 = math.tanh %632 : vector<8x32xf32>
    %634 = arith.mulf %629, %633 : vector<8x32xf32>
    %cst_162 = arith.constant dense<0.000000e+00> : vector<8x2xf32>
    %635 = tpu.matmul %634, %7, %cst_162 {dimension_numbers = #tpu.dot_dimension_numbers<[1], [0], [0], [1], [0, 0, 1, 1], [], []>} : vector<8x32xf32>, vector<32x2xf32>, vector<8x2xf32> -> vector<8x2xf32>
    %636 = vector.broadcast %8 : vector<1x2xf32> to vector<8x2xf32>
    %637 = arith.addf %635, %636 : vector<8x2xf32>
    %c2_163 = arith.constant 2 : index
    %c0_164 = arith.constant 0 : index
    %c0_165 = arith.constant 0 : index
    %638 = vector.load %arg21[%c2_163, %c0_164, %c0_165] : memref<5x8x2xf32, #tpu.memory_space<vmem>>, vector<1x8x2xf32>
    %639 = vector.shape_cast %638 : vector<1x8x2xf32> to vector<8x2xf32>
    %640 = vector.shape_cast %637 : vector<8x2xf32> to vector<1x8x2xf32>
    tpu.vector_store %arg21[%c2_163, %c0_164, %c0_165], %640 {strides = array<i32>} : memref<5x8x2xf32, #tpu.memory_space<vmem>>, vector<1x8x2xf32>,
    %cst_166 = arith.constant dense<0.000000e+00> : vector<8x3xf32>
    %641 = tpu.matmul %637, %6, %cst_166 {dimension_numbers = #tpu.dot_dimension_numbers<[1], [0], [0], [1], [0, 0, 1, 1], [], []>} : vector<8x2xf32>, vector<2x3xf32>, vector<8x3xf32> -> vector<8x3xf32>
    %642 = vector.extract_strided_slice %556 {offsets = [2, 0, 0], sizes = [1, 8, 3], strides = [1, 1, 1]} : vector<4x8x3xf32> to vector<1x8x3xf32>
    %643 = vector.shape_cast %642 : vector<1x8x3xf32> to vector<8x3xf32>
    %644 = arith.addf %641, %643 : vector<8x3xf32>
    %cst_167 = arith.constant 0.000000e+00 : f32
    %645 = vector.broadcast %cst_167 : f32 to vector<8x3xf32>
    %646 = arith.maximumf %644, %645 : vector<8x3xf32>
    %cst_168 = arith.constant dense<0.000000e+00> : vector<8x128xf32>
    %647 = tpu.matmul %646, %3, %cst_168 {dimension_numbers = #tpu.dot_dimension_numbers<[1], [0], [0], [1], [0, 0, 1, 1], [], []>} : vector<8x3xf32>, vector<3x128xf32>, vector<8x128xf32> -> vector<8x128xf32>
    %cst_169 = arith.constant dense<0.000000e+00> : vector<8x128xf32>
    %648 = tpu.matmul %634, %4, %cst_169 {dimension_numbers = #tpu.dot_dimension_numbers<[1], [0], [0], [1], [0, 0, 1, 1], [], []>} : vector<8x32xf32>, vector<32x128xf32>, vector<8x128xf32> -> vector<8x128xf32>
    %649 = arith.addf %647, %648 : vector<8x128xf32>
    %650 = vector.broadcast %5 : vector<1x128xf32> to vector<8x128xf32>
    %651 = arith.addf %649, %650 : vector<8x128xf32>
    %652 = vector.extract_strided_slice %651 {offsets = [0, 0], sizes = [8, 32], strides = [1, 1]} : vector<8x128xf32> to vector<8x32xf32>
    %653 = arith.negf %652 : vector<8x32xf32>
    %654 = math.exp %653 : vector<8x32xf32>
    %cst_170 = arith.constant 1.000000e+00 : f32
    %655 = vector.broadcast %cst_170 : f32 to vector<8x32xf32>
    %656 = arith.addf %655, %654 : vector<8x32xf32>
    %657 = arith.divf %655, %656 : vector<8x32xf32>
    %658 = vector.extract_strided_slice %651 {offsets = [0, 32], sizes = [8, 32], strides = [1, 1]} : vector<8x128xf32> to vector<8x32xf32>
    %659 = arith.negf %658 : vector<8x32xf32>
    %660 = math.exp %659 : vector<8x32xf32>
    %cst_171 = arith.constant 1.000000e+00 : f32
    %661 = vector.broadcast %cst_171 : f32 to vector<8x32xf32>
    %662 = arith.addf %661, %660 : vector<8x32xf32>
    %663 = arith.divf %661, %662 : vector<8x32xf32>
    %664 = vector.extract_strided_slice %651 {offsets = [0, 64], sizes = [8, 32], strides = [1, 1]} : vector<8x128xf32> to vector<8x32xf32>
    %665 = math.tanh %664 : vector<8x32xf32>
    %666 = vector.extract_strided_slice %651 {offsets = [0, 96], sizes = [8, 32], strides = [1, 1]} : vector<8x128xf32> to vector<8x32xf32>
    %667 = arith.negf %666 : vector<8x32xf32>
    %668 = math.exp %667 : vector<8x32xf32>
    %cst_172 = arith.constant 1.000000e+00 : f32
    %669 = vector.broadcast %cst_172 : f32 to vector<8x32xf32>
    %670 = arith.addf %669, %668 : vector<8x32xf32>
    %671 = arith.divf %669, %670 : vector<8x32xf32>
    %672 = arith.mulf %663, %632 : vector<8x32xf32>
    %673 = arith.mulf %657, %665 : vector<8x32xf32>
    %674 = arith.addf %672, %673 : vector<8x32xf32>
    %675 = math.tanh %674 : vector<8x32xf32>
    %676 = arith.mulf %671, %675 : vector<8x32xf32>
    %cst_173 = arith.constant dense<0.000000e+00> : vector<8x2xf32>
    %677 = tpu.matmul %676, %7, %cst_173 {dimension_numbers = #tpu.dot_dimension_numbers<[1], [0], [0], [1], [0, 0, 1, 1], [], []>} : vector<8x32xf32>, vector<32x2xf32>, vector<8x2xf32> -> vector<8x2xf32>
    %678 = vector.broadcast %8 : vector<1x2xf32> to vector<8x2xf32>
    %679 = arith.addf %677, %678 : vector<8x2xf32>
    %c3_174 = arith.constant 3 : index
    %c0_175 = arith.constant 0 : index
    %c0_176 = arith.constant 0 : index
    %680 = vector.load %arg21[%c3_174, %c0_175, %c0_176] : memref<5x8x2xf32, #tpu.memory_space<vmem>>, vector<1x8x2xf32>
    %681 = vector.shape_cast %680 : vector<1x8x2xf32> to vector<8x2xf32>
    %682 = vector.shape_cast %679 : vector<8x2xf32> to vector<1x8x2xf32>
    tpu.vector_store %arg21[%c3_174, %c0_175, %c0_176], %682 {strides = array<i32>} : memref<5x8x2xf32, #tpu.memory_space<vmem>>, vector<1x8x2xf32>,
    %cst_177 = arith.constant dense<0.000000e+00> : vector<8x3xf32>
    %683 = tpu.matmul %679, %6, %cst_177 {dimension_numbers = #tpu.dot_dimension_numbers<[1], [0], [0], [1], [0, 0, 1, 1], [], []>} : vector<8x2xf32>, vector<2x3xf32>, vector<8x3xf32> -> vector<8x3xf32>
    %684 = vector.extract_strided_slice %556 {offsets = [3, 0, 0], sizes = [1, 8, 3], strides = [1, 1, 1]} : vector<4x8x3xf32> to vector<1x8x3xf32>
    %685 = vector.shape_cast %684 : vector<1x8x3xf32> to vector<8x3xf32>
    %686 = arith.addf %683, %685 : vector<8x3xf32>
    %cst_178 = arith.constant 0.000000e+00 : f32
    %687 = vector.broadcast %cst_178 : f32 to vector<8x3xf32>
    %688 = arith.maximumf %686, %687 : vector<8x3xf32>
    %cst_179 = arith.constant dense<0.000000e+00> : vector<8x128xf32>
    %689 = tpu.matmul %688, %3, %cst_179 {dimension_numbers = #tpu.dot_dimension_numbers<[1], [0], [0], [1], [0, 0, 1, 1], [], []>} : vector<8x3xf32>, vector<3x128xf32>, vector<8x128xf32> -> vector<8x128xf32>
    %cst_180 = arith.constant dense<0.000000e+00> : vector<8x128xf32>
    %690 = tpu.matmul %676, %4, %cst_180 {dimension_numbers = #tpu.dot_dimension_numbers<[1], [0], [0], [1], [0, 0, 1, 1], [], []>} : vector<8x32xf32>, vector<32x128xf32>, vector<8x128xf32> -> vector<8x128xf32>
    %691 = arith.addf %689, %690 : vector<8x128xf32>
    %692 = vector.broadcast %5 : vector<1x128xf32> to vector<8x128xf32>
    %693 = arith.addf %691, %692 : vector<8x128xf32>
    %694 = vector.extract_strided_slice %693 {offsets = [0, 0], sizes = [8, 32], strides = [1, 1]} : vector<8x128xf32> to vector<8x32xf32>
    %695 = arith.negf %694 : vector<8x32xf32>
    %696 = math.exp %695 : vector<8x32xf32>
    %cst_181 = arith.constant 1.000000e+00 : f32
    %697 = vector.broadcast %cst_181 : f32 to vector<8x32xf32>
    %698 = arith.addf %697, %696 : vector<8x32xf32>
    %699 = arith.divf %697, %698 : vector<8x32xf32>
    %700 = vector.extract_strided_slice %693 {offsets = [0, 32], sizes = [8, 32], strides = [1, 1]} : vector<8x128xf32> to vector<8x32xf32>
    %701 = arith.negf %700 : vector<8x32xf32>
    %702 = math.exp %701 : vector<8x32xf32>
    %cst_182 = arith.constant 1.000000e+00 : f32
    %703 = vector.broadcast %cst_182 : f32 to vector<8x32xf32>
    %704 = arith.addf %703, %702 : vector<8x32xf32>
    %705 = arith.divf %703, %704 : vector<8x32xf32>
    %706 = vector.extract_strided_slice %693 {offsets = [0, 64], sizes = [8, 32], strides = [1, 1]} : vector<8x128xf32> to vector<8x32xf32>
    %707 = math.tanh %706 : vector<8x32xf32>
    %708 = vector.extract_strided_slice %693 {offsets = [0, 96], sizes = [8, 32], strides = [1, 1]} : vector<8x128xf32> to vector<8x32xf32>
    %709 = arith.negf %708 : vector<8x32xf32>
    %710 = math.exp %709 : vector<8x32xf32>
    %cst_183 = arith.constant 1.000000e+00 : f32
    %711 = vector.broadcast %cst_183 : f32 to vector<8x32xf32>
    %712 = arith.addf %711, %710 : vector<8x32xf32>
    %713 = arith.divf %711, %712 : vector<8x32xf32>
    %714 = arith.mulf %705, %674 : vector<8x32xf32>
    %715 = arith.mulf %699, %707 : vector<8x32xf32>
    %716 = arith.addf %714, %715 : vector<8x32xf32>
    %717 = math.tanh %716 : vector<8x32xf32>
    %718 = arith.mulf %713, %717 : vector<8x32xf32>
    %cst_184 = arith.constant dense<0.000000e+00> : vector<8x2xf32>
    %719 = tpu.matmul %718, %7, %cst_184 {dimension_numbers = #tpu.dot_dimension_numbers<[1], [0], [0], [1], [0, 0, 1, 1], [], []>} : vector<8x32xf32>, vector<32x2xf32>, vector<8x2xf32> -> vector<8x2xf32>
    %720 = vector.broadcast %8 : vector<1x2xf32> to vector<8x2xf32>
    %721 = arith.addf %719, %720 : vector<8x2xf32>
    %c4_185 = arith.constant 4 : index
    %c0_186 = arith.constant 0 : index
    %c0_187 = arith.constant 0 : index
    %722 = vector.load %arg21[%c4_185, %c0_186, %c0_187] : memref<5x8x2xf32, #tpu.memory_space<vmem>>, vector<1x8x2xf32>
    %723 = vector.shape_cast %722 : vector<1x8x2xf32> to vector<8x2xf32>
    %724 = vector.shape_cast %721 : vector<8x2xf32> to vector<1x8x2xf32>
    tpu.vector_store %arg21[%c4_185, %c0_186, %c0_187], %724 {strides = array<i32>} : memref<5x8x2xf32, #tpu.memory_space<vmem>>, vector<1x8x2xf32>,
    return
  }
}

</mosaic_0001>

<bundles_post_ra>
// kernel: data_enhanced_forward.1
= control target key start
LH: loop header
LB: loop body
LE: loop exit
PB: predicated region body
PF: predicated region fallthrough
CT: control target
= control target key end

     0   :  { %v2412_v2 = vmov 0   ;;  %v2413_v4 = vmov 0.0   ;;  %s2414_s24 = smov 96   ;;  %s2416_s25 = smov 32   ;;  %vm163_vm4 = vcmask 130048   ;;  %s3059_s3 = inlined_call_operand.vmem [shape: f32[16,64], index: 3, kind: input, shape index: {}]   ;;  %s3060_s0 = inlined_call_operand.vmem [shape: f32[8,8,5], index: 0, kind: input, shape index: {}]   ;;  %s3061_s2 = inlined_call_operand.vmem [shape: f32[1,64], index: 2, kind: input, shape index: {}]   ;;  %s3062_s4 = inlined_call_operand.vmem [shape: f32[1,64], index: 4, kind: input, shape index: {}]   ;;  %s3063_s5 = inlined_call_operand.vmem [shape: f32[16,6], index: 5, kind: input, shape index: {}]   ;;  %s3064_s6 = inlined_call_operand.vmem [shape: f32[1,6], index: 6, kind: input, shape index: {}]   ;;  %s3065_s7 = inlined_call_operand.vmem [shape: f32[10,10], index: 7, kind: input, shape index: {}]   ;;  %s3066_s8 = inlined_call_operand.vmem [shape: f32[1,10], index: 8, kind: input, shape index: {}]   ;;  %s3067_s9 = inlined_call_operand.vmem [shape: f32[10,128], index: 9, kind: input, shape index: {}]   ;;  %s3068_s11 = inlined_call_operand.vmem [shape: f32[1,128], index: 11, kind: input, shape index: {}]   ;;  %s3069_s10 = inlined_call_operand.vmem [shape: f32[32,128], index: 10, kind: input, shape index: {}]   ;;  %s3070_s14 = inlined_call_operand.vmem [shape: f32[3,3], index: 14, kind: input, shape index: {}]   ;;  %s3071_s15 = inlined_call_operand.vmem [shape: f32[1,3], index: 15, kind: input, shape index: {}]   ;;  %s3072_s1 = inlined_call_operand.vmem [shape: f32[4,8,1], index: 1, kind: input, shape index: {}]   ;;  %s3073_s12 = inlined_call_operand.vmem [shape: f32[32,2], index: 12, kind: input, shape index: {}]   ;;  %s3074_s17 = inlined_call_operand.vmem [shape: f32[32,128], index: 17, kind: input, shape index: {}]   ;;  %s3075_s13 = inlined_call_operand.vmem [shape: f32[1,2], index: 13, kind: input, shape index: {}]   ;;  %s3076_s16 = inlined_call_operand.vmem [shape: f32[3,128], index: 16, kind: input, shape index: {}]   ;;  %s3077_s21 = inlined_call_operand.vmem [shape: f32[5,8,2], index: 21, kind: output, shape index: {}]   ;;  %s3078_s18 = inlined_call_operand.vmem [shape: f32[1,128], index: 18, kind: input, shape index: {}]   ;;  %s3079_s19 = inlined_call_operand.vmem [shape: f32[32,2], index: 19, kind: input, shape index: {}]   ;;  %s3080_s20 = inlined_call_operand.vmem [shape: f32[1,2], index: 20, kind: input, shape index: {}]  }
   0x1   :  { %3084 = sst [smem:[#allocation3_spill]] %s3059_s3  ;;  %2239 = vset.pattern.permute.xlu0 %v2412_v2  ;;  %2240 = vset.pattern.permute.xlu2 %v2412_v2  ;;  %s2419_s30 = smov 64  }
   0x2   :  { %3085 = sst [smem:[#allocation4_spill]] %s3060_s0  ;;  %2241 = vset.pattern.permute.xlu1 %v2412_v2 }
   0x3   :  { %3086 = sst [smem:[#allocation5_spill]] %s3061_s2  ;;  %s2415_s2 = smov 16  }
   0x4   :  { %3087 = sst [smem:[#allocation6_spill]] %s3062_s4 }
   0x5   :  { %3088 = sst [smem:[#allocation7_spill]] %s3063_s5  ;;  %s2418_s5 = smov 127  }
   0x6   :  { %3089 = sst [smem:[#allocation8_spill]] %s3064_s6 }
   0x7   :  { %s3090_s26 = sld [smem:[#allocation3_spill]] }
   0x8   :  { %s3091_s3 = sld [smem:[#allocation4_spill]] }
   0x9   :  { %s3092_s6 = sld [smem:[#allocation5_spill]] }
   0xa   :  { %s3093_s0 = sld [smem:[#allocation6_spill]] }
   0xb   :  { %s3094_s27 = sld [smem:[#allocation7_spill]] }
   0xc   :  { %s3095_s4 = sld [smem:[#allocation8_spill]] }
   0xd   :  { %v77_v0 = vld [vmem:[%s3090_s26 + $0x8] sm:$0xff]  ;;  %v76_v1 = vld [vmem:[%s3090_s26] sm:$0xff]  ;;  %s2417_s26 = smov 80  }
   0xe   :  { %v2539_v3 = vld [vmem:[%s3091_s3] sm:$0xff]  ;;  %181 = vmatpush.msra.mxu0 %v77_v0  ;;  %246 = vmatpush.msra.mxu1 %v77_v0  ;;  %v2562_v34 = vld [vmem:[%s3091_s3 + $0x8] sm:$0xff]  ;;  %v2576_v63 = vld [vmem:[%s3091_s3 + $0x10] sm:$0xff] }
   0xf   :  { %102 = vperm.xlu0 %2239, %v2539_v3   ;;  %312 = vmatpush.msra.mxu2 %v77_v0  ;;  %v2546_v5 = vld [vmem:[%s3092_s6] ss:$0 sm:$0xff] }
  0x10   :  { %182 = vmatpush.msra.mxu0 %v76_v1  ;;  %247 = vmatpush.msra.mxu1 %v76_v1  ;;  %v2552_v8 = vld [vmem:[%s3093_s0] ss:$0 sm:$0xff] }
  0x11   :  { %183 = vmatmul.f32.vlgmr.msra.gmra.mxu0 %v2413_v4  ;;  %313 = vmatpush.msra.mxu2 %v76_v1 }
  0x12   :  { %378 = vmatpush.msra.mxu3 %v77_v0  ;;  %444 = vmatpush.msrb.mxu0 %v77_v0 }
  0x13   :  { %510 = vmatpush.msrb.mxu1 %v77_v0  ;;  %576 = vmatpush.msrb.mxu2 %v77_v0 }
  0x14   :  { %379 = vmatpush.msra.mxu3 %v76_v1  ;;  %445 = vmatpush.msrb.mxu0 %v76_v1 }
  0x15   :  { %511 = vmatpush.msrb.mxu1 %v76_v1  ;;  %577 = vmatpush.msrb.mxu2 %v76_v1 }
  0x16   :  { %642 = vmatpush.msrb.mxu3 %v77_v0 }
  0x18   :  { %643 = vmatpush.msrb.mxu3 %v76_v1 }
  0x81   :  { %v103_v6 = vpop.permute.xlu0 %102 }
  0x82   :  { %v143_v7 = vmul.f32 %v2546_v5, %v103_v6 }
  0x84   :  { %v155_v9 = vadd.f32 %v2552_v8, %v143_v7 }
  0x8e   :  { %v184_v10 = vpop.f32.mrf.mxu0 }
  0x8f   :  { %v187_v11 = vadd.f32 %v184_v10, %v155_v9 }
  0x91   :  { %2252 = vtanh.f32 %v187_v11  ;;  %v2133_v13 = vmul.f32 -1.442695, %v187_v11 }
  0x93   :  { %2254 = vpow2.f32 %v2133_v13 }
  0x97   :  { %v2253_v12 = vpop.eup %2252 }
  0x98   :  { %210 = vrot.lane.b32.xlu0 %v2253_v12, %s2414_s24 }
  0x99   :  { %v2255_v14 = vpop.eup %2254 }
  0x9a   :  { %v191_v15 = vadd.f32 1.0, %v2255_v14 }
  0x9c   :  { %2256 = vrcp.f32 %v191_v15  ;;  %v203_v21 = vand.u32 2147483648, %v191_v15  ;;  %vm197_vm1 = vweird.f32 %v191_v15  ;;  %v201_v22 = vand.u32 2147483647, %v191_v15 }
  0x9e   :  { %v204_v24 = vor.u32 1.1754944e-38, %v203_v21  ;;  %vm202_vm3 = vcmp.eq.f32.partialorder %v201_v22, 8.507059e+37 }
  0xa2   :  { %v2257_v16 = vpop.eup %2256 }
  0xa3   :  { %v193_v17 = vmul.f32 %v2257_v16, %v191_v15  ;;  %vm198_vm0 = vweird.f32 %v2257_v16 }
  0xa4   :  { %vm199_vm2 = vmor %vm197_vm1, %vm198_vm0 }
  0xa5   :  { %v194_v18 = vsub.f32 1.0, %v193_v17 }
  0xa7   :  { %v195_v19 = vmul.f32 %v2257_v16, %v194_v18 }
  0xa9   :  { %v196_v20 = vadd.f32 %v2257_v16, %v195_v19 }
  0xab   :  { %v200_v23 = vsel %vm199_vm2, %v2257_v16, %v196_v20 }
  0xac   :  { %v205_v26 = vsel %vm202_vm3, %v204_v24, %v200_v23 }
  0xad   :  { %v208_v28 = vmul.f32 0.0, %v205_v26 }
 0x10a   :  { %v211_v25 = vpop.permute.xlu0 %210 }
 0x10b   :  { %v213_v27 = vmul.f32 %v211_v25, %v205_v26 }
 0x10d   :  { %215 = vrot.lane.b32.xlu1 %v213_v27, %s2415_s2 }
 0x17f   :  { %v216_v29 = vpop.permute.xlu1 %215 }
 0x180   :  { %v218_v30 = vadd.f32 %v216_v29, %v208_v28 }
 0x182   :  { %2258 = vtanh.f32 %v218_v30 }
 0x188   :  { %v2259_v31 = vpop.eup %2258 }
 0x189   :  { %221 = vrot.lane.b32.xlu1 %v2259_v31, %s2416_s25 }
 0x1fb   :  { %v222_v32 = vpop.permute.xlu1 %221 }
 0x1fc   :  { %v224_v33 = vmul.f32 %v222_v32, %v205_v26  ;;  %v2588_v26 = vld [vmem:[%s3091_s3 + $0x18] sm:$0xff] }
 0x1fe   :  { %226 = vrot.lane.b32.xlu2 %v224_v33, %s2417_s26 }
 0x206   :  { %107 = vperm.xlu2 %2240, %v2562_v34  }
 0x258   :  { %v227_v35 = vpop.permute.xlu2 %226 }
 0x259   :  { %229 = vst.msk [vmem:[#allocation2] sm:$0xff] %vm163_vm4, %v227_v35  ;;  %2134 = vmatmul.msk.f32.vlgmr.msra.gmra.mxu1 %vm163_vm4, %v227_v35 }
 0x260   :  { %v108_v36 = vpop.permute.xlu2 %107 }
 0x261   :  { %v144_v37 = vmul.f32 %v2546_v5, %v108_v36 }
 0x263   :  { %v156_v38 = vadd.f32 %v2552_v8, %v144_v37 }
 0x2d6   :  { %v249_v39 = vpop.f32.mrf.mxu1 }
 0x2d7   :  { %v252_v40 = vadd.f32 %v249_v39, %v156_v38 }
 0x2d9   :  { %2260 = vtanh.f32 %v252_v40  ;;  %v2135_v42 = vmul.f32 -1.442695, %v252_v40 }
 0x2db   :  { %2262 = vpow2.f32 %v2135_v42 }
 0x2df   :  { %v2261_v41 = vpop.eup %2260 }
 0x2e0   :  { %275 = vrot.lane.b32.xlu0 %v2261_v41, %s2414_s24 }
 0x2e1   :  { %v2263_v43 = vpop.eup %2262 }
 0x2e2   :  { %v256_v44 = vadd.f32 1.0, %v2263_v43 }
 0x2e4   :  { %2264 = vrcp.f32 %v256_v44  ;;  %v268_v50 = vand.u32 2147483648, %v256_v44  ;;  %vm262_vm6 = vweird.f32 %v256_v44  ;;  %v266_v51 = vand.u32 2147483647, %v256_v44 }
 0x2e6   :  { %v269_v53 = vor.u32 1.1754944e-38, %v268_v50  ;;  %vm267_vm8 = vcmp.eq.f32.partialorder %v266_v51, 8.507059e+37 }
 0x2ea   :  { %v2265_v45 = vpop.eup %2264 }
 0x2eb   :  { %v258_v46 = vmul.f32 %v2265_v45, %v256_v44  ;;  %vm263_vm5 = vweird.f32 %v2265_v45 }
 0x2ec   :  { %vm264_vm7 = vmor %vm262_vm6, %vm263_vm5 }
 0x2ed   :  { %v259_v47 = vsub.f32 1.0, %v258_v46 }
 0x2ef   :  { %v260_v48 = vmul.f32 %v2265_v45, %v259_v47 }
 0x2f1   :  { %v261_v49 = vadd.f32 %v2265_v45, %v260_v48 }
 0x2f3   :  { %v265_v52 = vsel %vm264_vm7, %v2265_v45, %v261_v49 }
 0x2f4   :  { %v270_v55 = vsel %vm267_vm8, %v269_v53, %v265_v52 }
 0x2f5   :  { %v273_v57 = vmul.f32 %v270_v55, %v218_v30 }
 0x352   :  { %v276_v54 = vpop.permute.xlu0 %275 }
 0x353   :  { %v278_v56 = vmul.f32 %v276_v54, %v270_v55 }
 0x355   :  { %280 = vrot.lane.b32.xlu1 %v278_v56, %s2415_s2  ;;  %v2602_v56 = vld [vmem:[%s3091_s3 + $0x20] sm:$0xff] }
 0x35d   :  { %112 = vperm.xlu1 %2241, %v2576_v63  }
 0x3c7   :  { %v281_v58 = vpop.permute.xlu1 %280 }
 0x3c8   :  { %v283_v59 = vadd.f32 %v281_v58, %v273_v57 }
 0x3ca   :  { %2266 = vtanh.f32 %v283_v59 }
 0x3cf   :  { %v113_v1 = vpop.permute.xlu1 %112 }
 0x3d0   :  { %v2267_v60 = vpop.eup %2266  ;;  %v145_v2 = vmul.f32 %v2546_v5, %v113_v1  ;;  %v700_v1 = vld [vmem:[%s3094_s27] sm:$0xff] }
 0x3d1   :  { %286 = vrot.lane.b32.xlu2 %v2267_v60, %s2416_s25 }
 0x3d2   :  { %v157_v6 = vadd.f32 %v2552_v8, %v145_v2 }
 0x42b   :  { %v287_v61 = vpop.permute.xlu2 %286 }
 0x42c   :  { %v289_v62 = vmul.f32 %v287_v61, %v270_v55 }
 0x42e   :  { %291 = vrot.lane.b32.xlu0 %v289_v62, %s2417_s26 }
 0x4a0   :  { %v292_v0 = vpop.permute.xlu0 %291 }
 0x4a1   :  { %295 = vst.msk [vmem:[#allocation2 + $0x8] sm:$0xff] %vm163_vm4, %v292_v0  ;;  %2136 = vmatmul.msk.f32.vlgmr.msra.gmra.mxu2 %vm163_vm4, %v292_v0  ;;  %v701_v0 = vld [vmem:[%s3094_s27 + $0x8] sm:$0xff] }
 0x4a2   :  { %744 = vmatpush.msra.mxu0 %v701_v0 }
 0x4a4   :  { %745 = vmatpush.msra.mxu0 %v700_v1 }
 0x524   :  { %v315_v7 = vpop.f32.mrf.mxu2 }
 0x525   :  { %v318_v9 = vadd.f32 %v315_v7, %v157_v6  ;;  %v692_v6 = vld [vmem:[#allocation2] sm:$0xff]  ;;  %v693_v7 = vld [vmem:[#allocation2 + $0x8] sm:$0xff] }
 0x527   :  { %2268 = vtanh.f32 %v318_v9  ;;  %v2137_v11 = vmul.f32 -1.442695, %v318_v9 }
 0x529   :  { %2270 = vpow2.f32 %v2137_v11 }
 0x52d   :  { %v2269_v10 = vpop.eup %2268 }
 0x52e   :  { %341 = vrot.lane.b32.xlu2 %v2269_v10, %s2414_s24 }
 0x52f   :  { %v2271_v12 = vpop.eup %2270 }
 0x530   :  { %v322_v13 = vadd.f32 1.0, %v2271_v12 }
 0x532   :  { %2272 = vrcp.f32 %v322_v13  ;;  %v334_v19 = vand.u32 2147483648, %v322_v13  ;;  %vm328_vm10 = vweird.f32 %v322_v13  ;;  %v332_v20 = vand.u32 2147483647, %v322_v13 }
 0x534   :  { %v335_v22 = vor.u32 1.1754944e-38, %v334_v19  ;;  %vm333_vm12 = vcmp.eq.f32.partialorder %v332_v20, 8.507059e+37 }
 0x538   :  { %v2273_v14 = vpop.eup %2272 }
 0x539   :  { %v324_v15 = vmul.f32 %v2273_v14, %v322_v13  ;;  %vm329_vm9 = vweird.f32 %v2273_v14 }
 0x53a   :  { %vm330_vm11 = vmor %vm328_vm10, %vm329_vm9  ;;  %vm876_vm10 = vcmask 1045504  }
 0x53b   :  { %v325_v16 = vsub.f32 1.0, %v324_v15 }
 0x53d   :  { %v326_v17 = vmul.f32 %v2273_v14, %v325_v16 }
 0x53f   :  { %v327_v18 = vadd.f32 %v2273_v14, %v326_v17 }
 0x541   :  { %v331_v21 = vsel %vm330_vm11, %v2273_v14, %v327_v18  ;;  %vm851_vm11 = vcmask 48128  }
 0x542   :  { %v336_v24 = vsel %vm333_vm12, %v335_v22, %v331_v21 }
 0x543   :  { %v339_v27 = vmul.f32 %v336_v24, %v283_v59 }
 0x588   :  { %v342_v23 = vpop.permute.xlu2 %341 }
 0x589   :  { %v344_v25 = vmul.f32 %v342_v23, %v336_v24 }
 0x58b   :  { %346 = vrot.lane.b32.xlu0 %v344_v25, %s2415_s2 }
 0x593   :  { %117 = vperm.xlu0 %2239, %v2588_v26  }
 0x5fd   :  { %v347_v28 = vpop.permute.xlu0 %346 }
 0x5fe   :  { %v349_v29 = vadd.f32 %v347_v28, %v339_v27 }
 0x600   :  { %2274 = vtanh.f32 %v349_v29 }
 0x605   :  { %v118_v35 = vpop.permute.xlu0 %117 }
 0x606   :  { %v2275_v30 = vpop.eup %2274  ;;  %v146_v36 = vmul.f32 %v2546_v5, %v118_v35 }
 0x607   :  { %352 = vrot.lane.b32.xlu1 %v2275_v30, %s2416_s25 }
 0x608   :  { %v158_v37 = vadd.f32 %v2552_v8, %v146_v36 }
 0x679   :  { %v353_v31 = vpop.permute.xlu1 %352 }
 0x67a   :  { %v355_v32 = vmul.f32 %v353_v31, %v336_v24 }
 0x67c   :  { %357 = vrot.lane.b32.xlu2 %v355_v32, %s2417_s26 }
 0x6d6   :  { %v358_v33 = vpop.permute.xlu2 %357 }
 0x6d7   :  { %361 = vst.msk [vmem:[#allocation2 + $0x10] sm:$0xff] %vm163_vm4, %v358_v33  ;;  %2138 = vmatmul.msk.f32.vlgmr.msra.gmra.mxu3 %vm163_vm4, %v358_v33  ;;  %v2626_v33 = vld [vmem:[%s3091_s3 + $0x28] sm:$0xff] }
 0x6de   :  { %v694_v9 = vld [vmem:[#allocation2 + $0x10] sm:$0xff] }
 0x75a   :  { %v381_v38 = vpop.f32.mrf.mxu3 }
 0x75b   :  { %v384_v39 = vadd.f32 %v381_v38, %v158_v37 }
 0x75d   :  { %2276 = vtanh.f32 %v384_v39  ;;  %v2139_v41 = vmul.f32 -1.442695, %v384_v39 }
 0x75f   :  { %2278 = vpow2.f32 %v2139_v41 }
 0x763   :  { %v2277_v40 = vpop.eup %2276 }
 0x764   :  { %407 = vrot.lane.b32.xlu1 %v2277_v40, %s2414_s24 }
 0x765   :  { %v2279_v42 = vpop.eup %2278 }
 0x766   :  { %v388_v43 = vadd.f32 1.0, %v2279_v42 }
 0x768   :  { %2280 = vrcp.f32 %v388_v43  ;;  %v400_v49 = vand.u32 2147483648, %v388_v43  ;;  %vm394_vm14 = vweird.f32 %v388_v43  ;;  %v398_v50 = vand.u32 2147483647, %v388_v43 }
 0x76a   :  { %v401_v52 = vor.u32 1.1754944e-38, %v400_v49  ;;  %vm399_vm0 = vcmp.eq.f32.partialorder %v398_v50, 8.507059e+37 }
 0x76e   :  { %v2281_v44 = vpop.eup %2280 }
 0x76f   :  { %v390_v45 = vmul.f32 %v2281_v44, %v388_v43  ;;  %vm395_vm13 = vweird.f32 %v2281_v44 }
 0x770   :  { %vm396_vm15 = vmor %vm394_vm14, %vm395_vm13 }
 0x771   :  { %v391_v46 = vsub.f32 1.0, %v390_v45 }
 0x773   :  { %v392_v47 = vmul.f32 %v2281_v44, %v391_v46 }
 0x775   :  { %v393_v48 = vadd.f32 %v2281_v44, %v392_v47 }
 0x777   :  { %v397_v51 = vsel %vm396_vm15, %v2281_v44, %v393_v48 }
 0x778   :  { %v402_v54 = vsel %vm399_vm0, %v401_v52, %v397_v51  ;;  %vm806_vm0 = vcmask 1043456  }
 0x779   :  { %v405_v57 = vmul.f32 %v402_v54, %v349_v29 }
 0x7d6   :  { %v408_v53 = vpop.permute.xlu1 %407 }
 0x7d7   :  { %v410_v55 = vmul.f32 %v408_v53, %v402_v54 }
 0x7d9   :  { %412 = vrot.lane.b32.xlu2 %v410_v55, %s2415_s2 }
 0x7e1   :  { %122 = vperm.xlu2 %2240, %v2602_v56  }
 0x833   :  { %v413_v58 = vpop.permute.xlu2 %412 }
 0x834   :  { %v415_v59 = vadd.f32 %v413_v58, %v405_v57 }
 0x836   :  { %2282 = vtanh.f32 %v415_v59 }
 0x83b   :  { %v123_v11 = vpop.permute.xlu2 %122 }
 0x83c   :  { %v2283_v60 = vpop.eup %2282  ;;  %v147_v12 = vmul.f32 %v2546_v5, %v123_v11 }
 0x83d   :  { %418 = vrot.lane.b32.xlu0 %v2283_v60, %s2416_s25 }
 0x83e   :  { %v159_v13 = vadd.f32 %v2552_v8, %v147_v12 }
 0x8af   :  { %v419_v61 = vpop.permute.xlu0 %418 }
 0x8b0   :  { %v421_v62 = vmul.f32 %v419_v61, %v402_v54 }
 0x8b2   :  { %423 = vrot.lane.b32.xlu1 %v421_v62, %s2417_s26 }
 0x924   :  { %v424_v2 = vpop.permute.xlu1 %423 }
 0x925   :  { %427 = vst.msk [vmem:[#allocation2 + $0x18] sm:$0xff] %vm163_vm4, %v424_v2  ;;  %2140 = vmatmul.msk.f32.vlgmr.msrb.gmra.mxu0 %vm163_vm4, %v424_v2  ;;  %v2641_v2 = vld [vmem:[%s3091_s3 + $0x30] sm:$0xff] }
 0x92c   :  { %v695_v10 = vld [vmem:[#allocation2 + $0x18] sm:$0xff] }
 0x92d   :  { %2148 = vmatmul.msk.f32.vlgmr.msra.gmra.mxu0 %vm163_vm4, %v692_v6 }
 0x935   :  { %2149 = vmatmul.msk.f32.gmra.mxu0 %vm163_vm4, %v693_v7 }
 0x93d   :  { %2150 = vmatmul.msk.f32.gmra.mxu0 %vm163_vm4, %v694_v9 }
 0x945   :  { %2151 = vmatmul.msk.f32.gmra.mxu0 %vm163_vm4, %v695_v10 }
 0x9a2   :  { %v447_v14 = vpop.f32.mrf.mxu0 }
 0x9a3   :  { %v450_v15 = vadd.f32 %v447_v14, %v159_v13  ;;  %v771_v13 = vld [vmem:[%s3065_s7] sm:$0x3f] }
 0x9a4   :  { %2165 = vmatpush.msk.msra.mxu2 %vm876_vm10, %v771_v13 }
 0x9a5   :  { %2284 = vtanh.f32 %v450_v15  ;;  %v2141_v17 = vmul.f32 -1.442695, %v450_v15 }
 0x9a7   :  { %2286 = vpow2.f32 %v2141_v17 }
 0x9aa   :  { %v747_v14 = vpop.f32.mrf.mxu0 }
 0x9ab   :  { %v2285_v16 = vpop.eup %2284 }
 0x9ac   :  { %473 = vrot.lane.b32.xlu0 %v2285_v16, %s2414_s24  ;;  %v2657_v16 = vld [vmem:[%s3095_s4] ss:$0 sm:$0xff] }
 0x9ad   :  { %v2287_v18 = vpop.eup %2286  ;;  %v748_v17 = vadd.f32 %v2657_v16, %v747_v14  ;;  %v2709_v14 = vld [vmem:[%s3066_s8] ss:$0 sm:$0xff] }
 0x9ae   :  { %v454_v19 = vadd.f32 1.0, %v2287_v18 }
 0x9b0   :  { %2288 = vrcp.f32 %v454_v19  ;;  %v466_v25 = vand.u32 2147483648, %v454_v19  ;;  %vm460_vm2 = vweird.f32 %v454_v19  ;;  %v464_v27 = vand.u32 2147483647, %v454_v19 }
 0x9b2   :  { %v467_v29 = vor.u32 1.1754944e-38, %v466_v25  ;;  %vm465_vm5 = vcmp.eq.f32.partialorder %v464_v27, 8.507059e+37  ;;  %v750_v18 = vpop.f32.mrf.mxu0 }
 0x9b6   :  { %v2289_v20 = vpop.eup %2288 }
 0x9b7   :  { %v456_v21 = vmul.f32 %v2289_v20, %v454_v19  ;;  %vm461_vm1 = vweird.f32 %v2289_v20 }
 0x9b8   :  { %vm462_vm3 = vmor %vm460_vm2, %vm461_vm1  ;;  %vm789_vm1 = vcmask 31744   ;;  %vm972_vm2 = vcmask 1041408  }
 0x9b9   :  { %v457_v22 = vsub.f32 1.0, %v456_v21 }
 0x9ba   :  { %v753_v21 = vpop.f32.mrf.mxu0 }
 0x9bb   :  { %v458_v23 = vmul.f32 %v2289_v20, %v457_v22  ;;  %v754_v22 = vadd.f32 %v2657_v16, %v753_v21 }
 0x9bd   :  { %v459_v24 = vadd.f32 %v2289_v20, %v458_v23 }
 0x9bf   :  { %v463_v28 = vsel %vm462_vm3, %v2289_v20, %v459_v24  ;;  %v751_v20 = vadd.f32 %v2657_v16, %v750_v18  ;;  %vm947_vm3 = vcmask 80896  }
 0x9c0   :  { %v468_v31 = vsel %vm465_vm5, %v467_v29, %v463_v28 }
 0x9c1   :  { %v471_v35 = vmul.f32 %v468_v31, %v415_v59 }
 0x9c2   :  { %v756_v23 = vpop.f32.mrf.mxu0 }
 0x9c3   :  { %v757_v24 = vadd.f32 %v2657_v16, %v756_v23 }
 0xa1e   :  { %v474_v30 = vpop.permute.xlu0 %473 }
 0xa1f   :  { %v476_v32 = vmul.f32 %v474_v30, %v468_v31 }
 0xa21   :  { %478 = vrot.lane.b32.xlu1 %v476_v32, %s2415_s2 }
 0xa29   :  { %127 = vperm.xlu1 %2241, %v2626_v33  }
 0xa93   :  { %v479_v36 = vpop.permute.xlu1 %478 }
 0xa94   :  { %v481_v37 = vadd.f32 %v479_v36, %v471_v35 }
 0xa96   :  { %2290 = vtanh.f32 %v481_v37 }
 0xa9b   :  { %v128_v43 = vpop.permute.xlu1 %127 }
 0xa9c   :  { %v2291_v38 = vpop.eup %2290  ;;  %v148_v44 = vmul.f32 %v2546_v5, %v128_v43 }
 0xa9d   :  { %484 = vrot.lane.b32.xlu2 %v2291_v38, %s2416_s25 }
 0xa9e   :  { %v160_v45 = vadd.f32 %v2552_v8, %v148_v44 }
 0xaf7   :  { %v485_v39 = vpop.permute.xlu2 %484 }
 0xaf8   :  { %v487_v40 = vmul.f32 %v485_v39, %v468_v31 }
 0xafa   :  { %489 = vrot.lane.b32.xlu0 %v487_v40, %s2417_s26 }
 0xb6c   :  { %v490_v41 = vpop.permute.xlu0 %489 }
 0xb6d   :  { %493 = vst.msk [vmem:[#allocation2 + $0x20] sm:$0xff] %vm163_vm4, %v490_v41  ;;  %2142 = vmatmul.msk.f32.vlgmr.msrb.gmra.mxu1 %vm163_vm4, %v490_v41 }
 0xb74   :  { %v696_v42 = vld [vmem:[#allocation2 + $0x20] sm:$0xff] }
 0xb75   :  { %2152 = vmatmul.msk.f32.gmra.mxu0 %vm163_vm4, %v696_v42 }
 0xbea   :  { %v513_v46 = vpop.f32.mrf.mxu1 }
 0xbeb   :  { %v516_v47 = vadd.f32 %v513_v46, %v160_v45 }
 0xbed   :  { %2292 = vtanh.f32 %v516_v47  ;;  %v2143_v49 = vmul.f32 -1.442695, %v516_v47 }
 0xbef   :  { %2294 = vpow2.f32 %v2143_v49 }
 0xbf2   :  { %v759_v25 = vpop.f32.mrf.mxu0 }
 0xbf3   :  { %v2293_v48 = vpop.eup %2292  ;;  %v760_v27 = vadd.f32 %v2657_v16, %v759_v25 }
 0xbf4   :  { %539 = vrot.lane.b32.xlu2 %v2293_v48, %s2414_s24 }
 0xbf5   :  { %v2295_v50 = vpop.eup %2294 }
 0xbf6   :  { %v520_v51 = vadd.f32 1.0, %v2295_v50 }
 0xbf8   :  { %2296 = vrcp.f32 %v520_v51  ;;  %v532_v58 = vand.u32 2147483648, %v520_v51  ;;  %vm526_vm7 = vweird.f32 %v520_v51  ;;  %v530_v59 = vand.u32 2147483647, %v520_v51 }
 0xbfa   :  { %v533_v61 = vor.u32 1.1754944e-38, %v532_v58  ;;  %vm531_vm9 = vcmp.eq.f32.partialorder %v530_v59, 8.507059e+37 }
 0xbfe   :  { %v2297_v52 = vpop.eup %2296 }
 0xbff   :  { %v522_v53 = vmul.f32 %v2297_v52, %v520_v51  ;;  %vm527_vm6 = vweird.f32 %v2297_v52 }
 0xc00   :  { %vm528_vm8 = vmor %vm526_vm7, %vm527_vm6 }
 0xc01   :  { %v523_v54 = vsub.f32 1.0, %v522_v53  ;;  %v2679_v53 = vld [vmem:[%s3091_s3 + $0x38] sm:$0xff] }
 0xc03   :  { %v524_v55 = vmul.f32 %v2297_v52, %v523_v54 }
 0xc05   :  { %v525_v57 = vadd.f32 %v2297_v52, %v524_v55 }
 0xc07   :  { %v529_v60 = vsel %vm528_vm8, %v2297_v52, %v525_v57 }
 0xc08   :  { %v534_v0 = vsel %vm531_vm9, %v533_v61, %v529_v60  ;;  %v772_v61 = vld [vmem:[%s3065_s7 + $0x6] sm:$0xf] }
 0xc09   :  { %v537_v6 = vmul.f32 %v534_v0, %v481_v37  ;;  %2156 = vmatpush.msk.msra.mxu1 %vm806_vm0, %v772_v61 }
 0xc4e   :  { %v540_v62 = vpop.permute.xlu2 %539 }
 0xc4f   :  { %v542_v1 = vmul.f32 %v540_v62, %v534_v0 }
 0xc51   :  { %544 = vrot.lane.b32.xlu0 %v542_v1, %s2415_s2 }
 0xc59   :  { %132 = vperm.xlu0 %2239, %v2641_v2  }
 0xcc3   :  { %v545_v7 = vpop.permute.xlu0 %544 }
 0xcc4   :  { %v2644_v9 = vadd.f32 %v545_v7, %v537_v6  ;;  %v941_v6 = vld [vmem:[%s3067_s9] sm:$0xff] }
 0xcc6   :  { %2298 = vtanh.f32 %v2644_v9 }
 0xccb   :  { %v133_v28 = vpop.permute.xlu0 %132 }
 0xccc   :  { %v2299_v10 = vpop.eup %2298  ;;  %v149_v29 = vmul.f32 %v2546_v5, %v133_v28 }
 0xccd   :  { %550 = vrot.lane.b32.xlu1 %v2299_v10, %s2416_s25 }
 0xcce   :  { %v161_v30 = vadd.f32 %v2552_v8, %v149_v29 }
 0xd3f   :  { %v551_v11 = vpop.permute.xlu1 %550 }
 0xd40   :  { %v553_v12 = vmul.f32 %v551_v11, %v534_v0 }
 0xd42   :  { %555 = vrot.lane.b32.xlu2 %v553_v12, %s2417_s26 }
 0xd9c   :  { %v556_v15 = vpop.permute.xlu2 %555 }
 0xd9d   :  { %559 = vst.msk [vmem:[#allocation2 + $0x28] sm:$0xff] %vm163_vm4, %v556_v15  ;;  %2144 = vmatmul.msk.f32.vlgmr.msrb.gmra.mxu2 %vm163_vm4, %v556_v15 }
 0xda4   :  { %v697_v19 = vld [vmem:[#allocation2 + $0x28] sm:$0xff] }
 0xda5   :  { %2153 = vmatmul.msk.f32.gmra.mxu0 %vm163_vm4, %v697_v19  ;;  %2166 = vmatmul.msk.f32.vlgmr.msra.gmra.mxu2 %vm851_vm11, %v748_v17 }
 0xdad   :  { %2167 = vmatmul.msk.f32.gmra.mxu2 %vm851_vm11, %v751_v20 }
 0xdb5   :  { %2168 = vmatmul.msk.f32.gmra.mxu2 %vm851_vm11, %v754_v22 }
 0xdbd   :  { %2169 = vmatmul.msk.f32.gmra.mxu2 %vm851_vm11, %v757_v24 }
 0xdc5   :  { %2170 = vmatmul.msk.f32.gmra.mxu2 %vm851_vm11, %v760_v27 }
 0xe20   :  { %v579_v31 = vpop.f32.mrf.mxu2 }
 0xe21   :  { %v582_v32 = vadd.f32 %v579_v31, %v161_v30 }
 0xe22   :  { %v762_v35 = vpop.f32.mrf.mxu0 }
 0xe23   :  { %2300 = vtanh.f32 %v582_v32  ;;  %v763_v36 = vadd.f32 %v2657_v16, %v762_v35  ;;  %v2145_v38 = vmul.f32 -1.442695, %v582_v32 }
 0xe25   :  { %2171 = vmatmul.msk.f32.gmra.mxu2 %vm851_vm11, %v763_v36  ;;  %2302 = vpow2.f32 %v2145_v38 }
 0xe28   :  { %v897_v12 = vpop.f32.mrf.mxu2 }
 0xe29   :  { %v2301_v37 = vpop.eup %2300 }
 0xe2a   :  { %605 = vrot.lane.b32.xlu1 %v2301_v37, %s2414_s24 }
 0xe2b   :  { %v2303_v39 = vpop.eup %2302 }
 0xe2c   :  { %v586_v40 = vadd.f32 1.0, %v2303_v39 }
 0xe2e   :  { %2304 = vrcp.f32 %v586_v40  ;;  %v598_v46 = vand.u32 2147483648, %v586_v40  ;;  %vm592_vm13 = vweird.f32 %v586_v40  ;;  %v596_v47 = vand.u32 2147483647, %v586_v40 }
 0xe30   :  { %v599_v49 = vor.u32 1.1754944e-38, %v598_v46  ;;  %vm597_vm15 = vcmp.eq.f32.partialorder %v596_v47, 8.507059e+37  ;;  %v900_v47 = vpop.f32.mrf.mxu2 }
 0xe34   :  { %v2305_v41 = vpop.eup %2304 }
 0xe35   :  { %v588_v42 = vmul.f32 %v2305_v41, %v586_v40  ;;  %vm593_vm12 = vweird.f32 %v2305_v41 }
 0xe36   :  { %vm594_vm14 = vmor %vm592_vm13, %vm593_vm12  ;;  %vm1017_vm12 = vcmask 261120  }
 0xe37   :  { %v589_v43 = vsub.f32 1.0, %v588_v42 }
 0xe39   :  { %v590_v44 = vmul.f32 %v2305_v41, %v589_v43 }
 0xe3b   :  { %v591_v45 = vadd.f32 %v2305_v41, %v590_v44  ;;  %v79_v44 = vld [vmem:[%s3069_s10 + $0x8] sm:$0xff] }
 0xe3d   :  { %v595_v48 = vsel %vm594_vm14, %v2305_v41, %v591_v45 }
 0xe3e   :  { %v600_v51 = vsel %vm597_vm15, %v599_v49, %v595_v48 }
 0xe3f   :  { %v603_v54 = vmul.f32 %v600_v51, %v2644_v9 }
 0xe9c   :  { %v606_v50 = vpop.permute.xlu1 %605 }
 0xe9d   :  { %v608_v52 = vmul.f32 %v606_v50, %v600_v51 }
 0xe9f   :  { %610 = vrot.lane.b32.xlu2 %v608_v52, %s2415_s2  ;;  %v903_v52 = vpop.f32.mrf.mxu2 }
 0xea7   :  { %137 = vperm.xlu2 %2240, %v2679_v53  }
 0xef9   :  { %v611_v55 = vpop.permute.xlu2 %610 }
 0xefa   :  { %v2683_v57 = vadd.f32 %v611_v55, %v603_v54 }
 0xefc   :  { %2306 = vtanh.f32 %v2683_v57 }
 0xf01   :  { %v138_v7 = vpop.permute.xlu2 %137 }
 0xf02   :  { %v2307_v58 = vpop.eup %2306  ;;  %v150_v9 = vmul.f32 %v2546_v5, %v138_v7 }
 0xf03   :  { %616 = vrot.lane.b32.xlu0 %v2307_v58, %s2416_s25  ;;  %v78_v58 = vld [vmem:[%s3069_s10] sm:$0xff] }
 0xf04   :  { %v162_v10 = vadd.f32 %v2552_v8, %v150_v9 }
 0xf75   :  { %v617_v59 = vpop.permute.xlu0 %616 }
 0xf76   :  { %v619_v60 = vmul.f32 %v617_v59, %v600_v51 }
 0xf78   :  { %621 = vrot.lane.b32.xlu1 %v619_v60, %s2417_s26 }
 0xf80   :  { %773 = vrot.lane.b32.xlu1 %v2539_v3, %s2418_s5  ;;  %v942_v3 = vld [vmem:[%s3067_s9 + $0x8] sm:$0x3] }
 0xf81   :  { %2174 = vmatpush.msk.msra.mxu3 %vm972_vm2, %v942_v3 }
 0xf83   :  { %991 = vmatpush.msra.mxu3 %v941_v6 }
 0xfea   :  { %v622_v62 = vpop.permute.xlu1 %621 }
 0xfeb   :  { %625 = vst.msk [vmem:[#allocation2 + $0x30] sm:$0xff] %vm163_vm4, %v622_v62  ;;  %2146 = vmatmul.msk.f32.vlgmr.msrb.gmra.mxu3 %vm163_vm4, %v622_v62 }
 0xff2   :  { %v774_v0 = vpop.permute.xlu1 %773  ;;  %v698_v1 = vld [vmem:[#allocation2 + $0x30] sm:$0xff] }
 0xff3   :  { %2154 = vmatmul.msk.f32.gmra.mxu0 %vm163_vm4, %v698_v1  ;;  %2157 = vmatmul.msk.f32.vlgmr.msra.gmra.mxu1 %vm789_vm1, %v774_v0  ;;  %v2753_v0 = vld [vmem:[%s3068_s11] ss:$0 sm:$0xff] }
0x106e   :  { %v645_v11 = vpop.f32.mrf.mxu3 }
0x106f   :  { %v648_v13 = vadd.f32 %v645_v11, %v162_v10 }
0x1070   :  { %v765_v15 = vpop.f32.mrf.mxu0  ;;  %v827_v17 = vpop.f32.mrf.mxu1 }
0x1071   :  { %2308 = vtanh.f32 %v648_v13  ;;  %v766_v18 = vadd.f32 %v2657_v16, %v765_v15  ;;  %v898_v19 = vadd.f32 %v897_v12, %v827_v17  ;;  %v2147_v21 = vmul.f32 -1.442695, %v648_v13 }
0x1073   :  { %v925_v20 = vadd.f32 %v2709_v14, %v898_v19  ;;  %2172 = vmatmul.msk.f32.gmra.mxu2 %vm851_vm11, %v766_v18  ;;  %2310 = vpow2.f32 %v2147_v21 }
0x1075   :  { %v933_v5 = vmax.f32 %v925_v20, 0.0 }
0x1077   :  { %v2309_v8 = vpop.eup %2308  ;;  %2175 = vmatmul.msk.f32.vlgmr.msra.gmra.mxu3 %vm947_vm3, %v933_v5 }
0x1078   :  { %671 = vrot.lane.b32.xlu0 %v2309_v8, %s2414_s24 }
0x1079   :  { %v2311_v22 = vpop.eup %2310 }
0x107a   :  { %v652_v23 = vadd.f32 1.0, %v2311_v22 }
0x107c   :  { %2312 = vrcp.f32 %v652_v23  ;;  %v664_v30 = vand.u32 2147483648, %v652_v23  ;;  %vm658_vm6 = vweird.f32 %v652_v23  ;;  %v662_v31 = vand.u32 2147483647, %v652_v23 }
0x107e   :  { %v665_v35 = vor.u32 1.1754944e-38, %v664_v30  ;;  %vm663_vm8 = vcmp.eq.f32.partialorder %v662_v31, 8.507059e+37  ;;  %v906_v30 = vpop.f32.mrf.mxu2 }
0x1082   :  { %v2313_v24 = vpop.eup %2312 }
0x1083   :  { %v654_v25 = vmul.f32 %v2313_v24, %v652_v23  ;;  %vm659_vm5 = vweird.f32 %v2313_v24 }
0x1084   :  { %vm660_vm7 = vmor %vm658_vm6, %vm659_vm5 }
0x1085   :  { %v655_v27 = vsub.f32 1.0, %v654_v25 }
0x1087   :  { %v656_v28 = vmul.f32 %v2313_v24, %v655_v27 }
0x1089   :  { %v657_v29 = vadd.f32 %v2313_v24, %v656_v28 }
0x108b   :  { %v661_v32 = vsel %vm660_vm7, %v2313_v24, %v657_v29 }
0x108c   :  { %v666_v37 = vsel %vm663_vm8, %v665_v35, %v661_v32 }
0x108d   :  { %v669_v39 = vmul.f32 %v666_v37, %v2683_v57 }
0x10ea   :  { %v672_v36 = vpop.permute.xlu0 %671 }
0x10eb   :  { %v674_v38 = vmul.f32 %v672_v36, %v666_v37 }
0x10ed   :  { %676 = vrot.lane.b32.xlu2 %v674_v38, %s2415_s2 }
0x10f5   :  { %775 = vrot.lane.b32.xlu2 %v2562_v34, %s2418_s5 }
0x10fa   :  { %v993_v1 = vpop.f32.mrf.mxu3 }
0x10fb   :  { %v994_v3 = vadd.f32 %v2753_v0, %v993_v1 }
0x10fd   :  { %777 = vrot.lane.b32.xlu2 %v2576_v63, %s2418_s5  ;;  %v81_v63 = vld [vmem:[%s3069_s10 + $0x18] sm:$0xff] }
0x10fe   :  { %1032 = vmatpush.msrb.mxu0 %v81_v63  ;;  %1095 = vmatpush.msrb.mxu1 %v81_v63 }
0x10ff   :  { %1158 = vmatpush.msrb.mxu2 %v81_v63  ;;  %1221 = vmatpush.msrb.mxu3 %v81_v63 }
0x1105   :  { %781 = vrot.lane.b32.xlu2 %v2602_v56, %s2418_s5  ;;  %v80_v56 = vld [vmem:[%s3069_s10 + $0x10] sm:$0xff] }
0x1106   :  { %1033 = vmatpush.msrb.mxu0 %v80_v56  ;;  %1096 = vmatpush.msrb.mxu1 %v80_v56 }
0x1107   :  { %1159 = vmatpush.msrb.mxu2 %v80_v56  ;;  %1222 = vmatpush.msrb.mxu3 %v80_v56 }
0x1108   :  { %1034 = vmatpush.msrb.mxu0 %v79_v44  ;;  %1097 = vmatpush.msrb.mxu1 %v79_v44 }
0x1109   :  { %1160 = vmatpush.msrb.mxu2 %v79_v44  ;;  %1223 = vmatpush.msrb.mxu3 %v79_v44 }
0x110a   :  { %1035 = vmatpush.msrb.mxu0 %v78_v58  ;;  %1098 = vmatpush.msrb.mxu1 %v78_v58 }
0x110b   :  { %1161 = vmatpush.msrb.mxu2 %v78_v58  ;;  %1224 = vmatpush.msrb.mxu3 %v78_v58 }
0x110c   :  { %1284 = vmatpush.msra.mxu0 %v81_v63  ;;  %1347 = vmatpush.msra.mxu1 %v81_v63 }
0x110d   :  { %787 = vrot.lane.b32.xlu2 %v2679_v53, %s2418_s5  ;;  %1410 = vmatpush.msra.mxu2 %v81_v63 }
0x110e   :  { %1473 = vmatpush.msra.mxu3 %v81_v63  ;;  %1285 = vmatpush.msra.mxu0 %v80_v56 }
0x110f   :  { %1348 = vmatpush.msra.mxu1 %v80_v56  ;;  %1411 = vmatpush.msra.mxu2 %v80_v56 }
0x1110   :  { %1474 = vmatpush.msra.mxu3 %v80_v56  ;;  %1286 = vmatpush.msra.mxu0 %v79_v44 }
0x1111   :  { %1349 = vmatpush.msra.mxu1 %v79_v44  ;;  %1412 = vmatpush.msra.mxu2 %v79_v44 }
0x1112   :  { %1475 = vmatpush.msra.mxu3 %v79_v44  ;;  %1287 = vmatpush.msra.mxu0 %v78_v58 }
0x1113   :  { %1350 = vmatpush.msra.mxu1 %v78_v58  ;;  %1413 = vmatpush.msra.mxu2 %v78_v58 }
0x1114   :  { %1476 = vmatpush.msra.mxu3 %v78_v58 }
0x1147   :  { %v677_v40 = vpop.permute.xlu2 %676 }
0x1148   :  { %v679_v41 = vadd.f32 %v677_v40, %v669_v39  ;;  %v909_v39 = vpop.f32.mrf.mxu2 }
0x114a   :  { %2314 = vtanh.f32 %v679_v41 }
0x114f   :  { %v776_v42 = vpop.permute.xlu2 %775 }
0x1150   :  { %v2315_v43 = vpop.eup %2314  ;;  %2158 = vmatmul.msk.f32.gmra.mxu1 %vm789_vm1, %v776_v42  ;;  %v912_v63 = vpop.f32.mrf.mxu2 }
0x1151   :  { %682 = vrot.lane.b32.xlu0 %v2315_v43, %s2416_s25 }
0x1157   :  { %v778_v34 = vpop.permute.xlu2 %777 }
0x1158   :  { %2159 = vmatmul.msk.f32.gmra.mxu1 %vm789_vm1, %v778_v34 }
0x115f   :  { %v782_v29 = vpop.permute.xlu2 %781 }
0x1167   :  { %v788_v42 = vpop.permute.xlu2 %787 }
0x11c3   :  { %v683_v45 = vpop.permute.xlu0 %682 }
0x11c4   :  { %v685_v46 = vmul.f32 %v683_v45, %v666_v37 }
0x11c6   :  { %687 = vrot.lane.b32.xlu1 %v685_v46, %s2417_s26 }
0x11cd   :  { %v830_v48 = vpop.f32.mrf.mxu1 }
0x11ce   :  { %v901_v49 = vadd.f32 %v900_v47, %v830_v48  ;;  %v915_v47 = vpop.f32.mrf.mxu2 }
0x11d0   :  { %v926_v50 = vadd.f32 %v2709_v14, %v901_v49 }
0x11d2   :  { %v934_v51 = vmax.f32 %v926_v50, 0.0 }
0x11d4   :  { %2176 = vmatmul.msk.f32.gmra.mxu3 %vm947_vm3, %v934_v51 }
0x11d5   :  { %v833_v53 = vpop.f32.mrf.mxu1 }
0x11d6   :  { %v904_v54 = vadd.f32 %v903_v52, %v833_v53 }
0x11d8   :  { %v927_v55 = vadd.f32 %v2709_v14, %v904_v54 }
0x11da   :  { %v935_v57 = vmax.f32 %v927_v55, 0.0 }
0x11dc   :  { %2177 = vmatmul.msk.f32.gmra.mxu3 %vm947_vm3, %v935_v57 }
0x1238   :  { %v688_v59 = vpop.permute.xlu1 %687 }
0x1239   :  { %691 = vst.msk [vmem:[#allocation2 + $0x38] sm:$0xff] %vm163_vm4, %v688_v59 }
0x1240   :  { %v699_v60 = vld [vmem:[#allocation2 + $0x38] sm:$0xff] }
0x1241   :  { %2155 = vmatmul.msk.f32.gmra.mxu0 %vm163_vm4, %v699_v60 }
0x1249   :  { %1036 = vmatmul.f32.vlgmr.msrb.gmra.mxu0 %v2413_v4 }
0x1257   :  { %v996_v58 = vpop.f32.mrf.mxu3 }
0x1258   :  { %v997_v59 = vadd.f32 %v2753_v0, %v996_v58 }
0x12be   :  { %v768_v61 = vpop.f32.mrf.mxu0 }
0x12bf   :  { %v769_v62 = vadd.f32 %v2657_v16, %v768_v61 }
0x12c1   :  { %2173 = vmatmul.msk.f32.gmra.mxu2 %vm851_vm11, %v769_v62 }
0x12c6   :  { %v1037_v6 = vpop.f32.mrf.mxu0 }
0x12c7   :  { %v1040_v7 = vadd.f32 %v1037_v6, %v994_v3 }
0x12c9   :  { %2316 = vtanh.f32 %v1040_v7  ;;  %v2183_v4 = vmul.f32 -1.442695, %v1040_v7 }
0x12cb   :  { %2318 = vpow2.f32 %v2183_v4 }
0x12cf   :  { %v2317_v9 = vpop.eup %2316 }
0x12d0   :  { %1063 = vrot.lane.b32.xlu0 %v2317_v9, %s2419_s30 }
0x12d1   :  { %v2319_v16 = vpop.eup %2318 }
0x12d2   :  { %v1044_v10 = vadd.f32 1.0, %v2319_v16 }
0x12d4   :  { %2320 = vrcp.f32 %v1044_v10  ;;  %v1056_v18 = vand.u32 2147483648, %v1044_v10  ;;  %vm1050_vm9 = vweird.f32 %v1044_v10  ;;  %v1054_v19 = vand.u32 2147483647, %v1044_v10 }
0x12d6   :  { %v1057_v5 = vor.u32 1.1754944e-38, %v1056_v18  ;;  %vm1055_vm11 = vcmp.eq.f32.partialorder %v1054_v19, 8.507059e+37 }
0x12da   :  { %v2321_v11 = vpop.eup %2320 }
0x12db   :  { %v1046_v12 = vmul.f32 %v2321_v11, %v1044_v10  ;;  %vm1051_vm4 = vweird.f32 %v2321_v11 }
0x12dc   :  { %vm1052_vm10 = vmor %vm1050_vm9, %vm1051_vm4 }
0x12dd   :  { %v1047_v13 = vsub.f32 1.0, %v1046_v12 }
0x12df   :  { %v1048_v15 = vmul.f32 %v2321_v11, %v1047_v13 }
0x12e1   :  { %v1049_v17 = vadd.f32 %v2321_v11, %v1048_v15 }
0x12e3   :  { %v1053_v20 = vsel %vm1052_vm10, %v2321_v11, %v1049_v17 }
0x12e4   :  { %v1058_v21 = vsel %vm1055_vm11, %v1057_v5, %v1053_v20 }
0x12e5   :  { %v1061_v23 = vmul.f32 0.0, %v1058_v21 }
0x1342   :  { %v1064_v8 = vpop.permute.xlu0 %1063 }
0x1343   :  { %v1066_v22 = vmul.f32 %v1064_v8, %v1058_v21 }
0x1344   :  { %v918_v52 = vpop.f32.mrf.mxu2 }
0x1345   :  { %1068 = vrot.lane.b32.xlu1 %v1066_v22, %s2416_s25 }
0x134d   :  { %779 = vrot.lane.b32.xlu1 %v2588_v26, %s2418_s5 }
0x1355   :  { %785 = vrot.lane.b32.xlu1 %v2641_v2, %s2418_s5 }
0x13b7   :  { %v1069_v24 = vpop.permute.xlu1 %1068 }
0x13b8   :  { %v2763_v25 = vadd.f32 %v1069_v24, %v1061_v23  ;;  %v999_v24 = vpop.f32.mrf.mxu3 }
0x13ba   :  { %2322 = vtanh.f32 %v2763_v25 }
0x13bf   :  { %v780_v27 = vpop.permute.xlu1 %779 }
0x13c0   :  { %v2323_v28 = vpop.eup %2322  ;;  %2160 = vmatmul.msk.f32.gmra.mxu1 %vm789_vm1, %v780_v27  ;;  %v1000_v27 = vadd.f32 %v2753_v0, %v999_v24 }
0x13c1   :  { %1074 = vrot.lane.b32.xlu0 %v2323_v28, %s2419_s30 }
0x13c7   :  { %v786_v37 = vpop.permute.xlu1 %785 }
0x13c8   :  { %2161 = vmatmul.msk.f32.gmra.mxu1 %vm789_vm1, %v782_v29 }
0x13c9   :  { %783 = vrot.lane.b32.xlu0 %v2626_v33, %s2418_s5 }
0x1433   :  { %v1075_v26 = vpop.permute.xlu0 %1074 }
0x1434   :  { %v1077_v2 = vmul.f32 %v1075_v26, %v1058_v21 }
0x1436   :  { %1079 = vrot.lane.b32.xlu0 %v1077_v2, %s2416_s25 }
0x143b   :  { %v784_v31 = vpop.permute.xlu0 %783 }
0x143c   :  { %2162 = vmatmul.msk.f32.gmra.mxu1 %vm789_vm1, %v784_v31 }
0x143d   :  { %v836_v32 = vpop.f32.mrf.mxu1 }
0x143e   :  { %v907_v35 = vadd.f32 %v906_v30, %v836_v32 }
0x1440   :  { %v928_v36 = vadd.f32 %v2709_v14, %v907_v35 }
0x1442   :  { %v936_v38 = vmax.f32 %v928_v36, 0.0 }
0x1444   :  { %2163 = vmatmul.msk.f32.gmra.mxu1 %vm789_vm1, %v786_v37  ;;  %2178 = vmatmul.msk.f32.gmra.mxu3 %vm947_vm3, %v936_v38 }
0x1445   :  { %v839_v33 = vpop.f32.mrf.mxu1 }
0x1446   :  { %v910_v40 = vadd.f32 %v909_v39, %v839_v33 }
0x1448   :  { %v929_v41 = vadd.f32 %v2709_v14, %v910_v40 }
0x144a   :  { %v937_v43 = vmax.f32 %v929_v41, 0.0 }
0x144c   :  { %2164 = vmatmul.msk.f32.gmra.mxu1 %vm789_vm1, %v788_v42  ;;  %2179 = vmatmul.msk.f32.gmra.mxu3 %vm947_vm3, %v937_v43 }
0x14a8   :  { %v1080_v34 = vpop.permute.xlu0 %1079 }
0x14a9   :  { %2184 = vmatmul.msk.f32.vlgmr.msrb.gmra.mxu1 %vm1017_vm12, %v1080_v34 }
0x14b9   :  { %v842_v56 = vpop.f32.mrf.mxu1 }
0x14ba   :  { %v913_v44 = vadd.f32 %v912_v63, %v842_v56 }
0x14bc   :  { %v930_v45 = vadd.f32 %v2709_v14, %v913_v44 }
0x14be   :  { %v938_v46 = vmax.f32 %v930_v45, 0.0 }
0x14c0   :  { %2180 = vmatmul.msk.f32.gmra.mxu3 %vm947_vm3, %v938_v46 }
0x14c1   :  { %v845_v48 = vpop.f32.mrf.mxu1 }
0x14c2   :  { %v916_v49 = vadd.f32 %v915_v47, %v845_v48 }
0x14c4   :  { %v931_v50 = vadd.f32 %v2709_v14, %v916_v49 }
0x14c6   :  { %v939_v51 = vmax.f32 %v931_v50, 0.0 }
0x14c7   :  { %v1002_v48 = vpop.f32.mrf.mxu3 }
0x14c8   :  { %2181 = vmatmul.msk.f32.gmra.mxu3 %vm947_vm3, %v939_v51 }
0x14c9   :  { %v848_v53 = vpop.f32.mrf.mxu1 }
0x14ca   :  { %v919_v54 = vadd.f32 %v918_v52, %v848_v53  ;;  %v1003_v53 = vadd.f32 %v2753_v0, %v1002_v48 }
0x14cc   :  { %v932_v55 = vadd.f32 %v2709_v14, %v919_v54 }
0x14ce   :  { %v940_v57 = vmax.f32 %v932_v55, 0.0 }
0x14cf   :  { %v1005_v49 = vpop.f32.mrf.mxu3 }
0x14d0   :  { %2182 = vmatmul.msk.f32.gmra.mxu3 %vm947_vm3, %v940_v57 }
0x1526   :  { %v1100_v60 = vpop.f32.mrf.mxu1 }
0x1527   :  { %v1103_v61 = vadd.f32 %v1100_v60, %v997_v59 }
0x1529   :  { %2324 = vtanh.f32 %v1103_v61  ;;  %v2185_v1 = vmul.f32 -1.442695, %v1103_v61 }
0x152b   :  { %2326 = vpow2.f32 %v2185_v1 }
0x152f   :  { %v2325_v62 = vpop.eup %2324 }
0x1530   :  { %1126 = vrot.lane.b32.xlu1 %v2325_v62, %s2419_s30 }
0x1531   :  { %v2327_v3 = vpop.eup %2326 }
0x1532   :  { %v1107_v6 = vadd.f32 1.0, %v2327_v3 }
0x1534   :  { %2328 = vrcp.f32 %v1107_v6  ;;  %v1119_v10 = vand.u32 2147483648, %v1107_v6  ;;  %vm1113_vm14 = vweird.f32 %v1107_v6  ;;  %v1117_v11 = vand.u32 2147483647, %v1107_v6 }
0x1536   :  { %v1120_v13 = vor.u32 1.1754944e-38, %v1119_v10  ;;  %vm1118_vm0 = vcmp.eq.f32.partialorder %v1117_v11, 8.507059e+37 }
0x153a   :  { %v2329_v7 = vpop.eup %2328 }
0x153b   :  { %v1109_v9 = vmul.f32 %v2329_v7, %v1107_v6  ;;  %vm1114_vm13 = vweird.f32 %v2329_v7 }
0x153c   :  { %vm1115_vm15 = vmor %vm1113_vm14, %vm1114_vm13 }
0x153d   :  { %v1110_v14 = vsub.f32 1.0, %v1109_v9 }
0x153f   :  { %v1111_v4 = vmul.f32 %v2329_v7, %v1110_v14 }
0x1541   :  { %v1112_v16 = vadd.f32 %v2329_v7, %v1111_v4 }
0x1543   :  { %v1116_v12 = vsel %vm1115_vm15, %v2329_v7, %v1112_v16  ;;  %v2799_v50 = vpop.f32.mrf.mxu3 }
0x1544   :  { %v1121_v17 = vsel %vm1118_vm0, %v1120_v13, %v1116_v12 }
0x1545   :  { %v1124_v19 = vmul.f32 %v1121_v17, %v2763_v25 }
0x154b   :  { %v2801_v51 = vpop.f32.mrf.mxu3 }
0x1553   :  { %v2803_v52 = vpop.f32.mrf.mxu3 }
0x15a2   :  { %v1127_v15 = vpop.permute.xlu1 %1126 }
0x15a3   :  { %v1129_v18 = vmul.f32 %v1127_v15, %v1121_v17 }
0x15a5   :  { %1131 = vrot.lane.b32.xlu2 %v1129_v18, %s2416_s25 }
0x15ff   :  { %v1132_v20 = vpop.permute.xlu2 %1131 }
0x1600   :  { %v1134_v5 = vadd.f32 %v1132_v20, %v1124_v19 }
0x1602   :  { %2330 = vtanh.f32 %v1134_v5 }
0x1608   :  { %v2331_v8 = vpop.eup %2330 }
0x1609   :  { %1137 = vrot.lane.b32.xlu0 %v2331_v8, %s2419_s30 }
0x167b   :  { %v1138_v21 = vpop.permute.xlu0 %1137 }
0x167c   :  { %v1140_v22 = vmul.f32 %v1138_v21, %v1121_v17 }
0x167e   :  { %1142 = vrot.lane.b32.xlu1 %v1140_v22, %s2416_s25 }
0x16f0   :  { %v1143_v23 = vpop.permute.xlu1 %1142 }
0x16f1   :  { %2186 = vmatmul.msk.f32.vlgmr.msrb.gmra.mxu2 %vm1017_vm12, %v1143_v23 }
0x1774   :  { %v1163_v28 = vpop.f32.mrf.mxu2 }
0x1775   :  { %v1166_v29 = vadd.f32 %v1163_v28, %v1000_v27 }
0x1777   :  { %2332 = vtanh.f32 %v1166_v29  ;;  %v2187_v26 = vmul.f32 -1.442695, %v1166_v29 }
0x1779   :  { %2334 = vpow2.f32 %v2187_v26 }
0x177d   :  { %v2333_v25 = vpop.eup %2332 }
0x177e   :  { %1189 = vrot.lane.b32.xlu2 %v2333_v25, %s2419_s30 }
0x177f   :  { %v2335_v2 = vpop.eup %2334 }
0x1780   :  { %v1170_v30 = vadd.f32 1.0, %v2335_v2 }
0x1782   :  { %2336 = vrcp.f32 %v1170_v30  ;;  %v1182_v38 = vand.u32 2147483648, %v1170_v30  ;;  %vm1176_vm3 = vweird.f32 %v1170_v30  ;;  %v1180_v39 = vand.u32 2147483647, %v1170_v30 }
0x1784   :  { %v1183_v40 = vor.u32 1.1754944e-38, %v1182_v38  ;;  %vm1181_vm6 = vcmp.eq.f32.partialorder %v1180_v39, 8.507059e+37 }
0x1788   :  { %v2337_v31 = vpop.eup %2336 }
0x1789   :  { %v1172_v32 = vmul.f32 %v2337_v31, %v1170_v30  ;;  %vm1177_vm1 = vweird.f32 %v2337_v31 }
0x178a   :  { %vm1178_vm5 = vmor %vm1176_vm3, %vm1177_vm1 }
0x178b   :  { %v1173_v35 = vsub.f32 1.0, %v1172_v32 }
0x178d   :  { %v1174_v36 = vmul.f32 %v2337_v31, %v1173_v35 }
0x178f   :  { %v1175_v37 = vadd.f32 %v2337_v31, %v1174_v36 }
0x1791   :  { %v1179_v33 = vsel %vm1178_vm5, %v2337_v31, %v1175_v37 }
0x1792   :  { %v1184_v42 = vsel %vm1181_vm6, %v1183_v40, %v1179_v33 }
0x1793   :  { %v1187_v34 = vmul.f32 %v1184_v42, %v1134_v5  ;;  %v1006_v5 = vadd.f32 %v2753_v0, %v1005_v49 }
0x17d8   :  { %v1190_v41 = vpop.permute.xlu2 %1189 }
0x17d9   :  { %v1192_v43 = vmul.f32 %v1190_v41, %v1184_v42 }
0x17db   :  { %1194 = vrot.lane.b32.xlu0 %v1192_v43, %s2416_s25 }
0x184d   :  { %v1195_v63 = vpop.permute.xlu0 %1194 }
0x184e   :  { %v1197_v56 = vadd.f32 %v1195_v63, %v1187_v34  ;;  %v1009_v63 = vadd.f32 %v2753_v0, %v2799_v50 }
0x1850   :  { %2338 = vtanh.f32 %v1197_v56 }
0x1856   :  { %v2339_v44 = vpop.eup %2338 }
0x1857   :  { %1200 = vrot.lane.b32.xlu1 %v2339_v44, %s2419_s30 }
0x18c9   :  { %v1201_v45 = vpop.permute.xlu1 %1200 }
0x18ca   :  { %v1203_v46 = vmul.f32 %v1201_v45, %v1184_v42 }
0x18cc   :  { %1205 = vrot.lane.b32.xlu2 %v1203_v46, %s2416_s25 }
0x1926   :  { %v1206_v47 = vpop.permute.xlu2 %1205 }
0x1927   :  { %2188 = vmatmul.msk.f32.vlgmr.msrb.gmra.mxu3 %vm1017_vm12, %v1206_v47 }
0x19aa   :  { %v1226_v54 = vpop.f32.mrf.mxu3 }
0x19ab   :  { %v1229_v55 = vadd.f32 %v1226_v54, %v1003_v53 }
0x19ad   :  { %2340 = vtanh.f32 %v1229_v55  ;;  %v2189_v58 = vmul.f32 -1.442695, %v1229_v55 }
0x19af   :  { %2342 = vpow2.f32 %v2189_v58 }
0x19b3   :  { %v2341_v57 = vpop.eup %2340 }
0x19b4   :  { %1252 = vrot.lane.b32.xlu0 %v2341_v57, %s2419_s30 }
0x19b5   :  { %v2343_v59 = vpop.eup %2342 }
0x19b6   :  { %v1233_v60 = vadd.f32 1.0, %v2343_v59 }
0x19b8   :  { %2344 = vrcp.f32 %v1233_v60  ;;  %v1245_v7 = vand.u32 2147483648, %v1233_v60  ;;  %vm1239_vm8 = vweird.f32 %v1233_v60  ;;  %v1243_v9 = vand.u32 2147483647, %v1233_v60 }
0x19ba   :  { %v1246_v4 = vor.u32 1.1754944e-38, %v1245_v7  ;;  %vm1244_vm9 = vcmp.eq.f32.partialorder %v1243_v9, 8.507059e+37 }
0x19be   :  { %v2345_v61 = vpop.eup %2344 }
0x19bf   :  { %v1235_v62 = vmul.f32 %v2345_v61, %v1233_v60  ;;  %vm1240_vm7 = vweird.f32 %v2345_v61 }
0x19c0   :  { %vm1241_vm4 = vmor %vm1239_vm8, %vm1240_vm7 }
0x19c1   :  { %v1236_v1 = vsub.f32 1.0, %v1235_v62 }
0x19c3   :  { %v1237_v3 = vmul.f32 %v2345_v61, %v1236_v1 }
0x19c5   :  { %v1238_v6 = vadd.f32 %v2345_v61, %v1237_v3 }
0x19c7   :  { %v1242_v14 = vsel %vm1241_vm4, %v2345_v61, %v1238_v6 }
0x19c8   :  { %v1247_v10 = vsel %vm1244_vm9, %v1246_v4, %v1242_v14 }
0x19c9   :  { %v1250_v12 = vmul.f32 %v1247_v10, %v1197_v56 }
0x1a26   :  { %v1253_v16 = vpop.permute.xlu0 %1252 }
0x1a27   :  { %v1255_v11 = vmul.f32 %v1253_v16, %v1247_v10 }
0x1a29   :  { %1257 = vrot.lane.b32.xlu1 %v1255_v11, %s2416_s25 }
0x1a9b   :  { %v1258_v13 = vpop.permute.xlu1 %1257 }
0x1a9c   :  { %v1260_v15 = vadd.f32 %v1258_v13, %v1250_v12 }
0x1a9e   :  { %2346 = vtanh.f32 %v1260_v15 }
0x1aa4   :  { %v2347_v17 = vpop.eup %2346 }
0x1aa5   :  { %1263 = vrot.lane.b32.xlu2 %v2347_v17, %s2419_s30 }
0x1aff   :  { %v1264_v18 = vpop.permute.xlu2 %1263 }
0x1b00   :  { %v1266_v19 = vmul.f32 %v1264_v18, %v1247_v10  ;;  %v1012_v10 = vadd.f32 %v2753_v0, %v2801_v51 }
0x1b02   :  { %1268 = vrot.lane.b32.xlu0 %v1266_v19, %s2416_s25 }
0x1b74   :  { %v1269_v20 = vpop.permute.xlu0 %1268 }
0x1b75   :  { %2190 = vmatmul.msk.f32.vlgmr.msra.gmra.mxu0 %vm1017_vm12, %v1269_v20 }
0x1bf2   :  { %v1289_v8 = vpop.f32.mrf.mxu0 }
0x1bf3   :  { %v1292_v21 = vadd.f32 %v1289_v8, %v1006_v5 }
0x1bf5   :  { %2348 = vtanh.f32 %v1292_v21  ;;  %v2191_v23 = vmul.f32 -1.442695, %v1292_v21 }
0x1bf7   :  { %2350 = vpow2.f32 %v2191_v23 }
0x1bfb   :  { %v2349_v22 = vpop.eup %2348 }
0x1bfc   :  { %1315 = vrot.lane.b32.xlu1 %v2349_v22, %s2419_s30 }
0x1bfd   :  { %v2351_v24 = vpop.eup %2350 }
0x1bfe   :  { %v1296_v27 = vadd.f32 1.0, %v2351_v24 }
0x1c00   :  { %2352 = vrcp.f32 %v1296_v27  ;;  %v1308_v30 = vand.u32 2147483648, %v1296_v27  ;;  %vm1302_vm11 = vweird.f32 %v1296_v27  ;;  %v1306_v31 = vand.u32 2147483647, %v1296_v27 }
0x1c02   :  { %v1309_v35 = vor.u32 1.1754944e-38, %v1308_v30  ;;  %vm1307_vm14 = vcmp.eq.f32.partialorder %v1306_v31, 8.507059e+37 }
0x1c06   :  { %v2353_v28 = vpop.eup %2352 }
0x1c07   :  { %v1298_v29 = vmul.f32 %v2353_v28, %v1296_v27  ;;  %vm1303_vm10 = vweird.f32 %v2353_v28 }
0x1c08   :  { %vm1304_vm13 = vmor %vm1302_vm11, %vm1303_vm10 }
0x1c09   :  { %v1299_v25 = vsub.f32 1.0, %v1298_v29 }
0x1c0b   :  { %v1300_v26 = vmul.f32 %v2353_v28, %v1299_v25 }
0x1c0d   :  { %v1301_v2 = vadd.f32 %v2353_v28, %v1300_v26 }
0x1c0f   :  { %v1305_v32 = vsel %vm1304_vm13, %v2353_v28, %v1301_v2  ;;  %vm1638_vm13 = vcmask 1042432  }
0x1c10   :  { %v1310_v37 = vsel %vm1307_vm14, %v1309_v35, %v1305_v32  ;;  %vm1547_vm14 = vcmask 15360  }
0x1c11   :  { %v1313_v39 = vmul.f32 %v1310_v37, %v1260_v15 }
0x1c6e   :  { %v1316_v36 = vpop.permute.xlu1 %1315 }
0x1c6f   :  { %v1318_v38 = vmul.f32 %v1316_v36, %v1310_v37  ;;  %v1015_v36 = vadd.f32 %v2753_v0, %v2803_v52 }
0x1c71   :  { %1320 = vrot.lane.b32.xlu2 %v1318_v38, %s2416_s25 }
0x1ccb   :  { %v1321_v33 = vpop.permute.xlu2 %1320 }
0x1ccc   :  { %v1323_v40 = vadd.f32 %v1321_v33, %v1313_v39 }
0x1cce   :  { %2354 = vtanh.f32 %v1323_v40 }
0x1cd4   :  { %v2355_v41 = vpop.eup %2354 }
0x1cd5   :  { %1326 = vrot.lane.b32.xlu0 %v2355_v41, %s2419_s30 }
0x1d47   :  { %v1327_v42 = vpop.permute.xlu0 %1326 }
0x1d48   :  { %v1329_v43 = vmul.f32 %v1327_v42, %v1310_v37 }
0x1d4a   :  { %1331 = vrot.lane.b32.xlu1 %v1329_v43, %s2416_s25 }
0x1dbc   :  { %v1332_v34 = vpop.permute.xlu1 %1331 }
0x1dbd   :  { %2192 = vmatmul.msk.f32.vlgmr.msra.gmra.mxu1 %vm1017_vm12, %v1332_v34 }
0x1e3a   :  { %v1352_v56 = vpop.f32.mrf.mxu1 }
0x1e3b   :  { %v1355_v44 = vadd.f32 %v1352_v56, %v1009_v63 }
0x1e3d   :  { %2356 = vtanh.f32 %v1355_v44  ;;  %v2193_v46 = vmul.f32 -1.442695, %v1355_v44 }
0x1e3f   :  { %2358 = vpow2.f32 %v2193_v46 }
0x1e43   :  { %v2357_v45 = vpop.eup %2356 }
0x1e44   :  { %1378 = vrot.lane.b32.xlu2 %v2357_v45, %s2419_s30 }
0x1e45   :  { %v2359_v47 = vpop.eup %2358 }
0x1e46   :  { %v1359_v48 = vadd.f32 1.0, %v2359_v47 }
0x1e48   :  { %2360 = vrcp.f32 %v1359_v48  ;;  %v1371_v58 = vand.u32 2147483648, %v1359_v48  ;;  %vm1365_vm0 = vweird.f32 %v1359_v48  ;;  %v1369_v50 = vand.u32 2147483647, %v1359_v48 }
0x1e4a   :  { %v1372_v60 = vor.u32 1.1754944e-38, %v1371_v58  ;;  %vm1370_vm3 = vcmp.eq.f32.partialorder %v1369_v50, 8.507059e+37  ;;  %v97_v58 = vld [vmem:[%s3073_s12 + $0x18] sm:$0xff] }
0x1e4b   :  { %v2848_v50 = vld [vmem:[%s3074_s17 + $0x18] sm:$0xff]  ;;  %1539 = vmatpush.msrb.mxu0 %v97_v58 }
0x1e4c   :  { %1626 = vmatpush.msrb.mxu2 %v2848_v50 }
0x1e4e   :  { %v2361_v49 = vpop.eup %2360 }
0x1e4f   :  { %v1361_v53 = vmul.f32 %v2361_v49, %v1359_v48  ;;  %vm1366_vm15 = vweird.f32 %v2361_v49 }
0x1e50   :  { %vm1367_vm1 = vmor %vm1365_vm0, %vm1366_vm15  ;;  %vm1634_vm15 = vcmask 23552  }
0x1e51   :  { %v1362_v54 = vsub.f32 1.0, %v1361_v53 }
0x1e53   :  { %v1363_v55 = vmul.f32 %v2361_v49, %v1362_v54 }
0x1e55   :  { %v1364_v57 = vadd.f32 %v2361_v49, %v1363_v55 }
0x1e57   :  { %v1368_v59 = vsel %vm1367_vm1, %v2361_v49, %v1364_v57  ;;  %v1549_v49 = vld [vmem:[%s3072_s1] sm:$0xff] }
0x1e58   :  { %v1373_v62 = vsel %vm1370_vm3, %v1372_v60, %v1368_v59  ;;  %v96_v59 = vld [vmem:[%s3073_s12 + $0x10] sm:$0xff] }
0x1e59   :  { %v1376_v3 = vmul.f32 %v1373_v62, %v1323_v40  ;;  %v2857_v60 = vld [vmem:[%s3074_s17 + $0x10] sm:$0xff]  ;;  %1540 = vmatpush.msrb.mxu0 %v96_v59 }
0x1e5a   :  { %1627 = vmatpush.msrb.mxu2 %v2857_v60 }
0x1e9e   :  { %v1379_v61 = vpop.permute.xlu2 %1378 }
0x1e9f   :  { %v1381_v1 = vmul.f32 %v1379_v61, %v1373_v62  ;;  %v95_v61 = vld [vmem:[%s3073_s12 + $0x8] sm:$0xff] }
0x1ea0   :  { %1541 = vmatpush.msrb.mxu0 %v95_v61 }
0x1ea1   :  { %1383 = vrot.lane.b32.xlu0 %v1381_v1, %s2416_s25  ;;  %v94_v1 = vld [vmem:[%s3073_s12] sm:$0xff] }
0x1ea2   :  { %1542 = vmatpush.msrb.mxu0 %v94_v1 }
0x1f13   :  { %v1384_v6 = vpop.permute.xlu0 %1383 }
0x1f14   :  { %v1386_v7 = vadd.f32 %v1384_v6, %v1376_v3  ;;  %v2874_v3 = vld [vmem:[%s3074_s17] sm:$0xff] }
0x1f16   :  { %2362 = vtanh.f32 %v1386_v7 }
0x1f1c   :  { %v2363_v9 = vpop.eup %2362 }
0x1f1d   :  { %1389 = vrot.lane.b32.xlu1 %v2363_v9, %s2419_s30  ;;  %v2886_v9 = vld [vmem:[%s3070_s14] sm:$0x3] }
0x1f1e   :  { %2199 = vmatpush.msk.msrb.mxu1 %vm972_vm2, %v2886_v9 }
0x1f20   :  { %2207 = vmatpush.msk.msra.mxu1 %vm972_vm2, %v2886_v9 }
0x1f8f   :  { %v1390_v14 = vpop.permute.xlu1 %1389 }
0x1f90   :  { %v1392_v4 = vmul.f32 %v1390_v14, %v1373_v62  ;;  %v2865_v62 = vld [vmem:[%s3074_s17 + $0x8] sm:$0xff] }
0x1f91   :  { %1628 = vmatpush.msrb.mxu2 %v2865_v62 }
0x1f92   :  { %1394 = vrot.lane.b32.xlu2 %v1392_v4, %s2416_s25  ;;  %v2901_v4 = vld [vmem:[%s3076_s16] sm:$0x7] }
0x1f93   :  { %1629 = vmatpush.msrb.mxu2 %v2874_v3  ;;  %2202 = vmatpush.msk.msrb.mxu3 %vm1638_vm13, %v2901_v4 }
0x1fec   :  { %v1395_v16 = vpop.permute.xlu2 %1394 }
0x1fed   :  { %2194 = vmatmul.msk.f32.vlgmr.msra.gmra.mxu2 %vm1017_vm12, %v1395_v16  ;;  %v2248_v16 = vld [vmem:[%s3075_s13] ss:$0 sm:$0xff] }
0x1fee   :  { %1769 = vmatpush.msra.mxu2 %v2848_v50 }
0x1ff0   :  { %1770 = vmatpush.msra.mxu2 %v2857_v60 }
0x1ff2   :  { %1771 = vmatpush.msra.mxu2 %v2865_v62 }
0x1ff4   :  { %1772 = vmatpush.msra.mxu2 %v2874_v3 }
0x2070   :  { %v1415_v11 = vpop.f32.mrf.mxu2 }
0x2071   :  { %v1418_v12 = vadd.f32 %v1415_v11, %v1012_v10 }
0x2073   :  { %2364 = vtanh.f32 %v1418_v12  ;;  %v2195_v15 = vmul.f32 -1.442695, %v1418_v12  ;;  %v2920_v12 = vld [vmem:[%s3070_s14 + $0x2] ss:$0 sm:$0xff] }
0x2075   :  { %2366 = vpow2.f32 %v2195_v15 }
0x2079   :  { %v2365_v13 = vpop.eup %2364 }
0x207a   :  { %1441 = vrot.lane.b32.xlu0 %v2365_v13, %s2419_s30 }
0x207b   :  { %v2367_v17 = vpop.eup %2366 }
0x207c   :  { %v1422_v18 = vadd.f32 1.0, %v2367_v17  ;;  %v2926_v17 = vld [vmem:[%s3071_s15] ss:$0 sm:$0xff] }
0x207e   :  { %2368 = vrcp.f32 %v1422_v18  ;;  %v1434_v22 = vand.u32 2147483648, %v1422_v18  ;;  %vm1428_vm6 = vweird.f32 %v1422_v18  ;;  %v1432_v51 = vand.u32 2147483647, %v1422_v18 }
0x2080   :  { %v1435_v24 = vor.u32 1.1754944e-38, %v1434_v22  ;;  %vm1433_vm8 = vcmp.eq.f32.partialorder %v1432_v51, 8.507059e+37 }
0x2084   :  { %v2369_v19 = vpop.eup %2368 }
0x2085   :  { %v1424_v20 = vmul.f32 %v2369_v19, %v1422_v18  ;;  %vm1429_vm5 = vweird.f32 %v2369_v19 }
0x2086   :  { %vm1430_vm7 = vmor %vm1428_vm6, %vm1429_vm5 }
0x2087   :  { %v1425_v5 = vsub.f32 1.0, %v1424_v20 }
0x2089   :  { %v1426_v8 = vmul.f32 %v2369_v19, %v1425_v5 }
0x208b   :  { %v1427_v21 = vadd.f32 %v2369_v19, %v1426_v8  ;;  %v2935_v8 = vld [vmem:[%s3078_s18] ss:$0 sm:$0xff] }
0x208d   :  { %v1431_v23 = vsel %vm1430_vm7, %v2369_v19, %v1427_v21 }
0x208e   :  { %v1436_v28 = vsel %vm1433_vm8, %v1435_v24, %v1431_v23 }
0x208f   :  { %v1439_v25 = vmul.f32 %v1436_v28, %v1386_v7 }
0x20ec   :  { %v1442_v27 = vpop.permute.xlu0 %1441 }
0x20ed   :  { %v1444_v29 = vmul.f32 %v1442_v27, %v1436_v28 }
0x20ef   :  { %1446 = vrot.lane.b32.xlu1 %v1444_v29, %s2416_s25 }
0x2161   :  { %v1447_v26 = vpop.permute.xlu1 %1446 }
0x2162   :  { %v1449_v2 = vadd.f32 %v1447_v26, %v1439_v25 }
0x2164   :  { %2370 = vtanh.f32 %v1449_v2 }
0x216a   :  { %v2371_v30 = vpop.eup %2370 }
0x216b   :  { %1452 = vrot.lane.b32.xlu2 %v2371_v30, %s2419_s30 }
0x21c5   :  { %v1453_v31 = vpop.permute.xlu2 %1452 }
0x21c6   :  { %v1455_v32 = vmul.f32 %v1453_v31, %v1436_v28 }
0x21c8   :  { %1457 = vrot.lane.b32.xlu0 %v1455_v32, %s2416_s25 }
0x223a   :  { %v1458_v35 = vpop.permute.xlu0 %1457 }
0x223b   :  { %2196 = vmatmul.msk.f32.vlgmr.msra.gmra.mxu3 %vm1017_vm12, %v1458_v35 }
0x223c   :  { %2210 = vmatpush.msk.msra.mxu3 %vm1638_vm13, %v2901_v4 }
0x22be   :  { %v1478_v37 = vpop.f32.mrf.mxu3 }
0x22bf   :  { %v1481_v38 = vadd.f32 %v1478_v37, %v1015_v36 }
0x22c1   :  { %2372 = vtanh.f32 %v1481_v38  ;;  %v2197_v33 = vmul.f32 -1.442695, %v1481_v38 }
0x22c3   :  { %2374 = vpow2.f32 %v2197_v33 }
0x22c7   :  { %v2373_v39 = vpop.eup %2372 }
0x22c8   :  { %1504 = vrot.lane.b32.xlu1 %v2373_v39, %s2419_s30 }
0x22c9   :  { %v2375_v40 = vpop.eup %2374 }
0x22ca   :  { %v1485_v41 = vadd.f32 1.0, %v2375_v40  ;;  %v1550_v40 = vld [vmem:[%s3072_s1 + $0x8] sm:$0xff] }
0x22cc   :  { %2376 = vrcp.f32 %v1485_v41  ;;  %v1497_v44 = vand.u32 2147483648, %v1485_v41  ;;  %vm1491_vm9 = vweird.f32 %v1485_v41  ;;  %v1495_v0 = vand.u32 2147483647, %v1485_v41 }
0x22ce   :  { %v1498_v45 = vor.u32 1.1754944e-38, %v1497_v44  ;;  %vm1496_vm11 = vcmp.eq.f32.partialorder %v1495_v0, 8.507059e+37  ;;  %v2962_v44 = vld [vmem:[%s3079_s19 + $0x8] sm:$0xff]  ;;  %v2968_v0 = vld [vmem:[%s3079_s19] sm:$0xff] }
0x22d2   :  { %v2377_v42 = vpop.eup %2376 }
0x22d3   :  { %v1487_v43 = vmul.f32 %v2377_v42, %v1485_v41  ;;  %vm1492_vm4 = vweird.f32 %v2377_v42 }
0x22d4   :  { %vm1493_vm10 = vmor %vm1491_vm9, %vm1492_vm4 }
0x22d5   :  { %v1488_v34 = vsub.f32 1.0, %v1487_v43 }
0x22d7   :  { %v1489_v63 = vmul.f32 %v2377_v42, %v1488_v34 }
0x22d9   :  { %v1490_v56 = vadd.f32 %v2377_v42, %v1489_v63  ;;  %v2951_v63 = vld [vmem:[%s3079_s19 + $0x18] sm:$0xff] }
0x22da   :  { %1723 = vmatpush.msra.mxu0 %v2951_v63 }
0x22db   :  { %v1494_v52 = vsel %vm1493_vm10, %v2377_v42, %v1490_v56  ;;  %v2956_v56 = vld [vmem:[%s3079_s19 + $0x10] sm:$0xff] }
0x22dc   :  { %v1499_v47 = vsel %vm1496_vm11, %v1498_v45, %v1494_v52  ;;  %1724 = vmatpush.msra.mxu0 %v2956_v56 }
0x22dd   :  { %v1502_v53 = vmul.f32 %v1499_v47, %v1449_v2 }
0x22de   :  { %1725 = vmatpush.msra.mxu0 %v2962_v44 }
0x22e0   :  { %1726 = vmatpush.msra.mxu0 %v2968_v0 }
0x233a   :  { %v1505_v46 = vpop.permute.xlu1 %1504 }
0x233b   :  { %v1507_v48 = vmul.f32 %v1505_v46, %v1499_v47 }
0x233d   :  { %1509 = vrot.lane.b32.xlu2 %v1507_v48, %s2416_s25 }
0x2345   :  { %1556 = vperm.xlu2 %2240, %v1549_v49  }
0x2397   :  { %v1510_v54 = vpop.permute.xlu2 %1509 }
0x2398   :  { %v2838_v55 = vadd.f32 %v1510_v54, %v1502_v53 }
0x239a   :  { %2378 = vtanh.f32 %v2838_v55 }
0x239f   :  { %v1557_v13 = vpop.permute.xlu2 %1556 }
0x23a0   :  { %v2379_v57 = vpop.eup %2378  ;;  %v1575_v15 = vmul.f32 %v2920_v12, %v1557_v13 }
0x23a1   :  { %1515 = vrot.lane.b32.xlu0 %v2379_v57, %s2419_s30 }
0x23a2   :  { %v1583_v18 = vadd.f32 %v2926_v17, %v1575_v15 }
0x2413   :  { %v1516_v6 = vpop.permute.xlu0 %1515 }
0x2414   :  { %v1518_v7 = vmul.f32 %v1516_v6, %v1499_v47  ;;  %v2990_v47 = vld [vmem:[%s3080_s20] ss:$0 sm:$0xff] }
0x2416   :  { %1523 = vrot.lane.b32.xlu1 %v1518_v7, %s2416_s25 }
0x2488   :  { %v1524_v14 = vpop.permute.xlu1 %1523 }
0x2489   :  { %2198 = vmatmul.msk.f32.vlgmr.msrb.gmra.mxu0 %vm1017_vm12, %v1524_v14  ;;  %2201 = vmatmul.msk.f32.vlgmr.msrb.gmra.mxu2 %vm1017_vm12, %v1524_v14 }
0x248a   :  { %1901 = vmatpush.msrb.mxu2 %v2848_v50  ;;  %1855 = vmatpush.msrb.mxu0 %v2951_v63 }
0x248c   :  { %1902 = vmatpush.msrb.mxu2 %v2857_v60  ;;  %1856 = vmatpush.msrb.mxu0 %v2956_v56 }
0x248e   :  { %1903 = vmatpush.msrb.mxu2 %v2865_v62  ;;  %1857 = vmatpush.msrb.mxu0 %v2962_v44 }
0x2490   :  { %1904 = vmatpush.msrb.mxu2 %v2874_v3  ;;  %1858 = vmatpush.msrb.mxu0 %v2968_v0 }
0x2506   :  { %v1544_v10 = vpop.f32.mrf.mxu0 }
0x2507   :  { %v1545_v11 = vadd.f32 %v2248_v16, %v1544_v10 }
0x2509   :  { %1548 = vst.msk [vmem:[%s3077_s21] sm:$0xff] %vm1547_vm14, %v1545_v11  ;;  %2200 = vmatmul.msk.f32.vlgmr.msrb.gmra.mxu1 %vm1547_vm14, %v1545_v11 }
0x250a   :  { %2215 = vmatpush.msk.msrb.mxu1 %vm972_vm2, %v2886_v9 }
0x250c   :  { %v1631_v21 = vpop.f32.mrf.mxu2 }
0x2586   :  { %v1610_v19 = vpop.f32.mrf.mxu1 }
0x2587   :  { %v1611_v20 = vadd.f32 %v1610_v19, %v1583_v18 }
0x2589   :  { %v1613_v5 = vmax.f32 %v1611_v20, 0.0 }
0x258b   :  { %2203 = vmatmul.msk.f32.vlgmr.msrb.gmra.mxu3 %vm1634_vm15, %v1613_v5 }
0x258c   :  { %2218 = vmatpush.msk.msrb.mxu3 %vm1638_vm13, %v2901_v4 }
0x260e   :  { %v1659_v22 = vpop.f32.mrf.mxu3 }
0x260f   :  { %v1660_v51 = vadd.f32 %v1659_v22, %v1631_v21  ;;  %v1551_v21 = vld [vmem:[%s3072_s1 + $0x10] sm:$0xff] }
0x2611   :  { %v1665_v23 = vadd.f32 %v2935_v8, %v1660_v51 }
0x2613   :  { %2380 = vtanh.f32 %v1665_v23  ;;  %v2204_v27 = vmul.f32 -1.442695, %v1665_v23 }
0x2615   :  { %2382 = vpow2.f32 %v2204_v27 }
0x2619   :  { %v2381_v24 = vpop.eup %2380 }
0x261a   :  { %1688 = vrot.lane.b32.xlu0 %v2381_v24, %s2419_s30 }
0x261b   :  { %v2383_v28 = vpop.eup %2382 }
0x261c   :  { %v1669_v29 = vadd.f32 1.0, %v2383_v28 }
0x261e   :  { %2384 = vrcp.f32 %v1669_v29  ;;  %v1681_v32 = vand.u32 2147483648, %v1669_v29  ;;  %vm1675_vm1 = vweird.f32 %v1669_v29  ;;  %v1679_v35 = vand.u32 2147483647, %v1669_v29 }
0x2620   :  { %v1682_v37 = vor.u32 1.1754944e-38, %v1681_v32  ;;  %vm1680_vm5 = vcmp.eq.f32.partialorder %v1679_v35, 8.507059e+37 }
0x2624   :  { %v2385_v25 = vpop.eup %2384 }
0x2625   :  { %v1671_v26 = vmul.f32 %v2385_v25, %v1669_v29  ;;  %vm1676_vm0 = vweird.f32 %v2385_v25 }
0x2626   :  { %vm1677_vm3 = vmor %vm1675_vm1, %vm1676_vm0 }
0x2627   :  { %v1672_v2 = vsub.f32 1.0, %v1671_v26 }
0x2629   :  { %v1673_v30 = vmul.f32 %v2385_v25, %v1672_v2 }
0x262b   :  { %v1674_v31 = vadd.f32 %v2385_v25, %v1673_v30 }
0x262d   :  { %v1678_v36 = vsel %vm1677_vm3, %v2385_v25, %v1674_v31 }
0x262e   :  { %v1683_v39 = vsel %vm1680_vm5, %v1682_v37, %v1678_v36 }
0x262f   :  { %v1686_v41 = vmul.f32 %v1683_v39, %v2838_v55 }
0x268c   :  { %v1689_v38 = vpop.permute.xlu0 %1688 }
0x268d   :  { %v1691_v33 = vmul.f32 %v1689_v38, %v1683_v39 }
0x268f   :  { %1693 = vrot.lane.b32.xlu1 %v1691_v33, %s2416_s25 }
0x2697   :  { %1561 = vperm.xlu1 %2241, %v1550_v40  }
0x2701   :  { %v1694_v42 = vpop.permute.xlu1 %1693 }
0x2702   :  { %v2944_v43 = vadd.f32 %v1694_v42, %v1686_v41 }
0x2704   :  { %2386 = vtanh.f32 %v2944_v43 }
0x2709   :  { %v1562_v53 = vpop.permute.xlu1 %1561 }
0x270a   :  { %v2387_v34 = vpop.eup %2386  ;;  %v1576_v54 = vmul.f32 %v2920_v12, %v1562_v53 }
0x270b   :  { %1699 = vrot.lane.b32.xlu2 %v2387_v34, %s2419_s30 }
0x270c   :  { %v1584_v55 = vadd.f32 %v2926_v17, %v1576_v54 }
0x2765   :  { %v1700_v52 = vpop.permute.xlu2 %1699 }
0x2766   :  { %v1702_v45 = vmul.f32 %v1700_v52, %v1683_v39 }
0x2768   :  { %1707 = vrot.lane.b32.xlu0 %v1702_v45, %s2416_s25 }
0x27da   :  { %v1708_v46 = vpop.permute.xlu0 %1707 }
0x27db   :  { %2205 = vmatmul.msk.f32.vlgmr.msra.gmra.mxu0 %vm1017_vm12, %v1708_v46  ;;  %2209 = vmatmul.msk.f32.vlgmr.msra.gmra.mxu2 %vm1017_vm12, %v1708_v46 }
0x27dc   :  { %1987 = vmatpush.msra.mxu0 %v2951_v63  ;;  %2033 = vmatpush.msra.mxu2 %v2848_v50 }
0x27de   :  { %1988 = vmatpush.msra.mxu0 %v2956_v56  ;;  %2034 = vmatpush.msra.mxu2 %v2857_v60 }
0x27e0   :  { %1989 = vmatpush.msra.mxu0 %v2962_v44  ;;  %2035 = vmatpush.msra.mxu2 %v2865_v62 }
0x27e2   :  { %1990 = vmatpush.msra.mxu0 %v2968_v0  ;;  %2036 = vmatpush.msra.mxu2 %v2874_v3 }
0x2858   :  { %v1728_v48 = vpop.f32.mrf.mxu0 }
0x2859   :  { %v1729_v49 = vadd.f32 %v2990_v47, %v1728_v48 }
0x285b   :  { %2206 = vst.msk [vmem:[%s3077_s21 + $0x8] sm:$0xff] %vm1547_vm14, %v1729_v49  ;;  %2208 = vmatmul.msk.f32.vlgmr.msra.gmra.mxu1 %vm1547_vm14, %v1729_v49 }
0x285c   :  { %2223 = vmatpush.msk.msra.mxu1 %vm972_vm2, %v2886_v9 }
0x285e   :  { %v1774_v59 = vpop.f32.mrf.mxu2 }
0x28d8   :  { %v1753_v57 = vpop.f32.mrf.mxu1 }
0x28d9   :  { %v1754_v58 = vadd.f32 %v1753_v57, %v1584_v55  ;;  %v1552_v55 = vld [vmem:[%s3072_s1 + $0x18] sm:$0xff] }
0x28db   :  { %v1756_v50 = vmax.f32 %v1754_v58, 0.0 }
0x28dd   :  { %2211 = vmatmul.msk.f32.vlgmr.msra.gmra.mxu3 %vm1634_vm15, %v1756_v50 }
0x28de   :  { %2226 = vmatpush.msk.msra.mxu3 %vm1638_vm13, %v2901_v4 }
0x2960   :  { %v1797_v60 = vpop.f32.mrf.mxu3 }
0x2961   :  { %v1798_v61 = vadd.f32 %v1797_v60, %v1774_v59 }
0x2963   :  { %v1800_v62 = vadd.f32 %v2935_v8, %v1798_v61 }
0x2965   :  { %2388 = vtanh.f32 %v1800_v62  ;;  %v2212_v3 = vmul.f32 -1.442695, %v1800_v62 }
0x2967   :  { %2390 = vpow2.f32 %v2212_v3 }
0x296b   :  { %v2389_v1 = vpop.eup %2388 }
0x296c   :  { %1823 = vrot.lane.b32.xlu2 %v2389_v1, %s2419_s30 }
0x296d   :  { %v2391_v6 = vpop.eup %2390 }
0x296e   :  { %v1804_v7 = vadd.f32 1.0, %v2391_v6 }
0x2970   :  { %2392 = vrcp.f32 %v1804_v7  ;;  %v1816_v4 = vand.u32 2147483648, %v1804_v7  ;;  %vm1810_vm6 = vweird.f32 %v1804_v7  ;;  %v1814_v13 = vand.u32 2147483647, %v1804_v7 }
0x2972   :  { %v1817_v18 = vor.u32 1.1754944e-38, %v1816_v4  ;;  %vm1815_vm8 = vcmp.eq.f32.partialorder %v1814_v13, 8.507059e+37 }
0x2976   :  { %v2393_v9 = vpop.eup %2392 }
0x2977   :  { %v1806_v14 = vmul.f32 %v2393_v9, %v1804_v7  ;;  %vm1811_vm2 = vweird.f32 %v2393_v9 }
0x2978   :  { %vm1812_vm7 = vmor %vm1810_vm6, %vm1811_vm2 }
0x2979   :  { %v1807_v16 = vsub.f32 1.0, %v1806_v14 }
0x297b   :  { %v1808_v10 = vmul.f32 %v2393_v9, %v1807_v16 }
0x297d   :  { %v1809_v11 = vadd.f32 %v2393_v9, %v1808_v10 }
0x297f   :  { %v1813_v15 = vsel %vm1812_vm7, %v2393_v9, %v1809_v11 }
0x2980   :  { %v1818_v20 = vsel %vm1815_vm8, %v1817_v18, %v1813_v15 }
0x2981   :  { %v1821_v22 = vmul.f32 %v1818_v20, %v2944_v43 }
0x29c6   :  { %v1824_v19 = vpop.permute.xlu2 %1823 }
0x29c7   :  { %v1826_v5 = vmul.f32 %v1824_v19, %v1818_v20 }
0x29c9   :  { %1828 = vrot.lane.b32.xlu0 %v1826_v5, %s2416_s25 }
0x29d1   :  { %1566 = vperm.xlu0 %2239, %v1551_v21  }
0x2a3b   :  { %v1829_v51 = vpop.permute.xlu0 %1828 }
0x2a3c   :  { %v1831_v23 = vadd.f32 %v1829_v51, %v1821_v22 }
0x2a3e   :  { %2394 = vtanh.f32 %v1831_v23 }
0x2a43   :  { %v1567_v2 = vpop.permute.xlu0 %1566 }
0x2a44   :  { %v2395_v24 = vpop.eup %2394  ;;  %v1577_v30 = vmul.f32 %v2920_v12, %v1567_v2 }
0x2a45   :  { %1834 = vrot.lane.b32.xlu1 %v2395_v24, %s2419_s30 }
0x2a46   :  { %v1585_v31 = vadd.f32 %v2926_v17, %v1577_v30 }
0x2ab7   :  { %v1835_v27 = vpop.permute.xlu1 %1834 }
0x2ab8   :  { %v1837_v28 = vmul.f32 %v1835_v27, %v1818_v20 }
0x2aba   :  { %1839 = vrot.lane.b32.xlu2 %v1837_v28, %s2416_s25 }
0x2b14   :  { %v1840_v29 = vpop.permute.xlu2 %1839 }
0x2b15   :  { %2213 = vmatmul.msk.f32.vlgmr.msrb.gmra.mxu0 %vm1017_vm12, %v1840_v29  ;;  %2217 = vmatmul.msk.f32.vlgmr.msrb.gmra.mxu2 %vm1017_vm12, %v1840_v29 }
0x2b16   :  { %2119 = vmatpush.msrb.mxu0 %v2951_v63 }
0x2b18   :  { %2120 = vmatpush.msrb.mxu0 %v2956_v56 }
0x2b1a   :  { %2121 = vmatpush.msrb.mxu0 %v2962_v44 }
0x2b1c   :  { %2122 = vmatpush.msrb.mxu0 %v2968_v0 }
0x2b92   :  { %v1860_v25 = vpop.f32.mrf.mxu0 }
0x2b93   :  { %v1861_v26 = vadd.f32 %v2990_v47, %v1860_v25 }
0x2b95   :  { %2214 = vst.msk [vmem:[%s3077_s21 + $0x10] sm:$0xff] %vm1547_vm14, %v1861_v26  ;;  %2216 = vmatmul.msk.f32.vlgmr.msrb.gmra.mxu1 %vm1547_vm14, %v1861_v26 }
0x2b98   :  { %v1906_v37 = vpop.f32.mrf.mxu2 }
0x2c12   :  { %v1885_v32 = vpop.f32.mrf.mxu1 }
0x2c13   :  { %v1886_v35 = vadd.f32 %v1885_v32, %v1585_v31 }
0x2c15   :  { %v1888_v36 = vmax.f32 %v1886_v35, 0.0 }
0x2c17   :  { %2219 = vmatmul.msk.f32.vlgmr.msrb.gmra.mxu3 %vm1634_vm15, %v1888_v36 }
0x2c9a   :  { %v1929_v38 = vpop.f32.mrf.mxu3 }
0x2c9b   :  { %v1930_v39 = vadd.f32 %v1929_v38, %v1906_v37 }
0x2c9d   :  { %v1932_v33 = vadd.f32 %v2935_v8, %v1930_v39 }
0x2c9f   :  { %2396 = vtanh.f32 %v1932_v33  ;;  %v2220_v41 = vmul.f32 -1.442695, %v1932_v33 }
0x2ca1   :  { %2398 = vpow2.f32 %v2220_v41 }
0x2ca5   :  { %v2397_v40 = vpop.eup %2396 }
0x2ca6   :  { %1955 = vrot.lane.b32.xlu1 %v2397_v40, %s2419_s30 }
0x2ca7   :  { %v2399_v42 = vpop.eup %2398 }
0x2ca8   :  { %v1936_v43 = vadd.f32 1.0, %v2399_v42 }
0x2caa   :  { %2400 = vrcp.f32 %v1936_v43  ;;  %v1948_v52 = vand.u32 2147483648, %v1936_v43  ;;  %vm1942_vm9 = vweird.f32 %v1936_v43  ;;  %v1946_v45 = vand.u32 2147483647, %v1936_v43 }
0x2cac   :  { %v1949_v48 = vor.u32 1.1754944e-38, %v1948_v52  ;;  %vm1947_vm11 = vcmp.eq.f32.partialorder %v1946_v45, 8.507059e+37 }
0x2cb0   :  { %v2401_v34 = vpop.eup %2400 }
0x2cb1   :  { %v1938_v63 = vmul.f32 %v2401_v34, %v1936_v43  ;;  %vm1943_vm4 = vweird.f32 %v2401_v34 }
0x2cb2   :  { %vm1944_vm10 = vmor %vm1942_vm9, %vm1943_vm4 }
0x2cb3   :  { %v1939_v56 = vsub.f32 1.0, %v1938_v63 }
0x2cb5   :  { %v1940_v44 = vmul.f32 %v2401_v34, %v1939_v56 }
0x2cb7   :  { %v1941_v0 = vadd.f32 %v2401_v34, %v1940_v44 }
0x2cb9   :  { %v1945_v46 = vsel %vm1944_vm10, %v2401_v34, %v1941_v0 }
0x2cba   :  { %v1950_v53 = vsel %vm1947_vm11, %v1949_v48, %v1945_v46 }
0x2cbb   :  { %v1953_v57 = vmul.f32 %v1950_v53, %v1831_v23 }
0x2d18   :  { %v1956_v49 = vpop.permute.xlu1 %1955 }
0x2d19   :  { %v1958_v54 = vmul.f32 %v1956_v49, %v1950_v53 }
0x2d1b   :  { %1960 = vrot.lane.b32.xlu2 %v1958_v54, %s2416_s25 }
0x2d23   :  { %1571 = vperm.xlu2 %2240, %v1552_v55  }
0x2d75   :  { %v1961_v58 = vpop.permute.xlu2 %1960 }
0x2d76   :  { %v1963_v50 = vadd.f32 %v1961_v58, %v1953_v57 }
0x2d78   :  { %2402 = vtanh.f32 %v1963_v50 }
0x2d7d   :  { %v1572_v6 = vpop.permute.xlu2 %1571 }
0x2d7e   :  { %v2403_v59 = vpop.eup %2402  ;;  %v1578_v7 = vmul.f32 %v2920_v12, %v1572_v6 }
0x2d7f   :  { %1966 = vrot.lane.b32.xlu0 %v2403_v59, %s2419_s30 }
0x2d80   :  { %v1586_v9 = vadd.f32 %v2926_v17, %v1578_v7 }
0x2df1   :  { %v1967_v60 = vpop.permute.xlu0 %1966 }
0x2df2   :  { %v1969_v61 = vmul.f32 %v1967_v60, %v1950_v53 }
0x2df4   :  { %1971 = vrot.lane.b32.xlu1 %v1969_v61, %s2416_s25 }
0x2e66   :  { %v1972_v62 = vpop.permute.xlu1 %1971 }
0x2e67   :  { %2221 = vmatmul.msk.f32.vlgmr.msra.gmra.mxu0 %vm1017_vm12, %v1972_v62  ;;  %2225 = vmatmul.msk.f32.vlgmr.msra.gmra.mxu2 %vm1017_vm12, %v1972_v62 }
0x2ee4   :  { %v1992_v1 = vpop.f32.mrf.mxu0 }
0x2ee5   :  { %v1993_v3 = vadd.f32 %v2990_v47, %v1992_v1 }
0x2ee7   :  { %2222 = vst.msk [vmem:[%s3077_s21 + $0x18] sm:$0xff] %vm1547_vm14, %v1993_v3  ;;  %2224 = vmatmul.msk.f32.vlgmr.msra.gmra.mxu1 %vm1547_vm14, %v1993_v3 }
0x2eea   :  { %v2038_v11 = vpop.f32.mrf.mxu2 }
0x2f64   :  { %v2017_v14 = vpop.f32.mrf.mxu1 }
0x2f65   :  { %v2018_v16 = vadd.f32 %v2017_v14, %v1586_v9 }
0x2f67   :  { %v2020_v10 = vmax.f32 %v2018_v16, 0.0 }
0x2f69   :  { %2227 = vmatmul.msk.f32.vlgmr.msra.gmra.mxu3 %vm1634_vm15, %v2020_v10 }
0x2fec   :  { %v2061_v4 = vpop.f32.mrf.mxu3 }
0x2fed   :  { %v2062_v13 = vadd.f32 %v2061_v4, %v2038_v11 }
0x2fef   :  { %v2064_v15 = vadd.f32 %v2935_v8, %v2062_v13 }
0x2ff1   :  { %2404 = vtanh.f32 %v2064_v15  ;;  %v2228_v19 = vmul.f32 -1.442695, %v2064_v15 }
0x2ff3   :  { %2406 = vpow2.f32 %v2228_v19 }
0x2ff7   :  { %v2405_v18 = vpop.eup %2404 }
0x2ff8   :  { %2087 = vrot.lane.b32.xlu0 %v2405_v18, %s2419_s30 }
0x2ff9   :  { %v2407_v20 = vpop.eup %2406 }
0x2ffa   :  { %v2068_v12 = vadd.f32 1.0, %v2407_v20 }
0x2ffc   :  { %2408 = vrcp.f32 %v2068_v12  ;;  %v2080_v23 = vand.u32 2147483648, %v2068_v12  ;;  %vm2074_vm15 = vweird.f32 %v2068_v12  ;;  %v2078_v24 = vand.u32 2147483647, %v2068_v12 }
0x2ffe   :  { %v2081_v27 = vor.u32 1.1754944e-38, %v2080_v23  ;;  %vm2079_vm1 = vcmp.eq.f32.partialorder %v2078_v24, 8.507059e+37 }
0x3002   :  { %v2409_v17 = vpop.eup %2408 }
0x3003   :  { %v2070_v5 = vmul.f32 %v2409_v17, %v2068_v12  ;;  %vm2075_vm13 = vweird.f32 %v2409_v17 }
0x3004   :  { %vm2076_vm0 = vmor %vm2074_vm15, %vm2075_vm13 }
0x3005   :  { %v2071_v21 = vsub.f32 1.0, %v2070_v5 }
0x3007   :  { %v2072_v22 = vmul.f32 %v2409_v17, %v2071_v21 }
0x3009   :  { %v2073_v51 = vadd.f32 %v2409_v17, %v2072_v22 }
0x300b   :  { %v2077_v8 = vsel %vm2076_vm0, %v2409_v17, %v2073_v51 }
0x300c   :  { %v2082_v29 = vsel %vm2079_vm1, %v2081_v27, %v2077_v8 }
0x300d   :  { %v2085_v26 = vmul.f32 %v2082_v29, %v1963_v50 }
0x306a   :  { %v2088_v28 = vpop.permute.xlu0 %2087 }
0x306b   :  { %v2090_v25 = vmul.f32 %v2088_v28, %v2082_v29 }
0x306d   :  { %2092 = vrot.lane.b32.xlu1 %v2090_v25, %s2416_s25 }
0x30df   :  { %v2093_v2 = vpop.permute.xlu1 %2092 }
0x30e0   :  { %v2095_v30 = vadd.f32 %v2093_v2, %v2085_v26 }
0x30e2   :  { %2410 = vtanh.f32 %v2095_v30 }
0x30e8   :  { %v2411_v31 = vpop.eup %2410 }
0x30e9   :  { %2098 = vrot.lane.b32.xlu2 %v2411_v31, %s2419_s30 }
0x3143   :  { %v2099_v32 = vpop.permute.xlu2 %2098 }
0x3144   :  { %v2101_v35 = vmul.f32 %v2099_v32, %v2082_v29 }
0x3146   :  { %2103 = vrot.lane.b32.xlu0 %v2101_v35, %s2416_s25 }
0x31b8   :  { %v2104_v36 = vpop.permute.xlu0 %2103 }
0x31b9   :  { %2229 = vmatmul.msk.f32.vlgmr.msrb.gmra.mxu0 %vm1017_vm12, %v2104_v36 }
0x3236   :  { %v2124_v37 = vpop.f32.mrf.mxu0 }
0x3237   :  { %v2125_v38 = vadd.f32 %v2990_v47, %v2124_v37 }
0x3239   :  { %2230 = vst.msk [vmem:[%s3077_s21 + $0x20] sm:$0xff] %vm1547_vm14, %v2125_v38 }

</bundles_post_ra>
